<compile_context>
chip_gen: v7x
topology: tpu7x:2x2x1
jax: 0.10.0
libtpu: 0.0.40
codegen_flags: <defaults>
</compile_context>

<pallas_src>
import functools

import jax
import jax.numpy as jnp
from jax.experimental import pallas as pl
from jax.experimental.pallas import tpu as pltpu


# ------------------------------------------------------------------
# Fused kernel: embed -> 2-layer LSTM -> FC -> ReLU -> LogSoftmax
# ------------------------------------------------------------------
def fused_rnn_kernel(tok_ref, emb_ref, wih0_ref, whh0_ref, b0_ref,
                     w1_ref, b1_ref, fcw_ref, fcb_ref, out_ref, *, gate_pad):
    """tok_ref: (T,) int32 in SMEM; emb_ref: (vocab, E);
    wih0_ref: (E, 4G); whh0_ref: (G, 4G); b0_ref: (1, 4G);
    w1_ref: (2G, 4G); b1_ref: (1, 4G); fcw_ref: (G, V); fcb_ref: (1, V);
    out_ref: (T, V).  G = gate_pad (hidden padded to 128 lanes per gate)."""
    T = tok_ref.shape[0]
    G = gate_pad

    # --- in-kernel embedding gather (token ids from SMEM, table in VMEM) ---
    rows = [emb_ref[pl.ds(tok_ref[t], 1), :] for t in range(T)]
    x = jnp.concatenate(rows, axis=0)                                # (T, E)

    # --- hoisted layer-0 input projection: one batched MXU matmul ---
    g0_all = (jnp.dot(x, wih0_ref[...], preferred_element_type=jnp.float32)
              + b0_ref[...])                                         # (T, 4G)

    def act(g):
        # 128-lane-aligned slices: no sub-lane masking / relayout.
        i = jax.nn.sigmoid(g[:, 0 * G:1 * G])
        f = jax.nn.sigmoid(g[:, 1 * G:2 * G])
        cc = jnp.tanh(g[:, 2 * G:3 * G])
        o = jax.nn.sigmoid(g[:, 3 * G:4 * G])
        return i, f, cc, o

    zero = jnp.zeros((1, G), jnp.float32)
    h0 = c0 = h1 = c1 = zero
    h1_rows = []
    # Fully unrolled serial recurrence (T is small and static).
    for t in range(T):
        # layer 0: recurrent matmul only (input part precomputed in g0_all)
        g0 = g0_all[t:t + 1, :] + jnp.dot(h0, whh0_ref[...],
                                          preferred_element_type=jnp.float32)
        i0, f0, cc0, o0 = act(g0)
        c0 = f0 * c0 + i0 * cc0
        h0 = o0 * jnp.tanh(c0)

        # layer 1: single fused matmul over [h0_t, h1_prev]
        cat = jnp.concatenate([h0, h1], axis=1)                      # (1, 2G)
        g1 = (jnp.dot(cat, w1_ref[...], preferred_element_type=jnp.float32)
              + b1_ref[...])
        i1, f1, cc1, o1 = act(g1)
        c1 = f1 * c1 + i1 * cc1
        h1 = o1 * jnp.tanh(c1)
        h1_rows.append(h1)

    hs = jnp.concatenate(h1_rows, axis=0)                            # (T, G)

    # --- Linear(H -> V) + ReLU + LogSoftmax(dim=1), fused ---
    z = (jnp.dot(hs, fcw_ref[...], preferred_element_type=jnp.float32)
         + fcb_ref[...])
    z = jnp.maximum(z, 0.0)
    m = jnp.max(z, axis=1, keepdims=True)
    e = jnp.exp(z - m)
    lse = jnp.log(jnp.sum(e, axis=1, keepdims=True)) + m
    out_ref[...] = z - lse


# ------------------------------------------------------------------
# One-time weight repacking: gate-pad to 128-lane blocks, zero-pad hidden rows
# ------------------------------------------------------------------
def prepare_padded_params(params):
    H = params["whh0"].shape[0]
    G = max(128, ((H + 127) // 128) * 128)

    def pad_gate_cols(w):                     # (in, 4H) -> (in, 4G)
        out = jnp.zeros((w.shape[0], 4 * G), w.dtype)
        for k in range(4):
            out = out.at[:, k * G:k * G + H].set(w[:, k * H:(k + 1) * H])
        return out

    def pad_rows(w, rows):                    # (H, N) -> (rows, N)
        return jnp.zeros((rows, w.shape[1]), w.dtype).at[:w.shape[0], :].set(w)

    return {
        "gate_pad": G,
        "wih0p": pad_gate_cols(params["wih0"]),                       # (E, 4G)
        "whh0p": pad_rows(pad_gate_cols(params["whh0"]), G),          # (G, 4G)
        "b0p": pad_gate_cols(params["b0"]),                           # (1, 4G)
        "w1cat": jnp.concatenate(
            [pad_rows(pad_gate_cols(params["wih1"]), G),
             pad_rows(pad_gate_cols(params["whh1"]), G)], axis=0),    # (2G, 4G)
        "b1p": pad_gate_cols(params["b1"]),                           # (1, 4G)
        "fc_wp": pad_rows(params["fc_w"], G),                         # (G, V)
    }


# ------------------------------------------------------------------
# Wrapper
# ------------------------------------------------------------------
def rnn_model_forward(sentence, params, padded, is_test=False):
    """sentence: int index tensor of any shape; returns (T, vocab) log-probs
    (T = sentence.size), matching the PyTorch module with is_test=False."""
    tokens = sentence.reshape(-1).astype(jnp.int32)
    T = tokens.shape[0]
    V = params["fc_w"].shape[1]
    G = padded["gate_pad"]

    vmem = pl.BlockSpec(memory_space=pltpu.MemorySpace.VMEM)
    smem = pl.BlockSpec(memory_space=pltpu.MemorySpace.SMEM)

    out = pl.pallas_call(
        functools.partial(fused_rnn_kernel, gate_pad=G),
        out_shape=jax.ShapeDtypeStruct((T, V), jnp.float32),
        in_specs=[smem, vmem, vmem, vmem, vmem, vmem, vmem, vmem, vmem],
        out_specs=vmem,
    )(tokens,
      params["emb"].astype(jnp.float32),
      padded["wih0p"], padded["whh0p"], padded["b0p"],
      padded["w1cat"], padded["b1p"],
      padded["fc_wp"], params["fc_b"])

    if is_test:
        return out[-1:, :]
    return out


# ------------------------------------------------------------------
# Pure-JAX reference (unpadded weights) for correctness checking
# ------------------------------------------------------------------
def reference_forward(sentence, params):
    H = params["whh0"].shape[0]
    tokens = sentence.reshape(-1)
    x = jnp.take(params["emb"], tokens, axis=0).astype(jnp.float32)
    T = x.shape[0]

    def cell(x_row, h, c, wih, whh, b):
        g = x_row @ wih + h @ whh + b
        i = jax.nn.sigmoid(g[:, 0 * H:1 * H])
        f = jax.nn.sigmoid(g[:, 1 * H:2 * H])
        gg = jnp.tanh(g[:, 2 * H:3 * H])
        o = jax.nn.sigmoid(g[:, 3 * H:4 * H])
        c = f * c + i * gg
        h = o * jnp.tanh(c)
        return h, c

    z = jnp.zeros((1, H), jnp.float32)
    h0, c0, h1, c1 = z, z, z, z
    outs = []
    for t in range(T):
        h0, c0 = cell(x[t:t + 1], h0, c0, params["wih0"], params["whh0"], params["b0"])
        h1, c1 = cell(h0, h1, c1, params["wih1"], params["whh1"], params["b1"])
        outs.append(h1)
    hs = jnp.concatenate(outs, axis=0)
    zlin = jnp.maximum(hs @ params["fc_w"] + params["fc_b"], 0.0)
    return jax.nn.log_softmax(zlin, axis=1)


# ------------------------------------------------------------------
# Deterministic parameter construction (shapes follow the nn.Module __init__)
# ------------------------------------------------------------------
def init_params(key, vocab_len, embedding_dim, hidden_dim):
    ks = jax.random.split(key, 12)
    k_lstm = 1.0 / jnp.sqrt(hidden_dim)                   # PyTorch LSTM default init
    w_bound = jnp.sqrt(6.0 / (hidden_dim + vocab_len))    # weights_init for Linear

    def unif(k, shape, bound):
        return jax.random.uniform(k, shape, jnp.float32, -bound, bound)

    return {
        # nn.Embedding(vocab, E) default ~ N(0, 1)
        "emb": jax.random.normal(ks[0], (vocab_len, embedding_dim), jnp.float32),
        # LSTM layer 0: weight_ih (4H, E) stored transposed -> (E, 4H), etc.
        "wih0": unif(ks[1], (embedding_dim, 4 * hidden_dim), k_lstm),
        "whh0": unif(ks[2], (hidden_dim, 4 * hidden_dim), k_lstm),
        "b0": (unif(ks[3], (1, 4 * hidden_dim), k_lstm)
               + unif(ks[4], (1, 4 * hidden_dim), k_lstm)),   # b_ih + b_hh
        # LSTM layer 1: input is H-dim
        "wih1": unif(ks[5], (hidden_dim, 4 * hidden_dim), k_lstm),
        "whh1": unif(ks[6], (hidden_dim, 4 * hidden_dim), k_lstm),
        "b1": (unif(ks[7], (1, 4 * hidden_dim), k_lstm)
               + unif(ks[8], (1, 4 * hidden_dim), k_lstm)),
        # fc = nn.Linear(H, vocab); weights_init: uniform(-w_bound, w_bound), bias=0
        "fc_w": unif(ks[9], (hidden_dim, vocab_len), w_bound),   # stored (H, V)
        "fc_b": jnp.zeros((1, vocab_len), jnp.float32),
    }


if __name__ == "__main__":
    vocab_len = 64
    embedding_dim = 32
    lstm_hidden_dim = 32
    seq_len = 8

    key = jax.random.PRNGKey(0)
    k_param, k_sent = jax.random.split(key)
    params = init_params(k_param, vocab_len, embedding_dim, lstm_hidden_dim)
    padded = prepare_padded_params(params)
    sentence = jax.random.randint(k_sent, (seq_len,), 0, vocab_len, dtype=jnp.int32)

    out = rnn_model_forward(sentence, params, padded)
    out = jax.block_until_ready(out)

    assert out.shape == (seq_len, vocab_len)
    # log-softmax rows exponentiate-sum to ~1
    row_sums = jnp.exp(out).sum(axis=1)
    assert bool(jnp.all(jnp.abs(row_sums - 1.0) < 1e-4))
    # match the pure-JAX reference (loose tolerance for MXU/EUP approximations)
    ref = reference_forward(sentence, params)
    max_err = float(jnp.max(jnp.abs(out - ref)))
    assert max_err < 5e-3, max_err
    print("KERNEL_OK")
</pallas_src>

<mosaic_0001>
module attributes {stable_mosaic.version = 11 : i64} {
  func.func @fused_rnn_kernel(%arg0: memref<8xi32, #tpu.memory_space<smem>>, %arg1: memref<64x32xf32, #tpu.memory_space<vmem>>, %arg2: memref<32x512xf32, #tpu.memory_space<vmem>>, %arg3: memref<128x512xf32, #tpu.memory_space<vmem>>, %arg4: memref<1x512xf32, #tpu.memory_space<vmem>>, %arg5: memref<256x512xf32, #tpu.memory_space<vmem>>, %arg6: memref<1x512xf32, #tpu.memory_space<vmem>>, %arg7: memref<128x64xf32, #tpu.memory_space<vmem>>, %arg8: memref<1x64xf32, #tpu.memory_space<vmem>>, %arg9: memref<8x64xf32, #tpu.memory_space<vmem>>) attributes {dimension_semantics = [], scalar_prefetch = 0 : i64, scratch_operands = 0 : i64, tpu.core_type = #tpu.core_type<tc>} {
    %c0 = arith.constant 0 : index
    %0 = memref.load %arg0[%c0] : memref<8xi32, #tpu.memory_space<smem>>
    %1 = arith.index_cast %0 : i32 to index
    %c0_0 = arith.constant 0 : index
    %2 = vector.load %arg1[%1, %c0_0] : memref<64x32xf32, #tpu.memory_space<vmem>>, vector<1x32xf32>
    %c1 = arith.constant 1 : index
    %3 = memref.load %arg0[%c1] : memref<8xi32, #tpu.memory_space<smem>>
    %4 = arith.index_cast %3 : i32 to index
    %c0_1 = arith.constant 0 : index
    %5 = vector.load %arg1[%4, %c0_1] : memref<64x32xf32, #tpu.memory_space<vmem>>, vector<1x32xf32>
    %c2 = arith.constant 2 : index
    %6 = memref.load %arg0[%c2] : memref<8xi32, #tpu.memory_space<smem>>
    %7 = arith.index_cast %6 : i32 to index
    %c0_2 = arith.constant 0 : index
    %8 = vector.load %arg1[%7, %c0_2] : memref<64x32xf32, #tpu.memory_space<vmem>>, vector<1x32xf32>
    %c3 = arith.constant 3 : index
    %9 = memref.load %arg0[%c3] : memref<8xi32, #tpu.memory_space<smem>>
    %10 = arith.index_cast %9 : i32 to index
    %c0_3 = arith.constant 0 : index
    %11 = vector.load %arg1[%10, %c0_3] : memref<64x32xf32, #tpu.memory_space<vmem>>, vector<1x32xf32>
    %c4 = arith.constant 4 : index
    %12 = memref.load %arg0[%c4] : memref<8xi32, #tpu.memory_space<smem>>
    %13 = arith.index_cast %12 : i32 to index
    %c0_4 = arith.constant 0 : index
    %14 = vector.load %arg1[%13, %c0_4] : memref<64x32xf32, #tpu.memory_space<vmem>>, vector<1x32xf32>
    %c5 = arith.constant 5 : index
    %15 = memref.load %arg0[%c5] : memref<8xi32, #tpu.memory_space<smem>>
    %16 = arith.index_cast %15 : i32 to index
    %c0_5 = arith.constant 0 : index
    %17 = vector.load %arg1[%16, %c0_5] : memref<64x32xf32, #tpu.memory_space<vmem>>, vector<1x32xf32>
    %c6 = arith.constant 6 : index
    %18 = memref.load %arg0[%c6] : memref<8xi32, #tpu.memory_space<smem>>
    %19 = arith.index_cast %18 : i32 to index
    %c0_6 = arith.constant 0 : index
    %20 = vector.load %arg1[%19, %c0_6] : memref<64x32xf32, #tpu.memory_space<vmem>>, vector<1x32xf32>
    %c7 = arith.constant 7 : index
    %21 = memref.load %arg0[%c7] : memref<8xi32, #tpu.memory_space<smem>>
    %22 = arith.index_cast %21 : i32 to index
    %c0_7 = arith.constant 0 : index
    %23 = vector.load %arg1[%22, %c0_7] : memref<64x32xf32, #tpu.memory_space<vmem>>, vector<1x32xf32>
    %24 = tpu.concatenate %2, %5, %8, %11, %14, %17, %20, %23 in 0 : vector<1x32xf32>, vector<1x32xf32>, vector<1x32xf32>, vector<1x32xf32>, vector<1x32xf32>, vector<1x32xf32>, vector<1x32xf32>, vector<1x32xf32> -> vector<8x32xf32>
    %c0_8 = arith.constant 0 : index
    %c0_9 = arith.constant 0 : index
    %25 = vector.load %arg2[%c0_8, %c0_9] : memref<32x512xf32, #tpu.memory_space<vmem>>, vector<32x512xf32>
    %cst = arith.constant dense<0.000000e+00> : vector<8x512xf32>
    %26 = tpu.matmul %24, %25, %cst {dimension_numbers = #tpu.dot_dimension_numbers<[1], [0], [0], [1], [0, 0, 1, 1], [], []>} : vector<8x32xf32>, vector<32x512xf32>, vector<8x512xf32> -> vector<8x512xf32>
    %c0_10 = arith.constant 0 : index
    %c0_11 = arith.constant 0 : index
    %27 = vector.load %arg4[%c0_10, %c0_11] : memref<1x512xf32, #tpu.memory_space<vmem>>, vector<1x512xf32>
    %28 = vector.broadcast %27 : vector<1x512xf32> to vector<8x512xf32>
    %29 = arith.addf %26, %28 : vector<8x512xf32>
    %cst_12 = arith.constant 0.000000e+00 : f32
    %30 = vector.broadcast %cst_12 : f32 to vector<1x128xf32>
    %31 = vector.extract_strided_slice %29 {offsets = [0, 0], sizes = [1, 512], strides = [1, 1]} : vector<8x512xf32> to vector<1x512xf32>
    %c0_13 = arith.constant 0 : index
    %c0_14 = arith.constant 0 : index
    %32 = vector.load %arg3[%c0_13, %c0_14] : memref<128x512xf32, #tpu.memory_space<vmem>>, vector<128x512xf32>
    %cst_15 = arith.constant dense<0.000000e+00> : vector<1x512xf32>
    %33 = tpu.matmul %30, %32, %cst_15 {dimension_numbers = #tpu.dot_dimension_numbers<[1], [0], [0], [1], [0, 0, 1, 1], [], []>} : vector<1x128xf32>, vector<128x512xf32>, vector<1x512xf32> -> vector<1x512xf32>
    %34 = arith.addf %31, %33 : vector<1x512xf32>
    %35 = vector.extract_strided_slice %34 {offsets = [0, 0], sizes = [1, 128], strides = [1, 1]} : vector<1x512xf32> to vector<1x128xf32>
    %36 = arith.negf %35 : vector<1x128xf32>
    %37 = math.exp %36 : vector<1x128xf32>
    %cst_16 = arith.constant 1.000000e+00 : f32
    %38 = vector.broadcast %cst_16 : f32 to vector<1x128xf32>
    %39 = arith.addf %38, %37 : vector<1x128xf32>
    %40 = arith.divf %38, %39 : vector<1x128xf32>
    %41 = vector.extract_strided_slice %34 {offsets = [0, 128], sizes = [1, 128], strides = [1, 1]} : vector<1x512xf32> to vector<1x128xf32>
    %42 = arith.negf %41 : vector<1x128xf32>
    %43 = math.exp %42 : vector<1x128xf32>
    %cst_17 = arith.constant 1.000000e+00 : f32
    %44 = vector.broadcast %cst_17 : f32 to vector<1x128xf32>
    %45 = arith.addf %44, %43 : vector<1x128xf32>
    %46 = arith.divf %44, %45 : vector<1x128xf32>
    %47 = vector.extract_strided_slice %34 {offsets = [0, 256], sizes = [1, 128], strides = [1, 1]} : vector<1x512xf32> to vector<1x128xf32>
    %48 = math.tanh %47 : vector<1x128xf32>
    %49 = vector.extract_strided_slice %34 {offsets = [0, 384], sizes = [1, 128], strides = [1, 1]} : vector<1x512xf32> to vector<1x128xf32>
    %50 = arith.negf %49 : vector<1x128xf32>
    %51 = math.exp %50 : vector<1x128xf32>
    %cst_18 = arith.constant 1.000000e+00 : f32
    %52 = vector.broadcast %cst_18 : f32 to vector<1x128xf32>
    %53 = arith.addf %52, %51 : vector<1x128xf32>
    %54 = arith.divf %52, %53 : vector<1x128xf32>
    %55 = arith.mulf %46, %30 : vector<1x128xf32>
    %56 = arith.mulf %40, %48 : vector<1x128xf32>
    %57 = arith.addf %55, %56 : vector<1x128xf32>
    %58 = math.tanh %57 : vector<1x128xf32>
    %59 = arith.mulf %54, %58 : vector<1x128xf32>
    %60 = tpu.concatenate %59, %30 in 1 : vector<1x128xf32>, vector<1x128xf32> -> vector<1x256xf32>
    %c0_19 = arith.constant 0 : index
    %c0_20 = arith.constant 0 : index
    %61 = vector.load %arg5[%c0_19, %c0_20] : memref<256x512xf32, #tpu.memory_space<vmem>>, vector<256x512xf32>
    %cst_21 = arith.constant dense<0.000000e+00> : vector<1x512xf32>
    %62 = tpu.matmul %60, %61, %cst_21 {dimension_numbers = #tpu.dot_dimension_numbers<[1], [0], [0], [1], [0, 0, 1, 1], [], []>} : vector<1x256xf32>, vector<256x512xf32>, vector<1x512xf32> -> vector<1x512xf32>
    %c0_22 = arith.constant 0 : index
    %c0_23 = arith.constant 0 : index
    %63 = vector.load %arg6[%c0_22, %c0_23] : memref<1x512xf32, #tpu.memory_space<vmem>>, vector<1x512xf32>
    %64 = arith.addf %62, %63 : vector<1x512xf32>
    %65 = vector.extract_strided_slice %64 {offsets = [0, 0], sizes = [1, 128], strides = [1, 1]} : vector<1x512xf32> to vector<1x128xf32>
    %66 = arith.negf %65 : vector<1x128xf32>
    %67 = math.exp %66 : vector<1x128xf32>
    %cst_24 = arith.constant 1.000000e+00 : f32
    %68 = vector.broadcast %cst_24 : f32 to vector<1x128xf32>
    %69 = arith.addf %68, %67 : vector<1x128xf32>
    %70 = arith.divf %68, %69 : vector<1x128xf32>
    %71 = vector.extract_strided_slice %64 {offsets = [0, 128], sizes = [1, 128], strides = [1, 1]} : vector<1x512xf32> to vector<1x128xf32>
    %72 = arith.negf %71 : vector<1x128xf32>
    %73 = math.exp %72 : vector<1x128xf32>
    %cst_25 = arith.constant 1.000000e+00 : f32
    %74 = vector.broadcast %cst_25 : f32 to vector<1x128xf32>
    %75 = arith.addf %74, %73 : vector<1x128xf32>
    %76 = arith.divf %74, %75 : vector<1x128xf32>
    %77 = vector.extract_strided_slice %64 {offsets = [0, 256], sizes = [1, 128], strides = [1, 1]} : vector<1x512xf32> to vector<1x128xf32>
    %78 = math.tanh %77 : vector<1x128xf32>
    %79 = vector.extract_strided_slice %64 {offsets = [0, 384], sizes = [1, 128], strides = [1, 1]} : vector<1x512xf32> to vector<1x128xf32>
    %80 = arith.negf %79 : vector<1x128xf32>
    %81 = math.exp %80 : vector<1x128xf32>
    %cst_26 = arith.constant 1.000000e+00 : f32
    %82 = vector.broadcast %cst_26 : f32 to vector<1x128xf32>
    %83 = arith.addf %82, %81 : vector<1x128xf32>
    %84 = arith.divf %82, %83 : vector<1x128xf32>
    %85 = arith.mulf %76, %30 : vector<1x128xf32>
    %86 = arith.mulf %70, %78 : vector<1x128xf32>
    %87 = arith.addf %85, %86 : vector<1x128xf32>
    %88 = math.tanh %87 : vector<1x128xf32>
    %89 = arith.mulf %84, %88 : vector<1x128xf32>
    %90 = vector.extract_strided_slice %29 {offsets = [1, 0], sizes = [1, 512], strides = [1, 1]} : vector<8x512xf32> to vector<1x512xf32>
    %c0_27 = arith.constant 0 : index
    %c0_28 = arith.constant 0 : index
    %91 = vector.load %arg3[%c0_27, %c0_28] : memref<128x512xf32, #tpu.memory_space<vmem>>, vector<128x512xf32>
    %cst_29 = arith.constant dense<0.000000e+00> : vector<1x512xf32>
    %92 = tpu.matmul %59, %91, %cst_29 {dimension_numbers = #tpu.dot_dimension_numbers<[1], [0], [0], [1], [0, 0, 1, 1], [], []>} : vector<1x128xf32>, vector<128x512xf32>, vector<1x512xf32> -> vector<1x512xf32>
    %93 = arith.addf %90, %92 : vector<1x512xf32>
    %94 = vector.extract_strided_slice %93 {offsets = [0, 0], sizes = [1, 128], strides = [1, 1]} : vector<1x512xf32> to vector<1x128xf32>
    %95 = arith.negf %94 : vector<1x128xf32>
    %96 = math.exp %95 : vector<1x128xf32>
    %cst_30 = arith.constant 1.000000e+00 : f32
    %97 = vector.broadcast %cst_30 : f32 to vector<1x128xf32>
    %98 = arith.addf %97, %96 : vector<1x128xf32>
    %99 = arith.divf %97, %98 : vector<1x128xf32>
    %100 = vector.extract_strided_slice %93 {offsets = [0, 128], sizes = [1, 128], strides = [1, 1]} : vector<1x512xf32> to vector<1x128xf32>
    %101 = arith.negf %100 : vector<1x128xf32>
    %102 = math.exp %101 : vector<1x128xf32>
    %cst_31 = arith.constant 1.000000e+00 : f32
    %103 = vector.broadcast %cst_31 : f32 to vector<1x128xf32>
    %104 = arith.addf %103, %102 : vector<1x128xf32>
    %105 = arith.divf %103, %104 : vector<1x128xf32>
    %106 = vector.extract_strided_slice %93 {offsets = [0, 256], sizes = [1, 128], strides = [1, 1]} : vector<1x512xf32> to vector<1x128xf32>
    %107 = math.tanh %106 : vector<1x128xf32>
    %108 = vector.extract_strided_slice %93 {offsets = [0, 384], sizes = [1, 128], strides = [1, 1]} : vector<1x512xf32> to vector<1x128xf32>
    %109 = arith.negf %108 : vector<1x128xf32>
    %110 = math.exp %109 : vector<1x128xf32>
    %cst_32 = arith.constant 1.000000e+00 : f32
    %111 = vector.broadcast %cst_32 : f32 to vector<1x128xf32>
    %112 = arith.addf %111, %110 : vector<1x128xf32>
    %113 = arith.divf %111, %112 : vector<1x128xf32>
    %114 = arith.mulf %105, %57 : vector<1x128xf32>
    %115 = arith.mulf %99, %107 : vector<1x128xf32>
    %116 = arith.addf %114, %115 : vector<1x128xf32>
    %117 = math.tanh %116 : vector<1x128xf32>
    %118 = arith.mulf %113, %117 : vector<1x128xf32>
    %119 = tpu.concatenate %118, %89 in 1 : vector<1x128xf32>, vector<1x128xf32> -> vector<1x256xf32>
    %c0_33 = arith.constant 0 : index
    %c0_34 = arith.constant 0 : index
    %120 = vector.load %arg5[%c0_33, %c0_34] : memref<256x512xf32, #tpu.memory_space<vmem>>, vector<256x512xf32>
    %cst_35 = arith.constant dense<0.000000e+00> : vector<1x512xf32>
    %121 = tpu.matmul %119, %120, %cst_35 {dimension_numbers = #tpu.dot_dimension_numbers<[1], [0], [0], [1], [0, 0, 1, 1], [], []>} : vector<1x256xf32>, vector<256x512xf32>, vector<1x512xf32> -> vector<1x512xf32>
    %c0_36 = arith.constant 0 : index
    %c0_37 = arith.constant 0 : index
    %122 = vector.load %arg6[%c0_36, %c0_37] : memref<1x512xf32, #tpu.memory_space<vmem>>, vector<1x512xf32>
    %123 = arith.addf %121, %122 : vector<1x512xf32>
    %124 = vector.extract_strided_slice %123 {offsets = [0, 0], sizes = [1, 128], strides = [1, 1]} : vector<1x512xf32> to vector<1x128xf32>
    %125 = arith.negf %124 : vector<1x128xf32>
    %126 = math.exp %125 : vector<1x128xf32>
    %cst_38 = arith.constant 1.000000e+00 : f32
    %127 = vector.broadcast %cst_38 : f32 to vector<1x128xf32>
    %128 = arith.addf %127, %126 : vector<1x128xf32>
    %129 = arith.divf %127, %128 : vector<1x128xf32>
    %130 = vector.extract_strided_slice %123 {offsets = [0, 128], sizes = [1, 128], strides = [1, 1]} : vector<1x512xf32> to vector<1x128xf32>
    %131 = arith.negf %130 : vector<1x128xf32>
    %132 = math.exp %131 : vector<1x128xf32>
    %cst_39 = arith.constant 1.000000e+00 : f32
    %133 = vector.broadcast %cst_39 : f32 to vector<1x128xf32>
    %134 = arith.addf %133, %132 : vector<1x128xf32>
    %135 = arith.divf %133, %134 : vector<1x128xf32>
    %136 = vector.extract_strided_slice %123 {offsets = [0, 256], sizes = [1, 128], strides = [1, 1]} : vector<1x512xf32> to vector<1x128xf32>
    %137 = math.tanh %136 : vector<1x128xf32>
    %138 = vector.extract_strided_slice %123 {offsets = [0, 384], sizes = [1, 128], strides = [1, 1]} : vector<1x512xf32> to vector<1x128xf32>
    %139 = arith.negf %138 : vector<1x128xf32>
    %140 = math.exp %139 : vector<1x128xf32>
    %cst_40 = arith.constant 1.000000e+00 : f32
    %141 = vector.broadcast %cst_40 : f32 to vector<1x128xf32>
    %142 = arith.addf %141, %140 : vector<1x128xf32>
    %143 = arith.divf %141, %142 : vector<1x128xf32>
    %144 = arith.mulf %135, %87 : vector<1x128xf32>
    %145 = arith.mulf %129, %137 : vector<1x128xf32>
    %146 = arith.addf %144, %145 : vector<1x128xf32>
    %147 = math.tanh %146 : vector<1x128xf32>
    %148 = arith.mulf %143, %147 : vector<1x128xf32>
    %149 = vector.extract_strided_slice %29 {offsets = [2, 0], sizes = [1, 512], strides = [1, 1]} : vector<8x512xf32> to vector<1x512xf32>
    %c0_41 = arith.constant 0 : index
    %c0_42 = arith.constant 0 : index
    %150 = vector.load %arg3[%c0_41, %c0_42] : memref<128x512xf32, #tpu.memory_space<vmem>>, vector<128x512xf32>
    %cst_43 = arith.constant dense<0.000000e+00> : vector<1x512xf32>
    %151 = tpu.matmul %118, %150, %cst_43 {dimension_numbers = #tpu.dot_dimension_numbers<[1], [0], [0], [1], [0, 0, 1, 1], [], []>} : vector<1x128xf32>, vector<128x512xf32>, vector<1x512xf32> -> vector<1x512xf32>
    %152 = arith.addf %149, %151 : vector<1x512xf32>
    %153 = vector.extract_strided_slice %152 {offsets = [0, 0], sizes = [1, 128], strides = [1, 1]} : vector<1x512xf32> to vector<1x128xf32>
    %154 = arith.negf %153 : vector<1x128xf32>
    %155 = math.exp %154 : vector<1x128xf32>
    %cst_44 = arith.constant 1.000000e+00 : f32
    %156 = vector.broadcast %cst_44 : f32 to vector<1x128xf32>
    %157 = arith.addf %156, %155 : vector<1x128xf32>
    %158 = arith.divf %156, %157 : vector<1x128xf32>
    %159 = vector.extract_strided_slice %152 {offsets = [0, 128], sizes = [1, 128], strides = [1, 1]} : vector<1x512xf32> to vector<1x128xf32>
    %160 = arith.negf %159 : vector<1x128xf32>
    %161 = math.exp %160 : vector<1x128xf32>
    %cst_45 = arith.constant 1.000000e+00 : f32
    %162 = vector.broadcast %cst_45 : f32 to vector<1x128xf32>
    %163 = arith.addf %162, %161 : vector<1x128xf32>
    %164 = arith.divf %162, %163 : vector<1x128xf32>
    %165 = vector.extract_strided_slice %152 {offsets = [0, 256], sizes = [1, 128], strides = [1, 1]} : vector<1x512xf32> to vector<1x128xf32>
    %166 = math.tanh %165 : vector<1x128xf32>
    %167 = vector.extract_strided_slice %152 {offsets = [0, 384], sizes = [1, 128], strides = [1, 1]} : vector<1x512xf32> to vector<1x128xf32>
    %168 = arith.negf %167 : vector<1x128xf32>
    %169 = math.exp %168 : vector<1x128xf32>
    %cst_46 = arith.constant 1.000000e+00 : f32
    %170 = vector.broadcast %cst_46 : f32 to vector<1x128xf32>
    %171 = arith.addf %170, %169 : vector<1x128xf32>
    %172 = arith.divf %170, %171 : vector<1x128xf32>
    %173 = arith.mulf %164, %116 : vector<1x128xf32>
    %174 = arith.mulf %158, %166 : vector<1x128xf32>
    %175 = arith.addf %173, %174 : vector<1x128xf32>
    %176 = math.tanh %175 : vector<1x128xf32>
    %177 = arith.mulf %172, %176 : vector<1x128xf32>
    %178 = tpu.concatenate %177, %148 in 1 : vector<1x128xf32>, vector<1x128xf32> -> vector<1x256xf32>
    %c0_47 = arith.constant 0 : index
    %c0_48 = arith.constant 0 : index
    %179 = vector.load %arg5[%c0_47, %c0_48] : memref<256x512xf32, #tpu.memory_space<vmem>>, vector<256x512xf32>
    %cst_49 = arith.constant dense<0.000000e+00> : vector<1x512xf32>
    %180 = tpu.matmul %178, %179, %cst_49 {dimension_numbers = #tpu.dot_dimension_numbers<[1], [0], [0], [1], [0, 0, 1, 1], [], []>} : vector<1x256xf32>, vector<256x512xf32>, vector<1x512xf32> -> vector<1x512xf32>
    %c0_50 = arith.constant 0 : index
    %c0_51 = arith.constant 0 : index
    %181 = vector.load %arg6[%c0_50, %c0_51] : memref<1x512xf32, #tpu.memory_space<vmem>>, vector<1x512xf32>
    %182 = arith.addf %180, %181 : vector<1x512xf32>
    %183 = vector.extract_strided_slice %182 {offsets = [0, 0], sizes = [1, 128], strides = [1, 1]} : vector<1x512xf32> to vector<1x128xf32>
    %184 = arith.negf %183 : vector<1x128xf32>
    %185 = math.exp %184 : vector<1x128xf32>
    %cst_52 = arith.constant 1.000000e+00 : f32
    %186 = vector.broadcast %cst_52 : f32 to vector<1x128xf32>
    %187 = arith.addf %186, %185 : vector<1x128xf32>
    %188 = arith.divf %186, %187 : vector<1x128xf32>
    %189 = vector.extract_strided_slice %182 {offsets = [0, 128], sizes = [1, 128], strides = [1, 1]} : vector<1x512xf32> to vector<1x128xf32>
    %190 = arith.negf %189 : vector<1x128xf32>
    %191 = math.exp %190 : vector<1x128xf32>
    %cst_53 = arith.constant 1.000000e+00 : f32
    %192 = vector.broadcast %cst_53 : f32 to vector<1x128xf32>
    %193 = arith.addf %192, %191 : vector<1x128xf32>
    %194 = arith.divf %192, %193 : vector<1x128xf32>
    %195 = vector.extract_strided_slice %182 {offsets = [0, 256], sizes = [1, 128], strides = [1, 1]} : vector<1x512xf32> to vector<1x128xf32>
    %196 = math.tanh %195 : vector<1x128xf32>
    %197 = vector.extract_strided_slice %182 {offsets = [0, 384], sizes = [1, 128], strides = [1, 1]} : vector<1x512xf32> to vector<1x128xf32>
    %198 = arith.negf %197 : vector<1x128xf32>
    %199 = math.exp %198 : vector<1x128xf32>
    %cst_54 = arith.constant 1.000000e+00 : f32
    %200 = vector.broadcast %cst_54 : f32 to vector<1x128xf32>
    %201 = arith.addf %200, %199 : vector<1x128xf32>
    %202 = arith.divf %200, %201 : vector<1x128xf32>
    %203 = arith.mulf %194, %146 : vector<1x128xf32>
    %204 = arith.mulf %188, %196 : vector<1x128xf32>
    %205 = arith.addf %203, %204 : vector<1x128xf32>
    %206 = math.tanh %205 : vector<1x128xf32>
    %207 = arith.mulf %202, %206 : vector<1x128xf32>
    %208 = vector.extract_strided_slice %29 {offsets = [3, 0], sizes = [1, 512], strides = [1, 1]} : vector<8x512xf32> to vector<1x512xf32>
    %c0_55 = arith.constant 0 : index
    %c0_56 = arith.constant 0 : index
    %209 = vector.load %arg3[%c0_55, %c0_56] : memref<128x512xf32, #tpu.memory_space<vmem>>, vector<128x512xf32>
    %cst_57 = arith.constant dense<0.000000e+00> : vector<1x512xf32>
    %210 = tpu.matmul %177, %209, %cst_57 {dimension_numbers = #tpu.dot_dimension_numbers<[1], [0], [0], [1], [0, 0, 1, 1], [], []>} : vector<1x128xf32>, vector<128x512xf32>, vector<1x512xf32> -> vector<1x512xf32>
    %211 = arith.addf %208, %210 : vector<1x512xf32>
    %212 = vector.extract_strided_slice %211 {offsets = [0, 0], sizes = [1, 128], strides = [1, 1]} : vector<1x512xf32> to vector<1x128xf32>
    %213 = arith.negf %212 : vector<1x128xf32>
    %214 = math.exp %213 : vector<1x128xf32>
    %cst_58 = arith.constant 1.000000e+00 : f32
    %215 = vector.broadcast %cst_58 : f32 to vector<1x128xf32>
    %216 = arith.addf %215, %214 : vector<1x128xf32>
    %217 = arith.divf %215, %216 : vector<1x128xf32>
    %218 = vector.extract_strided_slice %211 {offsets = [0, 128], sizes = [1, 128], strides = [1, 1]} : vector<1x512xf32> to vector<1x128xf32>
    %219 = arith.negf %218 : vector<1x128xf32>
    %220 = math.exp %219 : vector<1x128xf32>
    %cst_59 = arith.constant 1.000000e+00 : f32
    %221 = vector.broadcast %cst_59 : f32 to vector<1x128xf32>
    %222 = arith.addf %221, %220 : vector<1x128xf32>
    %223 = arith.divf %221, %222 : vector<1x128xf32>
    %224 = vector.extract_strided_slice %211 {offsets = [0, 256], sizes = [1, 128], strides = [1, 1]} : vector<1x512xf32> to vector<1x128xf32>
    %225 = math.tanh %224 : vector<1x128xf32>
    %226 = vector.extract_strided_slice %211 {offsets = [0, 384], sizes = [1, 128], strides = [1, 1]} : vector<1x512xf32> to vector<1x128xf32>
    %227 = arith.negf %226 : vector<1x128xf32>
    %228 = math.exp %227 : vector<1x128xf32>
    %cst_60 = arith.constant 1.000000e+00 : f32
    %229 = vector.broadcast %cst_60 : f32 to vector<1x128xf32>
    %230 = arith.addf %229, %228 : vector<1x128xf32>
    %231 = arith.divf %229, %230 : vector<1x128xf32>
    %232 = arith.mulf %223, %175 : vector<1x128xf32>
    %233 = arith.mulf %217, %225 : vector<1x128xf32>
    %234 = arith.addf %232, %233 : vector<1x128xf32>
    %235 = math.tanh %234 : vector<1x128xf32>
    %236 = arith.mulf %231, %235 : vector<1x128xf32>
    %237 = tpu.concatenate %236, %207 in 1 : vector<1x128xf32>, vector<1x128xf32> -> vector<1x256xf32>
    %c0_61 = arith.constant 0 : index
    %c0_62 = arith.constant 0 : index
    %238 = vector.load %arg5[%c0_61, %c0_62] : memref<256x512xf32, #tpu.memory_space<vmem>>, vector<256x512xf32>
    %cst_63 = arith.constant dense<0.000000e+00> : vector<1x512xf32>
    %239 = tpu.matmul %237, %238, %cst_63 {dimension_numbers = #tpu.dot_dimension_numbers<[1], [0], [0], [1], [0, 0, 1, 1], [], []>} : vector<1x256xf32>, vector<256x512xf32>, vector<1x512xf32> -> vector<1x512xf32>
    %c0_64 = arith.constant 0 : index
    %c0_65 = arith.constant 0 : index
    %240 = vector.load %arg6[%c0_64, %c0_65] : memref<1x512xf32, #tpu.memory_space<vmem>>, vector<1x512xf32>
    %241 = arith.addf %239, %240 : vector<1x512xf32>
    %242 = vector.extract_strided_slice %241 {offsets = [0, 0], sizes = [1, 128], strides = [1, 1]} : vector<1x512xf32> to vector<1x128xf32>
    %243 = arith.negf %242 : vector<1x128xf32>
    %244 = math.exp %243 : vector<1x128xf32>
    %cst_66 = arith.constant 1.000000e+00 : f32
    %245 = vector.broadcast %cst_66 : f32 to vector<1x128xf32>
    %246 = arith.addf %245, %244 : vector<1x128xf32>
    %247 = arith.divf %245, %246 : vector<1x128xf32>
    %248 = vector.extract_strided_slice %241 {offsets = [0, 128], sizes = [1, 128], strides = [1, 1]} : vector<1x512xf32> to vector<1x128xf32>
    %249 = arith.negf %248 : vector<1x128xf32>
    %250 = math.exp %249 : vector<1x128xf32>
    %cst_67 = arith.constant 1.000000e+00 : f32
    %251 = vector.broadcast %cst_67 : f32 to vector<1x128xf32>
    %252 = arith.addf %251, %250 : vector<1x128xf32>
    %253 = arith.divf %251, %252 : vector<1x128xf32>
    %254 = vector.extract_strided_slice %241 {offsets = [0, 256], sizes = [1, 128], strides = [1, 1]} : vector<1x512xf32> to vector<1x128xf32>
    %255 = math.tanh %254 : vector<1x128xf32>
    %256 = vector.extract_strided_slice %241 {offsets = [0, 384], sizes = [1, 128], strides = [1, 1]} : vector<1x512xf32> to vector<1x128xf32>
    %257 = arith.negf %256 : vector<1x128xf32>
    %258 = math.exp %257 : vector<1x128xf32>
    %cst_68 = arith.constant 1.000000e+00 : f32
    %259 = vector.broadcast %cst_68 : f32 to vector<1x128xf32>
    %260 = arith.addf %259, %258 : vector<1x128xf32>
    %261 = arith.divf %259, %260 : vector<1x128xf32>
    %262 = arith.mulf %253, %205 : vector<1x128xf32>
    %263 = arith.mulf %247, %255 : vector<1x128xf32>
    %264 = arith.addf %262, %263 : vector<1x128xf32>
    %265 = math.tanh %264 : vector<1x128xf32>
    %266 = arith.mulf %261, %265 : vector<1x128xf32>
    %267 = vector.extract_strided_slice %29 {offsets = [4, 0], sizes = [1, 512], strides = [1, 1]} : vector<8x512xf32> to vector<1x512xf32>
    %c0_69 = arith.constant 0 : index
    %c0_70 = arith.constant 0 : index
    %268 = vector.load %arg3[%c0_69, %c0_70] : memref<128x512xf32, #tpu.memory_space<vmem>>, vector<128x512xf32>
    %cst_71 = arith.constant dense<0.000000e+00> : vector<1x512xf32>
    %269 = tpu.matmul %236, %268, %cst_71 {dimension_numbers = #tpu.dot_dimension_numbers<[1], [0], [0], [1], [0, 0, 1, 1], [], []>} : vector<1x128xf32>, vector<128x512xf32>, vector<1x512xf32> -> vector<1x512xf32>
    %270 = arith.addf %267, %269 : vector<1x512xf32>
    %271 = vector.extract_strided_slice %270 {offsets = [0, 0], sizes = [1, 128], strides = [1, 1]} : vector<1x512xf32> to vector<1x128xf32>
    %272 = arith.negf %271 : vector<1x128xf32>
    %273 = math.exp %272 : vector<1x128xf32>
    %cst_72 = arith.constant 1.000000e+00 : f32
    %274 = vector.broadcast %cst_72 : f32 to vector<1x128xf32>
    %275 = arith.addf %274, %273 : vector<1x128xf32>
    %276 = arith.divf %274, %275 : vector<1x128xf32>
    %277 = vector.extract_strided_slice %270 {offsets = [0, 128], sizes = [1, 128], strides = [1, 1]} : vector<1x512xf32> to vector<1x128xf32>
    %278 = arith.negf %277 : vector<1x128xf32>
    %279 = math.exp %278 : vector<1x128xf32>
    %cst_73 = arith.constant 1.000000e+00 : f32
    %280 = vector.broadcast %cst_73 : f32 to vector<1x128xf32>
    %281 = arith.addf %280, %279 : vector<1x128xf32>
    %282 = arith.divf %280, %281 : vector<1x128xf32>
    %283 = vector.extract_strided_slice %270 {offsets = [0, 256], sizes = [1, 128], strides = [1, 1]} : vector<1x512xf32> to vector<1x128xf32>
    %284 = math.tanh %283 : vector<1x128xf32>
    %285 = vector.extract_strided_slice %270 {offsets = [0, 384], sizes = [1, 128], strides = [1, 1]} : vector<1x512xf32> to vector<1x128xf32>
    %286 = arith.negf %285 : vector<1x128xf32>
    %287 = math.exp %286 : vector<1x128xf32>
    %cst_74 = arith.constant 1.000000e+00 : f32
    %288 = vector.broadcast %cst_74 : f32 to vector<1x128xf32>
    %289 = arith.addf %288, %287 : vector<1x128xf32>
    %290 = arith.divf %288, %289 : vector<1x128xf32>
    %291 = arith.mulf %282, %234 : vector<1x128xf32>
    %292 = arith.mulf %276, %284 : vector<1x128xf32>
    %293 = arith.addf %291, %292 : vector<1x128xf32>
    %294 = math.tanh %293 : vector<1x128xf32>
    %295 = arith.mulf %290, %294 : vector<1x128xf32>
    %296 = tpu.concatenate %295, %266 in 1 : vector<1x128xf32>, vector<1x128xf32> -> vector<1x256xf32>
    %c0_75 = arith.constant 0 : index
    %c0_76 = arith.constant 0 : index
    %297 = vector.load %arg5[%c0_75, %c0_76] : memref<256x512xf32, #tpu.memory_space<vmem>>, vector<256x512xf32>
    %cst_77 = arith.constant dense<0.000000e+00> : vector<1x512xf32>
    %298 = tpu.matmul %296, %297, %cst_77 {dimension_numbers = #tpu.dot_dimension_numbers<[1], [0], [0], [1], [0, 0, 1, 1], [], []>} : vector<1x256xf32>, vector<256x512xf32>, vector<1x512xf32> -> vector<1x512xf32>
    %c0_78 = arith.constant 0 : index
    %c0_79 = arith.constant 0 : index
    %299 = vector.load %arg6[%c0_78, %c0_79] : memref<1x512xf32, #tpu.memory_space<vmem>>, vector<1x512xf32>
    %300 = arith.addf %298, %299 : vector<1x512xf32>
    %301 = vector.extract_strided_slice %300 {offsets = [0, 0], sizes = [1, 128], strides = [1, 1]} : vector<1x512xf32> to vector<1x128xf32>
    %302 = arith.negf %301 : vector<1x128xf32>
    %303 = math.exp %302 : vector<1x128xf32>
    %cst_80 = arith.constant 1.000000e+00 : f32
    %304 = vector.broadcast %cst_80 : f32 to vector<1x128xf32>
    %305 = arith.addf %304, %303 : vector<1x128xf32>
    %306 = arith.divf %304, %305 : vector<1x128xf32>
    %307 = vector.extract_strided_slice %300 {offsets = [0, 128], sizes = [1, 128], strides = [1, 1]} : vector<1x512xf32> to vector<1x128xf32>
    %308 = arith.negf %307 : vector<1x128xf32>
    %309 = math.exp %308 : vector<1x128xf32>
    %cst_81 = arith.constant 1.000000e+00 : f32
    %310 = vector.broadcast %cst_81 : f32 to vector<1x128xf32>
    %311 = arith.addf %310, %309 : vector<1x128xf32>
    %312 = arith.divf %310, %311 : vector<1x128xf32>
    %313 = vector.extract_strided_slice %300 {offsets = [0, 256], sizes = [1, 128], strides = [1, 1]} : vector<1x512xf32> to vector<1x128xf32>
    %314 = math.tanh %313 : vector<1x128xf32>
    %315 = vector.extract_strided_slice %300 {offsets = [0, 384], sizes = [1, 128], strides = [1, 1]} : vector<1x512xf32> to vector<1x128xf32>
    %316 = arith.negf %315 : vector<1x128xf32>
    %317 = math.exp %316 : vector<1x128xf32>
    %cst_82 = arith.constant 1.000000e+00 : f32
    %318 = vector.broadcast %cst_82 : f32 to vector<1x128xf32>
    %319 = arith.addf %318, %317 : vector<1x128xf32>
    %320 = arith.divf %318, %319 : vector<1x128xf32>
    %321 = arith.mulf %312, %264 : vector<1x128xf32>
    %322 = arith.mulf %306, %314 : vector<1x128xf32>
    %323 = arith.addf %321, %322 : vector<1x128xf32>
    %324 = math.tanh %323 : vector<1x128xf32>
    %325 = arith.mulf %320, %324 : vector<1x128xf32>
    %326 = vector.extract_strided_slice %29 {offsets = [5, 0], sizes = [1, 512], strides = [1, 1]} : vector<8x512xf32> to vector<1x512xf32>
    %c0_83 = arith.constant 0 : index
    %c0_84 = arith.constant 0 : index
    %327 = vector.load %arg3[%c0_83, %c0_84] : memref<128x512xf32, #tpu.memory_space<vmem>>, vector<128x512xf32>
    %cst_85 = arith.constant dense<0.000000e+00> : vector<1x512xf32>
    %328 = tpu.matmul %295, %327, %cst_85 {dimension_numbers = #tpu.dot_dimension_numbers<[1], [0], [0], [1], [0, 0, 1, 1], [], []>} : vector<1x128xf32>, vector<128x512xf32>, vector<1x512xf32> -> vector<1x512xf32>
    %329 = arith.addf %326, %328 : vector<1x512xf32>
    %330 = vector.extract_strided_slice %329 {offsets = [0, 0], sizes = [1, 128], strides = [1, 1]} : vector<1x512xf32> to vector<1x128xf32>
    %331 = arith.negf %330 : vector<1x128xf32>
    %332 = math.exp %331 : vector<1x128xf32>
    %cst_86 = arith.constant 1.000000e+00 : f32
    %333 = vector.broadcast %cst_86 : f32 to vector<1x128xf32>
    %334 = arith.addf %333, %332 : vector<1x128xf32>
    %335 = arith.divf %333, %334 : vector<1x128xf32>
    %336 = vector.extract_strided_slice %329 {offsets = [0, 128], sizes = [1, 128], strides = [1, 1]} : vector<1x512xf32> to vector<1x128xf32>
    %337 = arith.negf %336 : vector<1x128xf32>
    %338 = math.exp %337 : vector<1x128xf32>
    %cst_87 = arith.constant 1.000000e+00 : f32
    %339 = vector.broadcast %cst_87 : f32 to vector<1x128xf32>
    %340 = arith.addf %339, %338 : vector<1x128xf32>
    %341 = arith.divf %339, %340 : vector<1x128xf32>
    %342 = vector.extract_strided_slice %329 {offsets = [0, 256], sizes = [1, 128], strides = [1, 1]} : vector<1x512xf32> to vector<1x128xf32>
    %343 = math.tanh %342 : vector<1x128xf32>
    %344 = vector.extract_strided_slice %329 {offsets = [0, 384], sizes = [1, 128], strides = [1, 1]} : vector<1x512xf32> to vector<1x128xf32>
    %345 = arith.negf %344 : vector<1x128xf32>
    %346 = math.exp %345 : vector<1x128xf32>
    %cst_88 = arith.constant 1.000000e+00 : f32
    %347 = vector.broadcast %cst_88 : f32 to vector<1x128xf32>
    %348 = arith.addf %347, %346 : vector<1x128xf32>
    %349 = arith.divf %347, %348 : vector<1x128xf32>
    %350 = arith.mulf %341, %293 : vector<1x128xf32>
    %351 = arith.mulf %335, %343 : vector<1x128xf32>
    %352 = arith.addf %350, %351 : vector<1x128xf32>
    %353 = math.tanh %352 : vector<1x128xf32>
    %354 = arith.mulf %349, %353 : vector<1x128xf32>
    %355 = tpu.concatenate %354, %325 in 1 : vector<1x128xf32>, vector<1x128xf32> -> vector<1x256xf32>
    %c0_89 = arith.constant 0 : index
    %c0_90 = arith.constant 0 : index
    %356 = vector.load %arg5[%c0_89, %c0_90] : memref<256x512xf32, #tpu.memory_space<vmem>>, vector<256x512xf32>
    %cst_91 = arith.constant dense<0.000000e+00> : vector<1x512xf32>
    %357 = tpu.matmul %355, %356, %cst_91 {dimension_numbers = #tpu.dot_dimension_numbers<[1], [0], [0], [1], [0, 0, 1, 1], [], []>} : vector<1x256xf32>, vector<256x512xf32>, vector<1x512xf32> -> vector<1x512xf32>
    %c0_92 = arith.constant 0 : index
    %c0_93 = arith.constant 0 : index
    %358 = vector.load %arg6[%c0_92, %c0_93] : memref<1x512xf32, #tpu.memory_space<vmem>>, vector<1x512xf32>
    %359 = arith.addf %357, %358 : vector<1x512xf32>
    %360 = vector.extract_strided_slice %359 {offsets = [0, 0], sizes = [1, 128], strides = [1, 1]} : vector<1x512xf32> to vector<1x128xf32>
    %361 = arith.negf %360 : vector<1x128xf32>
    %362 = math.exp %361 : vector<1x128xf32>
    %cst_94 = arith.constant 1.000000e+00 : f32
    %363 = vector.broadcast %cst_94 : f32 to vector<1x128xf32>
    %364 = arith.addf %363, %362 : vector<1x128xf32>
    %365 = arith.divf %363, %364 : vector<1x128xf32>
    %366 = vector.extract_strided_slice %359 {offsets = [0, 128], sizes = [1, 128], strides = [1, 1]} : vector<1x512xf32> to vector<1x128xf32>
    %367 = arith.negf %366 : vector<1x128xf32>
    %368 = math.exp %367 : vector<1x128xf32>
    %cst_95 = arith.constant 1.000000e+00 : f32
    %369 = vector.broadcast %cst_95 : f32 to vector<1x128xf32>
    %370 = arith.addf %369, %368 : vector<1x128xf32>
    %371 = arith.divf %369, %370 : vector<1x128xf32>
    %372 = vector.extract_strided_slice %359 {offsets = [0, 256], sizes = [1, 128], strides = [1, 1]} : vector<1x512xf32> to vector<1x128xf32>
    %373 = math.tanh %372 : vector<1x128xf32>
    %374 = vector.extract_strided_slice %359 {offsets = [0, 384], sizes = [1, 128], strides = [1, 1]} : vector<1x512xf32> to vector<1x128xf32>
    %375 = arith.negf %374 : vector<1x128xf32>
    %376 = math.exp %375 : vector<1x128xf32>
    %cst_96 = arith.constant 1.000000e+00 : f32
    %377 = vector.broadcast %cst_96 : f32 to vector<1x128xf32>
    %378 = arith.addf %377, %376 : vector<1x128xf32>
    %379 = arith.divf %377, %378 : vector<1x128xf32>
    %380 = arith.mulf %371, %323 : vector<1x128xf32>
    %381 = arith.mulf %365, %373 : vector<1x128xf32>
    %382 = arith.addf %380, %381 : vector<1x128xf32>
    %383 = math.tanh %382 : vector<1x128xf32>
    %384 = arith.mulf %379, %383 : vector<1x128xf32>
    %385 = vector.extract_strided_slice %29 {offsets = [6, 0], sizes = [1, 512], strides = [1, 1]} : vector<8x512xf32> to vector<1x512xf32>
    %c0_97 = arith.constant 0 : index
    %c0_98 = arith.constant 0 : index
    %386 = vector.load %arg3[%c0_97, %c0_98] : memref<128x512xf32, #tpu.memory_space<vmem>>, vector<128x512xf32>
    %cst_99 = arith.constant dense<0.000000e+00> : vector<1x512xf32>
    %387 = tpu.matmul %354, %386, %cst_99 {dimension_numbers = #tpu.dot_dimension_numbers<[1], [0], [0], [1], [0, 0, 1, 1], [], []>} : vector<1x128xf32>, vector<128x512xf32>, vector<1x512xf32> -> vector<1x512xf32>
    %388 = arith.addf %385, %387 : vector<1x512xf32>
    %389 = vector.extract_strided_slice %388 {offsets = [0, 0], sizes = [1, 128], strides = [1, 1]} : vector<1x512xf32> to vector<1x128xf32>
    %390 = arith.negf %389 : vector<1x128xf32>
    %391 = math.exp %390 : vector<1x128xf32>
    %cst_100 = arith.constant 1.000000e+00 : f32
    %392 = vector.broadcast %cst_100 : f32 to vector<1x128xf32>
    %393 = arith.addf %392, %391 : vector<1x128xf32>
    %394 = arith.divf %392, %393 : vector<1x128xf32>
    %395 = vector.extract_strided_slice %388 {offsets = [0, 128], sizes = [1, 128], strides = [1, 1]} : vector<1x512xf32> to vector<1x128xf32>
    %396 = arith.negf %395 : vector<1x128xf32>
    %397 = math.exp %396 : vector<1x128xf32>
    %cst_101 = arith.constant 1.000000e+00 : f32
    %398 = vector.broadcast %cst_101 : f32 to vector<1x128xf32>
    %399 = arith.addf %398, %397 : vector<1x128xf32>
    %400 = arith.divf %398, %399 : vector<1x128xf32>
    %401 = vector.extract_strided_slice %388 {offsets = [0, 256], sizes = [1, 128], strides = [1, 1]} : vector<1x512xf32> to vector<1x128xf32>
    %402 = math.tanh %401 : vector<1x128xf32>
    %403 = vector.extract_strided_slice %388 {offsets = [0, 384], sizes = [1, 128], strides = [1, 1]} : vector<1x512xf32> to vector<1x128xf32>
    %404 = arith.negf %403 : vector<1x128xf32>
    %405 = math.exp %404 : vector<1x128xf32>
    %cst_102 = arith.constant 1.000000e+00 : f32
    %406 = vector.broadcast %cst_102 : f32 to vector<1x128xf32>
    %407 = arith.addf %406, %405 : vector<1x128xf32>
    %408 = arith.divf %406, %407 : vector<1x128xf32>
    %409 = arith.mulf %400, %352 : vector<1x128xf32>
    %410 = arith.mulf %394, %402 : vector<1x128xf32>
    %411 = arith.addf %409, %410 : vector<1x128xf32>
    %412 = math.tanh %411 : vector<1x128xf32>
    %413 = arith.mulf %408, %412 : vector<1x128xf32>
    %414 = tpu.concatenate %413, %384 in 1 : vector<1x128xf32>, vector<1x128xf32> -> vector<1x256xf32>
    %c0_103 = arith.constant 0 : index
    %c0_104 = arith.constant 0 : index
    %415 = vector.load %arg5[%c0_103, %c0_104] : memref<256x512xf32, #tpu.memory_space<vmem>>, vector<256x512xf32>
    %cst_105 = arith.constant dense<0.000000e+00> : vector<1x512xf32>
    %416 = tpu.matmul %414, %415, %cst_105 {dimension_numbers = #tpu.dot_dimension_numbers<[1], [0], [0], [1], [0, 0, 1, 1], [], []>} : vector<1x256xf32>, vector<256x512xf32>, vector<1x512xf32> -> vector<1x512xf32>
    %c0_106 = arith.constant 0 : index
    %c0_107 = arith.constant 0 : index
    %417 = vector.load %arg6[%c0_106, %c0_107] : memref<1x512xf32, #tpu.memory_space<vmem>>, vector<1x512xf32>
    %418 = arith.addf %416, %417 : vector<1x512xf32>
    %419 = vector.extract_strided_slice %418 {offsets = [0, 0], sizes = [1, 128], strides = [1, 1]} : vector<1x512xf32> to vector<1x128xf32>
    %420 = arith.negf %419 : vector<1x128xf32>
    %421 = math.exp %420 : vector<1x128xf32>
    %cst_108 = arith.constant 1.000000e+00 : f32
    %422 = vector.broadcast %cst_108 : f32 to vector<1x128xf32>
    %423 = arith.addf %422, %421 : vector<1x128xf32>
    %424 = arith.divf %422, %423 : vector<1x128xf32>
    %425 = vector.extract_strided_slice %418 {offsets = [0, 128], sizes = [1, 128], strides = [1, 1]} : vector<1x512xf32> to vector<1x128xf32>
    %426 = arith.negf %425 : vector<1x128xf32>
    %427 = math.exp %426 : vector<1x128xf32>
    %cst_109 = arith.constant 1.000000e+00 : f32
    %428 = vector.broadcast %cst_109 : f32 to vector<1x128xf32>
    %429 = arith.addf %428, %427 : vector<1x128xf32>
    %430 = arith.divf %428, %429 : vector<1x128xf32>
    %431 = vector.extract_strided_slice %418 {offsets = [0, 256], sizes = [1, 128], strides = [1, 1]} : vector<1x512xf32> to vector<1x128xf32>
    %432 = math.tanh %431 : vector<1x128xf32>
    %433 = vector.extract_strided_slice %418 {offsets = [0, 384], sizes = [1, 128], strides = [1, 1]} : vector<1x512xf32> to vector<1x128xf32>
    %434 = arith.negf %433 : vector<1x128xf32>
    %435 = math.exp %434 : vector<1x128xf32>
    %cst_110 = arith.constant 1.000000e+00 : f32
    %436 = vector.broadcast %cst_110 : f32 to vector<1x128xf32>
    %437 = arith.addf %436, %435 : vector<1x128xf32>
    %438 = arith.divf %436, %437 : vector<1x128xf32>
    %439 = arith.mulf %430, %382 : vector<1x128xf32>
    %440 = arith.mulf %424, %432 : vector<1x128xf32>
    %441 = arith.addf %439, %440 : vector<1x128xf32>
    %442 = math.tanh %441 : vector<1x128xf32>
    %443 = arith.mulf %438, %442 : vector<1x128xf32>
    %444 = vector.extract_strided_slice %29 {offsets = [7, 0], sizes = [1, 512], strides = [1, 1]} : vector<8x512xf32> to vector<1x512xf32>
    %c0_111 = arith.constant 0 : index
    %c0_112 = arith.constant 0 : index
    %445 = vector.load %arg3[%c0_111, %c0_112] : memref<128x512xf32, #tpu.memory_space<vmem>>, vector<128x512xf32>
    %cst_113 = arith.constant dense<0.000000e+00> : vector<1x512xf32>
    %446 = tpu.matmul %413, %445, %cst_113 {dimension_numbers = #tpu.dot_dimension_numbers<[1], [0], [0], [1], [0, 0, 1, 1], [], []>} : vector<1x128xf32>, vector<128x512xf32>, vector<1x512xf32> -> vector<1x512xf32>
    %447 = arith.addf %444, %446 : vector<1x512xf32>
    %448 = vector.extract_strided_slice %447 {offsets = [0, 0], sizes = [1, 128], strides = [1, 1]} : vector<1x512xf32> to vector<1x128xf32>
    %449 = arith.negf %448 : vector<1x128xf32>
    %450 = math.exp %449 : vector<1x128xf32>
    %cst_114 = arith.constant 1.000000e+00 : f32
    %451 = vector.broadcast %cst_114 : f32 to vector<1x128xf32>
    %452 = arith.addf %451, %450 : vector<1x128xf32>
    %453 = arith.divf %451, %452 : vector<1x128xf32>
    %454 = vector.extract_strided_slice %447 {offsets = [0, 128], sizes = [1, 128], strides = [1, 1]} : vector<1x512xf32> to vector<1x128xf32>
    %455 = arith.negf %454 : vector<1x128xf32>
    %456 = math.exp %455 : vector<1x128xf32>
    %cst_115 = arith.constant 1.000000e+00 : f32
    %457 = vector.broadcast %cst_115 : f32 to vector<1x128xf32>
    %458 = arith.addf %457, %456 : vector<1x128xf32>
    %459 = arith.divf %457, %458 : vector<1x128xf32>
    %460 = vector.extract_strided_slice %447 {offsets = [0, 256], sizes = [1, 128], strides = [1, 1]} : vector<1x512xf32> to vector<1x128xf32>
    %461 = math.tanh %460 : vector<1x128xf32>
    %462 = vector.extract_strided_slice %447 {offsets = [0, 384], sizes = [1, 128], strides = [1, 1]} : vector<1x512xf32> to vector<1x128xf32>
    %463 = arith.negf %462 : vector<1x128xf32>
    %464 = math.exp %463 : vector<1x128xf32>
    %cst_116 = arith.constant 1.000000e+00 : f32
    %465 = vector.broadcast %cst_116 : f32 to vector<1x128xf32>
    %466 = arith.addf %465, %464 : vector<1x128xf32>
    %467 = arith.divf %465, %466 : vector<1x128xf32>
    %468 = arith.mulf %459, %411 : vector<1x128xf32>
    %469 = arith.mulf %453, %461 : vector<1x128xf32>
    %470 = arith.addf %468, %469 : vector<1x128xf32>
    %471 = math.tanh %470 : vector<1x128xf32>
    %472 = arith.mulf %467, %471 : vector<1x128xf32>
    %473 = tpu.concatenate %472, %443 in 1 : vector<1x128xf32>, vector<1x128xf32> -> vector<1x256xf32>
    %c0_117 = arith.constant 0 : index
    %c0_118 = arith.constant 0 : index
    %474 = vector.load %arg5[%c0_117, %c0_118] : memref<256x512xf32, #tpu.memory_space<vmem>>, vector<256x512xf32>
    %cst_119 = arith.constant dense<0.000000e+00> : vector<1x512xf32>
    %475 = tpu.matmul %473, %474, %cst_119 {dimension_numbers = #tpu.dot_dimension_numbers<[1], [0], [0], [1], [0, 0, 1, 1], [], []>} : vector<1x256xf32>, vector<256x512xf32>, vector<1x512xf32> -> vector<1x512xf32>
    %c0_120 = arith.constant 0 : index
    %c0_121 = arith.constant 0 : index
    %476 = vector.load %arg6[%c0_120, %c0_121] : memref<1x512xf32, #tpu.memory_space<vmem>>, vector<1x512xf32>
    %477 = arith.addf %475, %476 : vector<1x512xf32>
    %478 = vector.extract_strided_slice %477 {offsets = [0, 0], sizes = [1, 128], strides = [1, 1]} : vector<1x512xf32> to vector<1x128xf32>
    %479 = arith.negf %478 : vector<1x128xf32>
    %480 = math.exp %479 : vector<1x128xf32>
    %cst_122 = arith.constant 1.000000e+00 : f32
    %481 = vector.broadcast %cst_122 : f32 to vector<1x128xf32>
    %482 = arith.addf %481, %480 : vector<1x128xf32>
    %483 = arith.divf %481, %482 : vector<1x128xf32>
    %484 = vector.extract_strided_slice %477 {offsets = [0, 128], sizes = [1, 128], strides = [1, 1]} : vector<1x512xf32> to vector<1x128xf32>
    %485 = arith.negf %484 : vector<1x128xf32>
    %486 = math.exp %485 : vector<1x128xf32>
    %cst_123 = arith.constant 1.000000e+00 : f32
    %487 = vector.broadcast %cst_123 : f32 to vector<1x128xf32>
    %488 = arith.addf %487, %486 : vector<1x128xf32>
    %489 = arith.divf %487, %488 : vector<1x128xf32>
    %490 = vector.extract_strided_slice %477 {offsets = [0, 256], sizes = [1, 128], strides = [1, 1]} : vector<1x512xf32> to vector<1x128xf32>
    %491 = math.tanh %490 : vector<1x128xf32>
    %492 = vector.extract_strided_slice %477 {offsets = [0, 384], sizes = [1, 128], strides = [1, 1]} : vector<1x512xf32> to vector<1x128xf32>
    %493 = arith.negf %492 : vector<1x128xf32>
    %494 = math.exp %493 : vector<1x128xf32>
    %cst_124 = arith.constant 1.000000e+00 : f32
    %495 = vector.broadcast %cst_124 : f32 to vector<1x128xf32>
    %496 = arith.addf %495, %494 : vector<1x128xf32>
    %497 = arith.divf %495, %496 : vector<1x128xf32>
    %498 = arith.mulf %489, %441 : vector<1x128xf32>
    %499 = arith.mulf %483, %491 : vector<1x128xf32>
    %500 = arith.addf %498, %499 : vector<1x128xf32>
    %501 = math.tanh %500 : vector<1x128xf32>
    %502 = arith.mulf %497, %501 : vector<1x128xf32>
    %503 = tpu.concatenate %89, %148, %207, %266, %325, %384, %443, %502 in 0 : vector<1x128xf32>, vector<1x128xf32>, vector<1x128xf32>, vector<1x128xf32>, vector<1x128xf32>, vector<1x128xf32>, vector<1x128xf32>, vector<1x128xf32> -> vector<8x128xf32>
    %c0_125 = arith.constant 0 : index
    %c0_126 = arith.constant 0 : index
    %504 = vector.load %arg7[%c0_125, %c0_126] : memref<128x64xf32, #tpu.memory_space<vmem>>, vector<128x64xf32>
    %cst_127 = arith.constant dense<0.000000e+00> : vector<8x64xf32>
    %505 = tpu.matmul %503, %504, %cst_127 {dimension_numbers = #tpu.dot_dimension_numbers<[1], [0], [0], [1], [0, 0, 1, 1], [], []>} : vector<8x128xf32>, vector<128x64xf32>, vector<8x64xf32> -> vector<8x64xf32>
    %c0_128 = arith.constant 0 : index
    %c0_129 = arith.constant 0 : index
    %506 = vector.load %arg8[%c0_128, %c0_129] : memref<1x64xf32, #tpu.memory_space<vmem>>, vector<1x64xf32>
    %507 = vector.broadcast %506 : vector<1x64xf32> to vector<8x64xf32>
    %508 = arith.addf %505, %507 : vector<8x64xf32>
    %cst_130 = arith.constant 0.000000e+00 : f32
    %509 = vector.broadcast %cst_130 : f32 to vector<8x64xf32>
    %510 = arith.maximumf %508, %509 : vector<8x64xf32>
    %cst_131 = arith.constant dense<0xFF800000> : vector<8xf32>
    %511 = vector.multi_reduction <maximumf>, %510, %cst_131 [1] : vector<8x64xf32> to vector<8xf32>
    %512 = vector.shape_cast %511 : vector<8xf32> to vector<8x1xf32>
    %513 = vector.broadcast %512 : vector<8x1xf32> to vector<8x64xf32>
    %514 = arith.subf %510, %513 : vector<8x64xf32>
    %515 = math.exp %514 : vector<8x64xf32>
    %cst_132 = arith.constant dense<0.000000e+00> : vector<8xf32>
    %516 = vector.multi_reduction <add>, %515, %cst_132 [1] : vector<8x64xf32> to vector<8xf32>
    %517 = vector.shape_cast %516 : vector<8xf32> to vector<8x1xf32>
    %518 = math.log %517 : vector<8x1xf32>
    %519 = arith.addf %518, %512 : vector<8x1xf32>
    %520 = vector.broadcast %519 : vector<8x1xf32> to vector<8x64xf32>
    %521 = arith.subf %510, %520 : vector<8x64xf32>
    %c0_133 = arith.constant 0 : index
    %c0_134 = arith.constant 0 : index
    %522 = vector.load %arg9[%c0_133, %c0_134] : memref<8x64xf32, #tpu.memory_space<vmem>>, vector<8x64xf32>
    tpu.vector_store %arg9[%c0_133, %c0_134], %521 {strides = array<i32>} : memref<8x64xf32, #tpu.memory_space<vmem>>, vector<8x64xf32>,
    return
  }
}

</mosaic_0001>

<bundles_post_ra>
// kernel: tpu_custom_call.1
= control target key start
LH: loop header
LB: loop body
LE: loop exit
PB: predicated region body
PF: predicated region fallthrough
CT: control target
= control target key end

     0   :  { %14 = vsyncpa [#allocation5], 0  ;;  %s7004_s0 = inlined_call_operand.vmem [shape: s32[8], index: 0, kind: input, shape index: {}]   ;;  %s7005_s1 = inlined_call_operand.vmem [shape: f32[64,32], index: 1, kind: input, shape index: {}]   ;;  %s7006_s2 = inlined_call_operand.vmem [shape: f32[32,512], index: 2, kind: input, shape index: {}]   ;;  %s7007_s3 = inlined_call_operand.hbm [shape: f32[128,512], index: 3, kind: input, shape index: {}]   ;;  %s7008_s4 = inlined_call_operand.vmem [shape: f32[1,512], index: 4, kind: input, shape index: {}]   ;;  %s7009_s5 = inlined_call_operand.hbm [shape: f32[256,512], index: 5, kind: input, shape index: {}]   ;;  %s7010_s6 = inlined_call_operand.vmem [shape: f32[1,512], index: 6, kind: input, shape index: {}]   ;;  %s7011_s7 = inlined_call_operand.vmem [shape: f32[128,64], index: 7, kind: input, shape index: {}]   ;;  %s7012_s8 = inlined_call_operand.vmem [shape: f32[1,64], index: 8, kind: input, shape index: {}]   ;;  %s7013_s9 = inlined_call_operand.hbm [shape: f32[8,64], index: 9, kind: output, shape index: {}]  }
   0x1   :  { %15 = vsyncpa [#allocation3], 0 }
   0x2   :  { %16 = vsyncpa [#allocation8], 0 }
   0x3   :  { %17 = vsyncpa [#allocation4], 0  ;;  %s24_s11 = sshll.u32 %s7004_s0, 4  ;;  %s25_s11 = int_to_ptr.vmem [resolvable:$true] %s24_s11 }
   0x4   :  { %s5484_s12 = scalar_lea.vmem %s25_s11, 16  ;;  %p5489_p1 = scmp.lt.s32.totalorder %s25_s11, %s25_s11 }
   0x5   :  { %p5485_p0 = scmp.ne.s32.totalorder %s25_s11, %s5484_s12  ;;  %p5490_p2 = scmp.lt.s32.totalorder %s5484_s12, %s5484_s12 }
   0x7   :  { %p5491_p3 = por %p5490_p2, %p5489_p1 }
   0x9   :  { %p5492_p4 = pnand %p5491_p3, %p5485_p0 }
   0xb   :  { %5495 = shalt.err (!%p5492_p4)
}
   0xc   :  { %s5570_s13 = smov [#allocation2]   ;;  %s5571_s14 = smov [#allocation6]  }
   0xd   :  { %27 = dma.vmem_to_smem %s25_s11, 16, %s5570_s13, [#allocation5]  }
   0xe   :  { %s37_s15 = sshll.u32 %s5571_s14, 4  ;;  %s5496_s18 = scalar_lea.hbm %s7007_s3, 8192  ;;  %s38_s15 = int_to_ptr.vmem [resolvable:$true] %s37_s15 }
   0xf   :  { %p5497_p5 = scmp.ne.s32.totalorder %s7007_s3, %s5496_s18  ;;  %p5500_p6 = scmp.lt.u32.totalorder %s5496_s18, %s7007_s3 }
  0x11   :  { %p5502_p7 = pnand %p5500_p6, %p5497_p5 }
  0x13   :  { %5505 = shalt.err (!%p5502_p7)
}
  0x14   :  { %s5506_s22 = scalar_lea.vmem %s38_s15, 8192  ;;  %p5511_p9 = scmp.lt.s32.totalorder %s38_s15, %s38_s15 }
  0x15   :  { %p5507_p8 = scmp.ne.s32.totalorder %s38_s15, %s5506_s22  ;;  %p5512_p10 = scmp.lt.s32.totalorder %s5506_s22, %s5506_s22 }
  0x17   :  { %p5513_p11 = por %p5512_p10, %p5511_p9 }
  0x19   :  { %p5514_p12 = pnand %p5513_p11, %p5507_p8 }
  0x1b   :  { %5517 = shalt.err (!%p5514_p12)
}
  0x1c   :  { %s5572_s23 = smov 512   ;;  %s5573_s24 = smov 32  }
  0x1d   :  { %43 = dma.hbm_to_vmem [thread:$0]  %s7007_s3, 8192, %s38_s15, [#allocation3], %s5572_s23, %s5572_s23, %s5573_s24  }
  0x1e   :  { %s5574_s27 = smov [#allocation7]   ;;  %s5518_s10 = scalar_lea.hbm %s7009_s5, 16384 }
  0x1f   :  { %s51_s28 = sshll.u32 %s5574_s27, 4  ;;  %p5519_p13 = scmp.ne.s32.totalorder %s7009_s5, %s5518_s10  ;;  %s52_s28 = int_to_ptr.vmem [resolvable:$true] %s51_s28 }
  0x20   :  { %p5522_p0 = scmp.lt.u32.totalorder %s5518_s10, %s7009_s5 }
  0x22   :  { %p5524_p1 = pnand %p5522_p0, %p5519_p13 }
  0x24   :  { %5527 = shalt.err (!%p5524_p1)
}
  0x25   :  { %s5528_s16 = scalar_lea.vmem %s52_s28, 16384  ;;  %p5533_p3 = scmp.lt.s32.totalorder %s52_s28, %s52_s28 }
  0x26   :  { %p5529_p2 = scmp.ne.s32.totalorder %s52_s28, %s5528_s16  ;;  %p5534_p4 = scmp.lt.s32.totalorder %s5528_s16, %s5528_s16 }
  0x28   :  { %p5535_p5 = por %p5534_p4, %p5533_p3 }
  0x2a   :  { %p5536_p6 = pnand %p5535_p5, %p5529_p2 }
  0x2c   :  { %5539 = shalt.err (!%p5536_p6)
}
  0x2d   :  { %57 = dma.hbm_to_vmem [thread:$0]  %s7009_s5, 16384, %s52_s28, [#allocation8], %s5572_s23, %s5572_s23, %s5573_s24  }
  0x2e   :  { %5562 = dma.done.wait [#allocation5], 16  }
  0x2f   :  { %5563 = vsyncadd [#allocation5], 4294967280 }
  0x30   :  { %5564 = dma.done.wait [#allocation3], 8192  }
  0x31   :  { %5565 = vsyncadd [#allocation3], 4294959104 }
  0x32   :  { %5566 = dma.done.wait [#allocation8], 16384  }
  0x33   :  { %5567 = vsyncadd [#allocation8], 4294950912 }
  0x34   :  { %73 = sfence }
  0x35   :  { %v318_v0 = vld [vmem:[#allocation6 + $0x8] sm:$0xff]  ;;  %v317_v2 = vld [vmem:[#allocation6] sm:$0xff]  ;;  %s5656_s17 = sld [smem:[#allocation2]]  ;;  %v7014_v7 = vmov 0.0   ;;  %s5661_s5 = sld [smem:[#allocation2 + $0x1]]  ;;  %v136_v32 = vld [vmem:[%s7006_s2 + $0x18] sm:$0xff] }
  0x36   :  { %v322_v1 = vld [vmem:[#allocation6 + $0x28] sm:$0xff]  ;;  %v321_v4 = vld [vmem:[#allocation6 + $0x20] sm:$0xff]  ;;  %239 = vmatprep.mubr.f32.mxu1 %v7014_v7  ;;  %445 = vmatprep.mubr.f32.mxu0 %v7014_v7  ;;  %s5674_s21 = sld [smem:[#allocation2 + $0x2]]  ;;  %s5683_s26 = sld [smem:[#allocation2 + $0x3]]  ;;  %v140_v33 = vld [vmem:[%s7006_s2 + $0x38] sm:$0xff]  ;;  %vm119_vm0 = vcmask 1040384  }
  0x37   :  { %v5658_v3 = vpack.c.bf16 %v322_v1, %v318_v0  ;;  %v326_v5 = vld [vmem:[#allocation6 + $0x48] sm:$0xff]  ;;  %v5664_v8 = vpack.c.bf16 %v321_v4, %v317_v2  ;;  %v325_v12 = vld [vmem:[#allocation6 + $0x40] sm:$0xff]  ;;  %s5691_s29 = sld [smem:[#allocation2 + $0x4]]  ;;  %s5699_s11 = sld [smem:[#allocation2 + $0x5]]  ;;  %v3647_v35 = vpack.c.bf16 %v140_v33, %v136_v32  ;;  %vm121_vm1 = vcmask 1041408   ;;  %v135_v53 = vld [vmem:[%s7006_s2 + $0x10] sm:$0xff] }
  0x38   :  { %v330_v6 = vld [vmem:[#allocation6 + $0x68] sm:$0xff]  ;;  %v329_v14 = vld [vmem:[#allocation6 + $0x60] sm:$0xff]  ;;  %s5711_s19 = sld [smem:[#allocation2 + $0x6]]  ;;  %s5723_s28 = sld [smem:[#allocation2 + $0x7]]  ;;  %vm123_vm2 = vcmask 1042432   ;;  %vm125_vm3 = vcmask 1043456  }
  0x39   :  { %7154 = vst [vmem:[#allocation14_spill] sm:$0xff] %v5658_v3  ;;  %v5666_v9 = vpack.c.bf16 %v330_v6, %v326_v5  ;;  %v134_v10 = vld [vmem:[%s7006_s2 + $0x8] sm:$0xff]  ;;  %3656 = vmatprep.subr.bf16.mxu0 %v5658_v3  ;;  %v133_v15 = vld [vmem:[%s7006_s2] sm:$0xff]  ;;  %v5686_v17 = vpack.c.bf16 %v329_v14, %v325_v12  ;;  %v139_v54 = vld [vmem:[%s7006_s2 + $0x30] sm:$0xff]  ;;  %vm127_vm4 = vcmask 1044480   ;;  %vm129_vm5 = vcmask 1045504  }
  0x3a   :  { %v138_v11 = vld [vmem:[%s7006_s2 + $0x28] sm:$0xff]  ;;  %v137_v16 = vld [vmem:[%s7006_s2 + $0x20] sm:$0xff]  ;;  %3658 = vmatpush1.bf16.msra.mxu0 %v5664_v8  ;;  %v144_v0 = vld [vmem:[%s7006_s2 + $0x58] sm:$0xff]  ;;  %vm131_vm6 = vcmask 1046528   ;;  %vm171_vm7 = vcmask 261120   ;;  %vm5577_vm8 = vmmov 0  }
  0x3b   :  { %v3639_v13 = vpack.c.bf16 %v138_v11, %v134_v10  ;;  %v3641_v18 = vpack.c.bf16 %v137_v16, %v133_v15  ;;  %v334_v19 = vld [vmem:[#allocation6 + $0x88] sm:$0xff]  ;;  %3660 = vmatprep.subr.bf16.mxu0 %v5666_v9  ;;  %v333_v24 = vld [vmem:[#allocation6 + $0x80] sm:$0xff]  ;;  %s75_s18 = scalar_lea.vmem %s7005_s1, %s5656_s17  ;;  %s78_s27 = scalar_lea.vmem %s7005_s1, %s5661_s5  ;;  %v148_v1 = vld [vmem:[%s7006_s2 + $0x78] sm:$0xff]  ;;  %v3649_v11 = vpack.c.bf16 %v139_v54, %v135_v53  ;;  %vm3489_vm9 = vcmask 523264  }
  0x3c   :  { %v338_v20 = vld [vmem:[#allocation6 + $0xa8] sm:$0xff]  ;;  %v337_v25 = vld [vmem:[#allocation6 + $0xa0] sm:$0xff]  ;;  %s81_s10 = scalar_lea.vmem %s7005_s1, %s5674_s21  ;;  %s84_s13 = scalar_lea.vmem %s7005_s1, %s5683_s26  ;;  %v147_v14 = vld [vmem:[%s7006_s2 + $0x70] sm:$0xff]  ;;  %v3651_v16 = vpack.c.bf16 %v148_v1, %v144_v0 }
  0x3d   :  { %v142_v21 = vld [vmem:[%s7006_s2 + $0x48] sm:$0xff]  ;;  %3640 = vmatprep.subr.bf16.mxu1 %v3639_v13  ;;  %v5694_v22 = vpack.c.bf16 %v338_v20, %v334_v19  ;;  %v141_v27 = vld [vmem:[%s7006_s2 + $0x40] sm:$0xff]  ;;  %v5726_v34 = vpack.c.bf16 %v337_v25, %v333_v24  ;;  %s87_s21 = scalar_lea.vmem %s7005_s1, %s5691_s29  ;;  %v143_v13 = vld [vmem:[%s7006_s2 + $0x50] sm:$0xff] }
  0x3e   :  { %v146_v23 = vld [vmem:[%s7006_s2 + $0x68] sm:$0xff]  ;;  %3642 = vmatpush1.bf16.msra.mxu1 %v3641_v18  ;;  %v145_v28 = vld [vmem:[%s7006_s2 + $0x60] sm:$0xff]  ;;  %3662 = vmatpush1.bf16.msra.mxu0 %v5686_v17  ;;  %s93_s20 = scalar_lea.vmem %s7005_s1, %s5711_s19  ;;  %v320_v20 = vld [vmem:[#allocation6 + $0x18] sm:$0xff] }
  0x3f   :  { %v3643_v26 = vpack.c.bf16 %v146_v23, %v142_v21  ;;  %v342_v29 = vld [vmem:[#allocation6 + $0xc8] sm:$0xff]  ;;  %v3645_v30 = vpack.c.bf16 %v145_v28, %v141_v27  ;;  %v341_v36 = vld [vmem:[#allocation6 + $0xc0] sm:$0xff]  ;;  %3664 = vmatprep.subr.bf16.mxu0 %v5694_v22  ;;  %v324_v24 = vld [vmem:[#allocation6 + $0x38] sm:$0xff]  ;;  %v3653_v27 = vpack.c.bf16 %v147_v14, %v143_v13 }
  0x40   :  { %v346_v31 = vld [vmem:[#allocation6 + $0xe8] sm:$0xff]  ;;  %v345_v37 = vld [vmem:[#allocation6 + $0xe0] sm:$0xff]  ;;  %v352_v0 = vld [vmem:[#allocation6 + $0x118] sm:$0xff] }
  0x41   :  { %3644 = vmatprep.subr.bf16.mxu1 %v3643_v26  ;;  %v5733_v38 = vpack.c.bf16 %v346_v31, %v342_v29  ;;  %v76_v39 = vld [vmem:[%s75_s18] sm:$0x1]  ;;  %v350_v45 = vld [vmem:[#allocation6 + $0x108] sm:$0xff]  ;;  %s90_s18 = scalar_lea.vmem %s7005_s1, %s5699_s11  ;;  %v5748_v49 = vpack.c.bf16 %v345_v37, %v341_v36  ;;  %v319_v29 = vld [vmem:[#allocation6 + $0x10] sm:$0xff]  ;;  %v5797_v31 = vpack.c.bf16 %v324_v24, %v320_v20 }
  0x42   :  { %v79_v40 = vld [vmem:[%s78_s27] sm:$0x1]  ;;  %3646 = vmatpush1.bf16.msra.mxu1 %v3645_v30  ;;  %v354_v48 = vld [vmem:[#allocation6 + $0x128] sm:$0xff]  ;;  %3666 = vmatpush1.bf16.msra.mxu0 %v5726_v34  ;;  %s96_s27 = scalar_lea.vmem %s7005_s1, %s5723_s28  ;;  %v323_v30 = vld [vmem:[#allocation6 + $0x30] sm:$0xff] }
  0x43   :  { %v82_v41 = vld [vmem:[%s81_s10] sm:$0x1]  ;;  %v99_v43 = vrot.slane %v79_v40, 7  ;;  %3648 = vmatprep.subr.bf16.mxu1 %v3647_v35  ;;  %3668 = vmatprep.subr.bf16.mxu0 %v5733_v38  ;;  %v5767_v58 = vpack.c.bf16 %v354_v48, %v350_v45  ;;  %v358_v5 = vld [vmem:[#allocation6 + $0x148] sm:$0xff]  ;;  %7155 = vst [vmem:[#allocation15_spill] sm:$0xff] %v5797_v31  ;;  %v328_v36 = vld [vmem:[#allocation6 + $0x58] sm:$0xff] }
  0x44   :  { %v85_v42 = vld [vmem:[%s84_s13] sm:$0x1]  ;;  %v102_v44 = vrot.slane %v82_v41, 6  ;;  %v362_v6 = vld [vmem:[#allocation6 + $0x168] sm:$0xff]  ;;  %v332_v37 = vld [vmem:[#allocation6 + $0x78] sm:$0xff]  ;;  %v5803_v41 = vpack.c.bf16 %v323_v30, %v319_v29 }
  0x45   :  { %v88_v46 = vld [vmem:[%s87_s21] sm:$0x1]  ;;  %v105_v47 = vrot.slane %v85_v42, 5  ;;  %v120_v52 = vsel %vm119_vm0, %v76_v39, %v99_v43  ;;  %v5790_v23 = vpack.c.bf16 %v362_v6, %v358_v5  ;;  %v366_v25 = vld [vmem:[#allocation6 + $0x188] sm:$0xff]  ;;  %v327_v43 = vld [vmem:[#allocation6 + $0x50] sm:$0xff] }
  0x46   :  { %v91_v50 = vld [vmem:[%s90_s18] sm:$0x1]  ;;  %v108_v51 = vrot.slane %v88_v46, 4  ;;  %v122_v57 = vsel %vm121_vm1, %v120_v52, %v102_v44  ;;  %3670 = vmatpush1.bf16.msra.mxu0 %v5748_v49  ;;  %v370_v26 = vld [vmem:[#allocation6 + $0x1a8] sm:$0xff]  ;;  %v5809_v44 = vpack.c.bf16 %v332_v37, %v328_v36  ;;  %v331_v45 = vld [vmem:[#allocation6 + $0x70] sm:$0xff] }
  0x47   :  { %v94_v55 = vld [vmem:[%s93_s20] sm:$0x1]  ;;  %v111_v56 = vrot.slane %v91_v50, 3  ;;  %v124_v63 = vsel %vm123_vm2, %v122_v57, %v105_v47  ;;  %3672 = vmatprep.subr.bf16.mxu0 %v5767_v58  ;;  %v5799_v32 = vpack.c.bf16 %v370_v26, %v366_v25  ;;  %v374_v39 = vld [vmem:[#allocation6 + $0x1c8] sm:$0xff]  ;;  %v336_v50 = vld [vmem:[#allocation6 + $0x98] sm:$0xff]  ;;  %v5816_v52 = vpack.c.bf16 %v331_v45, %v327_v43 }
  0x48   :  { %v349_v59 = vld [vmem:[#allocation6 + $0x100] sm:$0xff]  ;;  %v114_v62 = vrot.slane %v94_v55, 2  ;;  %v126_v4 = vsel %vm125_vm3, %v124_v63, %v108_v51  ;;  %v378_v40 = vld [vmem:[#allocation6 + $0x1e8] sm:$0xff]  ;;  %v340_v51 = vld [vmem:[#allocation6 + $0xb8] sm:$0xff] }
  0x49   :  { %v353_v60 = vld [vmem:[#allocation6 + $0x120] sm:$0xff]  ;;  %v128_v10 = vsel %vm127_vm4, %v126_v4, %v111_v56  ;;  %v5811_v46 = vpack.c.bf16 %v378_v40, %v374_v39  ;;  %v5822_v54 = vpack.c.bf16 %v340_v51, %v336_v50  ;;  %v335_v55 = vld [vmem:[#allocation6 + $0x90] sm:$0xff]  ;;  %v344_v57 = vld [vmem:[#allocation6 + $0xd8] sm:$0xff] }
  0x4a   :  { %v97_v61 = vld [vmem:[%s96_s27] sm:$0x1]  ;;  %v5779_v12 = vpack.c.bf16 %v353_v60, %v349_v59  ;;  %v130_v15 = vsel %vm129_vm5, %v128_v10, %v114_v62  ;;  %v339_v56 = vld [vmem:[#allocation6 + $0xb0] sm:$0xff]  ;;  %v348_v59 = vld [vmem:[#allocation6 + $0xf8] sm:$0xff] }
  0x4b   :  { %v117_v2 = vrot.slane %v97_v61, 1  ;;  %v357_v18 = vld [vmem:[#allocation6 + $0x140] sm:$0xff]  ;;  %v5827_v60 = vpack.c.bf16 %v339_v56, %v335_v55  ;;  %v5830_v61 = vpack.c.bf16 %v348_v59, %v344_v57  ;;  %v343_v62 = vld [vmem:[#allocation6 + $0xd0] sm:$0xff]  ;;  %v356_v1 = vld [vmem:[#allocation6 + $0x138] sm:$0xff] }
  0x4c   :  { %v361_v19 = vld [vmem:[#allocation6 + $0x160] sm:$0xff]  ;;  %3674 = vmatpush1.bf16.msra.mxu0 %v5779_v12  ;;  %v347_v63 = vld [vmem:[#allocation6 + $0xf0] sm:$0xff]  ;;  %v5838_v4 = vpack.c.bf16 %v356_v1, %v352_v0  ;;  %v360_v10 = vld [vmem:[#allocation6 + $0x158] sm:$0xff] }
  0x4d   :  { %v132_v21 = vsel %vm131_vm6, %v130_v15, %v117_v2  ;;  %v5794_v28 = vpack.c.bf16 %v361_v19, %v357_v18  ;;  %v365_v33 = vld [vmem:[#allocation6 + $0x180] sm:$0xff]  ;;  %3676 = vmatprep.subr.bf16.mxu0 %v5790_v23  ;;  %v5834_v2 = vpack.c.bf16 %v347_v63, %v343_v62  ;;  %v351_v5 = vld [vmem:[#allocation6 + $0x110] sm:$0xff]  ;;  %v368_v18 = vld [vmem:[#allocation6 + $0x198] sm:$0xff] }
  0x4e   :  { %3536 = vmatmul.mubr.msk.f32.vlgmr.msra.gmra.mrb[0].mxu1 %vm171_vm7, %v132_v21  ;;  %v369_v35 = vld [vmem:[#allocation6 + $0x1a0] sm:$0xff]  ;;  %v355_v6 = vld [vmem:[#allocation6 + $0x130] sm:$0xff]  ;;  %v372_v19 = vld [vmem:[#allocation6 + $0x1b8] sm:$0xff] }
  0x4f   :  { %3650 = vmatpush1.bf16.msra.mxu1 %v3649_v11  ;;  %310 = vmatprep.mubr.f32.mxu1 %v7014_v7  ;;  %v5805_v42 = vpack.c.bf16 %v369_v35, %v365_v33  ;;  %v373_v47 = vld [vmem:[#allocation6 + $0x1c0] sm:$0xff]  ;;  %v364_v11 = vld [vmem:[#allocation6 + $0x178] sm:$0xff]  ;;  %v5841_v13 = vpack.c.bf16 %v355_v6, %v351_v5  ;;  %v359_v15 = vld [vmem:[#allocation6 + $0x150] sm:$0xff] }
  0x50   :  { %3652 = vmatprep.subr.bf16.mxu1 %v3651_v16  ;;  %3678 = vmatpush1.bf16.msra.mxu0 %v5794_v28  ;;  %v377_v48 = vld [vmem:[#allocation6 + $0x1e0] sm:$0xff]  ;;  %v5844_v14 = vpack.c.bf16 %v364_v11, %v360_v10  ;;  %v363_v16 = vld [vmem:[#allocation6 + $0x170] sm:$0xff]  ;;  %v376_v26 = vld [vmem:[#allocation6 + $0x1d8] sm:$0xff] }
  0x51   :  { %3680 = vmatprep.subr.bf16.mxu0 %v5799_v32  ;;  %v5818_v53 = vpack.c.bf16 %v377_v48, %v373_v47  ;;  %v5847_v20 = vpack.c.bf16 %v363_v16, %v359_v15  ;;  %v367_v24 = vld [vmem:[#allocation6 + $0x190] sm:$0xff]  ;;  %v552_v37 = vld [vmem:[#allocation7 + $0x8] sm:$0xff]  ;;  %v554_v40 = vld [vmem:[#allocation7 + $0x18] sm:$0xff] }
  0x52   :  { %v371_v25 = vld [vmem:[#allocation6 + $0x1b0] sm:$0xff]  ;;  %v556_v39 = vld [vmem:[#allocation7 + $0x28] sm:$0xff]  ;;  %v558_v45 = vld [vmem:[#allocation7 + $0x38] sm:$0xff] }
  0x53   :  { %3654 = vmatpush1.bf16.msra.mxu1 %v3653_v27  ;;  %v380_v27 = vld [vmem:[#allocation6 + $0x1f8] sm:$0xff]  ;;  %v5853_v29 = vpack.c.bf16 %v371_v25, %v367_v24  ;;  %v375_v33 = vld [vmem:[#allocation6 + $0x1d0] sm:$0xff]  ;;  %v5865_v43 = vpack.c.bf16 %v556_v39, %v552_v37  ;;  %v5867_v47 = vpack.c.bf16 %v558_v45, %v554_v40  ;;  %v551_v48 = vld [vmem:[#allocation7] sm:$0xff] }
  0x54   :  { %3688 = vmatprep.subr.bf16.mxu1 %v5797_v31  ;;  %3682 = vmatpush1.bf16.msra.mxu0 %v5805_v42  ;;  %v5856_v30 = vpack.c.bf16 %v380_v27, %v376_v26  ;;  %v379_v35 = vld [vmem:[#allocation6 + $0x1f0] sm:$0xff]  ;;  %v555_v50 = vld [vmem:[#allocation7 + $0x20] sm:$0xff]  ;;  %v560_v59 = vld [vmem:[#allocation7 + $0x48] sm:$0xff] }
  0x55   :  { %3684 = vmatprep.subr.bf16.mxu0 %v5811_v46  ;;  %v5859_v36 = vpack.c.bf16 %v379_v35, %v375_v33  ;;  %v553_v51 = vld [vmem:[#allocation7 + $0x10] sm:$0xff]  ;;  %v5871_v55 = vpack.c.bf16 %v555_v50, %v551_v48  ;;  %v564_v62 = vld [vmem:[#allocation7 + $0x68] sm:$0xff]  ;;  %v562_v63 = vld [vmem:[#allocation7 + $0x58] sm:$0xff] }
  0x56   :  { %3537 = vmatmul.mubr.msk.f32.vlgmr.msra.gmra.mrb[2].mxu1 %vm171_vm7, %v132_v21  ;;  %v5850_v21 = vpack.c.bf16 %v372_v19, %v368_v18  ;;  %v557_v56 = vld [vmem:[#allocation7 + $0x30] sm:$0xff]  ;;  %v5877_v0 = vpack.c.bf16 %v564_v62, %v560_v59  ;;  %v566_v1 = vld [vmem:[#allocation7 + $0x78] sm:$0xff]  ;;  %v559_v5 = vld [vmem:[#allocation7 + $0x40] sm:$0xff] }
  0x57   :  { %3690 = vmatpush1.bf16.msra.mxu1 %v5803_v41  ;;  %516 = vmatprep.mubr.f32.mxu1 %v7014_v7  ;;  %v5873_v57 = vpack.c.bf16 %v557_v56, %v553_v51  ;;  %v563_v6 = vld [vmem:[#allocation7 + $0x60] sm:$0xff]  ;;  %v5879_v10 = vpack.c.bf16 %v566_v1, %v562_v63  ;;  %v561_v15 = vld [vmem:[#allocation7 + $0x50] sm:$0xff]  ;;  %v568_v18 = vld [vmem:[#allocation7 + $0x88] sm:$0xff] }
  0x58   :  { %3692 = vmatprep.subr.bf16.mxu1 %v5809_v44  ;;  %3686 = vmatpush1.bf16.msra.mxu0 %v5818_v53  ;;  %v5881_v11 = vpack.c.bf16 %v563_v6, %v559_v5  ;;  %v565_v16 = vld [vmem:[#allocation7 + $0x70] sm:$0xff]  ;;  %v572_v24 = vld [vmem:[#allocation7 + $0xa8] sm:$0xff]  ;;  %v570_v25 = vld [vmem:[#allocation7 + $0x98] sm:$0xff] }
  0x59   :  { %3720 = vmatprep.subr.bf16.mxu0 %v5865_v43  ;;  %v5884_v19 = vpack.c.bf16 %v565_v16, %v561_v15  ;;  %v574_v26 = vld [vmem:[#allocation7 + $0xb8] sm:$0xff]  ;;  %v5888_v27 = vpack.c.bf16 %v572_v24, %v568_v18  ;;  %v567_v35 = vld [vmem:[#allocation7 + $0x80] sm:$0xff]  ;;  %v569_v39 = vld [vmem:[#allocation7 + $0x90] sm:$0xff] }
  0x5a   :  { %v5890_v33 = vpack.c.bf16 %v574_v26, %v570_v25  ;;  %v571_v37 = vld [vmem:[#allocation7 + $0xa0] sm:$0xff]  ;;  %v573_v45 = vld [vmem:[#allocation7 + $0xb0] sm:$0xff]  ;;  %v576_v50 = vld [vmem:[#allocation7 + $0xc8] sm:$0xff] }
  0x5b   :  { %3694 = vmatpush1.bf16.msra.mxu1 %v5816_v52  ;;  %446 = vmatmul.mubr.f32.vlgmr.msra.gmra.mrb[0].mxu0 %v7014_v7  ;;  %7156 = vst [vmem:[#allocation16_spill] sm:$0xff] %v5888_v27  ;;  %v5893_v40 = vpack.c.bf16 %v571_v37, %v567_v35  ;;  %v5897_v48 = vpack.c.bf16 %v573_v45, %v569_v39  ;;  %v580_v51 = vld [vmem:[#allocation7 + $0xe8] sm:$0xff]  ;;  %v578_v56 = vld [vmem:[#allocation7 + $0xd8] sm:$0xff]  ;;  %v575_v63 = vld [vmem:[#allocation7 + $0xc0] sm:$0xff] }
  0x5c   :  { %3696 = vmatprep.subr.bf16.mxu1 %v5822_v54  ;;  %765 = vmatprep.mubr.f32.mxu0 %v7014_v7  ;;  %7157 = vst [vmem:[#allocation17_spill] sm:$0xff] %v5890_v33  ;;  %v5901_v59 = vpack.c.bf16 %v580_v51, %v576_v50  ;;  %v582_v62 = vld [vmem:[#allocation7 + $0xf8] sm:$0xff]  ;;  %v579_v1 = vld [vmem:[#allocation7 + $0xe0] sm:$0xff]  ;;  %v577_v15 = vld [vmem:[#allocation7 + $0xd0] sm:$0xff] }
  0x5d   :  { %3722 = vmatpush1.bf16.msra.mxu0 %v5871_v55  ;;  %7158 = vst [vmem:[#allocation18_spill] sm:$0xff] %v5893_v40  ;;  %7159 = vst [vmem:[#allocation19_spill] sm:$0xff] %v5897_v48  ;;  %v5903_v5 = vpack.c.bf16 %v582_v62, %v578_v56  ;;  %v5905_v6 = vpack.c.bf16 %v579_v1, %v575_v63  ;;  %v581_v16 = vld [vmem:[#allocation7 + $0xf0] sm:$0xff]  ;;  %v584_v24 = vld [vmem:[#allocation7 + $0x108] sm:$0xff] }
  0x5e   :  { %3724 = vmatprep.subr.bf16.mxu0 %v5877_v0  ;;  %7160 = vst [vmem:[#allocation20_spill] sm:$0xff] %v5901_v59  ;;  %v5908_v18 = vpack.c.bf16 %v581_v16, %v577_v15  ;;  %v588_v25 = vld [vmem:[#allocation7 + $0x128] sm:$0xff]  ;;  %v586_v26 = vld [vmem:[#allocation7 + $0x118] sm:$0xff]  ;;  %v583_v39 = vld [vmem:[#allocation7 + $0x100] sm:$0xff] }
  0x5f   :  { %3698 = vmatpush1.bf16.msra.mxu1 %v5827_v60  ;;  %7161 = vst [vmem:[#allocation21_spill] sm:$0xff] %v5903_v5  ;;  %7162 = vst [vmem:[#allocation22_spill] sm:$0xff] %v5905_v6  ;;  %v5913_v35 = vpack.c.bf16 %v588_v25, %v584_v24  ;;  %v590_v37 = vld [vmem:[#allocation7 + $0x138] sm:$0xff]  ;;  %v587_v45 = vld [vmem:[#allocation7 + $0x120] sm:$0xff] }
  0x60   :  { %3700 = vmatprep.subr.bf16.mxu1 %v5830_v61  ;;  %7163 = vst [vmem:[#allocation23_spill] sm:$0xff] %v5908_v18  ;;  %v5915_v50 = vpack.c.bf16 %v590_v37, %v586_v26  ;;  %v5917_v51 = vpack.c.bf16 %v587_v45, %v583_v39  ;;  %v585_v56 = vld [vmem:[#allocation7 + $0x110] sm:$0xff]  ;;  %v592_v1 = vld [vmem:[#allocation7 + $0x148] sm:$0xff]  ;;  %v594_v16 = vld [vmem:[#allocation7 + $0x158] sm:$0xff] }
  0x61   :  { %3726 = vmatpush1.bf16.msra.mxu0 %v5881_v11  ;;  %7164 = vst [vmem:[#allocation24_spill] sm:$0xff] %v5913_v35  ;;  %v589_v62 = vld [vmem:[#allocation7 + $0x130] sm:$0xff]  ;;  %v596_v15 = vld [vmem:[#allocation7 + $0x168] sm:$0xff]  ;;  %v598_v25 = vld [vmem:[#allocation7 + $0x178] sm:$0xff] }
  0x62   :  { %3728 = vmatprep.subr.bf16.mxu0 %v5888_v27  ;;  %7165 = vst [vmem:[#allocation25_spill] sm:$0xff] %v5915_v50  ;;  %7166 = vst [vmem:[#allocation26_spill] sm:$0xff] %v5917_v51  ;;  %v5920_v63 = vpack.c.bf16 %v589_v62, %v585_v56  ;;  %v5925_v24 = vpack.c.bf16 %v596_v15, %v592_v1  ;;  %v591_v26 = vld [vmem:[#allocation7 + $0x140] sm:$0xff]  ;;  %v5927_v39 = vpack.c.bf16 %v598_v25, %v594_v16  ;;  %v593_v56 = vld [vmem:[#allocation7 + $0x150] sm:$0xff] }
  0x63   :  { %3702 = vmatpush1.bf16.msra.mxu1 %v5834_v2  ;;  %v595_v37 = vld [vmem:[#allocation7 + $0x160] sm:$0xff]  ;;  %v597_v62 = vld [vmem:[#allocation7 + $0x170] sm:$0xff]  ;;  %v604_v1 = vld [vmem:[#allocation7 + $0x1a8] sm:$0xff] }
  0x64   :  { %3704 = vmatprep.subr.bf16.mxu1 %v5838_v4  ;;  %7167 = vst [vmem:[#allocation27_spill] sm:$0xff] %v5920_v63  ;;  %7168 = vst [vmem:[#allocation28_spill] sm:$0xff] %v5925_v24  ;;  %v5929_v45 = vpack.c.bf16 %v595_v37, %v591_v26  ;;  %v602_v15 = vld [vmem:[#allocation7 + $0x198] sm:$0xff]  ;;  %v599_v25 = vld [vmem:[#allocation7 + $0x180] sm:$0xff] }
  0x65   :  { %3730 = vmatpush1.bf16.msra.mxu0 %v5893_v40  ;;  %7169 = vst [vmem:[#allocation29_spill] sm:$0xff] %v5927_v39  ;;  %v606_v16 = vld [vmem:[#allocation7 + $0x1b8] sm:$0xff]  ;;  %v603_v26 = vld [vmem:[#allocation7 + $0x1a0] sm:$0xff] }
  0x66   :  { %3732 = vmatprep.subr.bf16.mxu0 %v5901_v59  ;;  %7170 = vst [vmem:[#allocation30_spill] sm:$0xff] %v5929_v45  ;;  %v5939_v37 = vpack.c.bf16 %v606_v16, %v602_v15  ;;  %v614_v15 = vld [vmem:[#allocation7 + $0x1f8] sm:$0xff]  ;;  %v607_v16 = vld [vmem:[#allocation7 + $0x1c0] sm:$0xff] }
  0x67   :  { %3706 = vmatpush1.bf16.msra.mxu1 %v5841_v13 }
  0x68   :  { %3708 = vmatprep.subr.bf16.mxu1 %v5844_v14  ;;  %7173 = vst [vmem:[#allocation33_spill] sm:$0xff] %v5939_v37 }
  0x69   :  { %3734 = vmatpush1.bf16.msra.mxu0 %v5905_v6 }
  0x6a   :  { %3736 = vmatprep.subr.bf16.mxu0 %v5913_v35  ;;  %v666_v35 = vld [vmem:[#allocation7 + $0x398] sm:$0xff] }
  0x6b   :  { %3710 = vmatpush1.bf16.msra.mxu1 %v5847_v20 }
  0x6c   :  { %3712 = vmatprep.subr.bf16.mxu1 %v5850_v21 }
  0x6d   :  { %3738 = vmatpush1.bf16.msra.mxu0 %v5917_v51 }
  0x6e   :  { %3740 = vmatprep.subr.bf16.mxu0 %v5925_v24 }
  0x6f   :  { %3714 = vmatpush1.bf16.msra.mxu1 %v5853_v29 }
  0x70   :  { %3716 = vmatprep.subr.bf16.mxu1 %v5856_v30 }
  0x71   :  { %3742 = vmatpush1.bf16.msra.mxu0 %v5929_v45 }
  0x73   :  { %3718 = vmatpush1.bf16.msra.mxu1 %v5859_v36 }
  0x74   :  { %3784 = vmatprep.subr.bf16.mxu1 %v5867_v47 }
  0x76   :  { %517 = vmatmul.mubr.f32.vlgmr.msra.gmra.mrb[4].mxu1 %v7014_v7 }
  0x77   :  { %836 = vmatprep.mubr.f32.mxu1 %v7014_v7  ;;  %3786 = vmatpush1.bf16.msra.mxu1 %v5873_v57  ;;  %v5932_v7 = vpack.c.bf16 %v597_v62, %v593_v56  ;;  %v601_v56 = vld [vmem:[#allocation7 + $0x190] sm:$0xff] }
  0x78   :  { %3788 = vmatprep.subr.bf16.mxu1 %v5879_v10  ;;  %v605_v62 = vld [vmem:[#allocation7 + $0x1b0] sm:$0xff] }
  0x79   :  { %7171 = vst [vmem:[#allocation31_spill] sm:$0xff] %v5932_v7 }
  0x7b   :  { %3790 = vmatpush1.bf16.msra.mxu1 %v5884_v19 }
  0x7c   :  { %3792 = vmatprep.subr.bf16.mxu1 %v5890_v33 }
  0x7f   :  { %3794 = vmatpush1.bf16.msra.mxu1 %v5897_v48 }
  0x80   :  { %3796 = vmatprep.subr.bf16.mxu1 %v5903_v5 }
  0x83   :  { %3798 = vmatpush1.bf16.msra.mxu1 %v5908_v18 }
  0x84   :  { %3800 = vmatprep.subr.bf16.mxu1 %v5915_v50  ;;  %v5941_v50 = vpack.c.bf16 %v603_v26, %v599_v25  ;;  %v611_v25 = vld [vmem:[#allocation7 + $0x1e0] sm:$0xff] }
  0x85   :  { %v5953_v24 = vpack.c.bf16 %v611_v25, %v607_v16  ;;  %v619_v16 = vld [vmem:[#allocation7 + $0x220] sm:$0xff] }
  0x86   :  { %7174 = vst [vmem:[#allocation34_spill] sm:$0xff] %v5941_v50 }
  0x87   :  { %3802 = vmatpush1.bf16.msra.mxu1 %v5920_v63  ;;  %v600_v63 = vld [vmem:[#allocation7 + $0x188] sm:$0xff]  ;;  %7178 = vst [vmem:[#allocation38_spill] sm:$0xff] %v5953_v24 }
  0x88   :  { %3804 = vmatprep.subr.bf16.mxu1 %v5927_v39  ;;  %v5937_v51 = vpack.c.bf16 %v604_v1, %v600_v63  ;;  %v5944_v39 = vpack.c.bf16 %v605_v62, %v601_v56  ;;  %v612_v63 = vld [vmem:[#allocation7 + $0x1e8] sm:$0xff]  ;;  %v610_v1 = vld [vmem:[#allocation7 + $0x1d8] sm:$0xff]  ;;  %v609_v56 = vld [vmem:[#allocation7 + $0x1d0] sm:$0xff] }
  0x89   :  { %v5951_v26 = vpack.c.bf16 %v614_v15, %v610_v1  ;;  %v613_v62 = vld [vmem:[#allocation7 + $0x1f0] sm:$0xff]  ;;  %v622_v1 = vld [vmem:[#allocation7 + $0x238] sm:$0xff]  ;;  %v615_v15 = vld [vmem:[#allocation7 + $0x200] sm:$0xff] }
  0x8a   :  { %7172 = vst [vmem:[#allocation32_spill] sm:$0xff] %v5937_v51  ;;  %3744 = vmatprep.subr.bf16.mxu0 %v5937_v51  ;;  %7175 = vst [vmem:[#allocation35_spill] sm:$0xff] %v5944_v39  ;;  %v5965_v51 = vpack.c.bf16 %v619_v16, %v615_v15  ;;  %v627_v15 = vld [vmem:[#allocation7 + $0x260] sm:$0xff] }
  0x8b   :  { %3806 = vmatpush1.bf16.msra.mxu1 %v5932_v7  ;;  %3746 = vmatpush1.bf16.msra.mxu0 %v5941_v50  ;;  %v608_v7 = vld [vmem:[#allocation7 + $0x1c8] sm:$0xff]  ;;  %7177 = vst [vmem:[#allocation37_spill] sm:$0xff] %v5951_v26 }
  0x8c   :  { %3808 = vmatprep.subr.bf16.mxu1 %v5939_v37  ;;  %v5949_v45 = vpack.c.bf16 %v612_v63, %v608_v7  ;;  %v5956_v37 = vpack.c.bf16 %v613_v62, %v609_v56  ;;  %v620_v7 = vld [vmem:[#allocation7 + $0x228] sm:$0xff]  ;;  %v618_v63 = vld [vmem:[#allocation7 + $0x218] sm:$0xff]  ;;  %7182 = vst [vmem:[#allocation42_spill] sm:$0xff] %v5965_v51  ;;  %v617_v56 = vld [vmem:[#allocation7 + $0x210] sm:$0xff] }
  0x8d   :  { %v5963_v25 = vpack.c.bf16 %v622_v1, %v618_v63  ;;  %v621_v62 = vld [vmem:[#allocation7 + $0x230] sm:$0xff]  ;;  %v630_v63 = vld [vmem:[#allocation7 + $0x278] sm:$0xff]  ;;  %v623_v1 = vld [vmem:[#allocation7 + $0x240] sm:$0xff] }
  0x8e   :  { %7176 = vst [vmem:[#allocation36_spill] sm:$0xff] %v5949_v45  ;;  %3748 = vmatprep.subr.bf16.mxu0 %v5949_v45  ;;  %7179 = vst [vmem:[#allocation39_spill] sm:$0xff] %v5956_v37  ;;  %v5977_v45 = vpack.c.bf16 %v627_v15, %v623_v1  ;;  %v635_v1 = vld [vmem:[#allocation7 + $0x2a0] sm:$0xff] }
  0x8f   :  { %3810 = vmatpush1.bf16.msra.mxu1 %v5944_v39  ;;  %3750 = vmatpush1.bf16.msra.mxu0 %v5953_v24  ;;  %v616_v39 = vld [vmem:[#allocation7 + $0x208] sm:$0xff]  ;;  %7181 = vst [vmem:[#allocation41_spill] sm:$0xff] %v5963_v25 }
  0x90   :  { %3812 = vmatprep.subr.bf16.mxu1 %v5951_v26  ;;  %v5961_v50 = vpack.c.bf16 %v620_v7, %v616_v39  ;;  %v5968_v26 = vpack.c.bf16 %v621_v62, %v617_v56  ;;  %v628_v39 = vld [vmem:[#allocation7 + $0x268] sm:$0xff]  ;;  %v626_v7 = vld [vmem:[#allocation7 + $0x258] sm:$0xff]  ;;  %7186 = vst [vmem:[#allocation46_spill] sm:$0xff] %v5977_v45  ;;  %v625_v56 = vld [vmem:[#allocation7 + $0x250] sm:$0xff] }
  0x91   :  { %v5975_v16 = vpack.c.bf16 %v630_v63, %v626_v7  ;;  %v629_v62 = vld [vmem:[#allocation7 + $0x270] sm:$0xff]  ;;  %v638_v7 = vld [vmem:[#allocation7 + $0x2b8] sm:$0xff]  ;;  %v631_v63 = vld [vmem:[#allocation7 + $0x280] sm:$0xff] }
  0x92   :  { %7180 = vst [vmem:[#allocation40_spill] sm:$0xff] %v5961_v50  ;;  %3752 = vmatprep.subr.bf16.mxu0 %v5961_v50  ;;  %7183 = vst [vmem:[#allocation43_spill] sm:$0xff] %v5968_v26  ;;  %v5989_v50 = vpack.c.bf16 %v635_v1, %v631_v63  ;;  %v643_v63 = vld [vmem:[#allocation7 + $0x2e0] sm:$0xff] }
  0x93   :  { %3814 = vmatpush1.bf16.msra.mxu1 %v5956_v37  ;;  %3754 = vmatpush1.bf16.msra.mxu0 %v5965_v51  ;;  %v624_v37 = vld [vmem:[#allocation7 + $0x248] sm:$0xff]  ;;  %7185 = vst [vmem:[#allocation45_spill] sm:$0xff] %v5975_v16 }
  0x94   :  { %3816 = vmatprep.subr.bf16.mxu1 %v5963_v25  ;;  %v5973_v24 = vpack.c.bf16 %v628_v39, %v624_v37  ;;  %v5980_v25 = vpack.c.bf16 %v629_v62, %v625_v56  ;;  %v636_v37 = vld [vmem:[#allocation7 + $0x2a8] sm:$0xff]  ;;  %v634_v39 = vld [vmem:[#allocation7 + $0x298] sm:$0xff]  ;;  %7190 = vst [vmem:[#allocation50_spill] sm:$0xff] %v5989_v50  ;;  %v633_v56 = vld [vmem:[#allocation7 + $0x290] sm:$0xff] }
  0x95   :  { %v5987_v15 = vpack.c.bf16 %v638_v7, %v634_v39  ;;  %v637_v62 = vld [vmem:[#allocation7 + $0x2b0] sm:$0xff]  ;;  %v646_v39 = vld [vmem:[#allocation7 + $0x2f8] sm:$0xff]  ;;  %v639_v7 = vld [vmem:[#allocation7 + $0x2c0] sm:$0xff] }
  0x96   :  { %7184 = vst [vmem:[#allocation44_spill] sm:$0xff] %v5973_v24  ;;  %3756 = vmatprep.subr.bf16.mxu0 %v5973_v24  ;;  %7187 = vst [vmem:[#allocation47_spill] sm:$0xff] %v5980_v25  ;;  %v6001_v24 = vpack.c.bf16 %v643_v63, %v639_v7  ;;  %v651_v7 = vld [vmem:[#allocation7 + $0x320] sm:$0xff] }
  0x97   :  { %3818 = vmatpush1.bf16.msra.mxu1 %v5968_v26  ;;  %3758 = vmatpush1.bf16.msra.mxu0 %v5977_v45  ;;  %v632_v26 = vld [vmem:[#allocation7 + $0x288] sm:$0xff]  ;;  %7189 = vst [vmem:[#allocation49_spill] sm:$0xff] %v5987_v15 }
  0x98   :  { %3820 = vmatprep.subr.bf16.mxu1 %v5975_v16  ;;  %v5985_v51 = vpack.c.bf16 %v636_v37, %v632_v26  ;;  %v5992_v16 = vpack.c.bf16 %v637_v62, %v633_v56  ;;  %v644_v26 = vld [vmem:[#allocation7 + $0x2e8] sm:$0xff]  ;;  %v642_v37 = vld [vmem:[#allocation7 + $0x2d8] sm:$0xff]  ;;  %7194 = vst [vmem:[#allocation54_spill] sm:$0xff] %v6001_v24  ;;  %v641_v56 = vld [vmem:[#allocation7 + $0x2d0] sm:$0xff] }
  0x99   :  { %v5999_v1 = vpack.c.bf16 %v646_v39, %v642_v37  ;;  %v645_v62 = vld [vmem:[#allocation7 + $0x2f0] sm:$0xff]  ;;  %v654_v37 = vld [vmem:[#allocation7 + $0x338] sm:$0xff]  ;;  %v647_v39 = vld [vmem:[#allocation7 + $0x300] sm:$0xff] }
  0x9a   :  { %7188 = vst [vmem:[#allocation48_spill] sm:$0xff] %v5985_v51  ;;  %3760 = vmatprep.subr.bf16.mxu0 %v5985_v51  ;;  %7191 = vst [vmem:[#allocation51_spill] sm:$0xff] %v5992_v16  ;;  %v6013_v51 = vpack.c.bf16 %v651_v7, %v647_v39  ;;  %v659_v39 = vld [vmem:[#allocation7 + $0x360] sm:$0xff] }
  0x9b   :  { %3822 = vmatpush1.bf16.msra.mxu1 %v5980_v25  ;;  %3762 = vmatpush1.bf16.msra.mxu0 %v5989_v50  ;;  %v640_v25 = vld [vmem:[#allocation7 + $0x2c8] sm:$0xff]  ;;  %7193 = vst [vmem:[#allocation53_spill] sm:$0xff] %v5999_v1 }
  0x9c   :  { %3824 = vmatprep.subr.bf16.mxu1 %v5987_v15  ;;  %v5997_v45 = vpack.c.bf16 %v644_v26, %v640_v25  ;;  %v6004_v15 = vpack.c.bf16 %v645_v62, %v641_v56  ;;  %v652_v25 = vld [vmem:[#allocation7 + $0x328] sm:$0xff]  ;;  %v650_v26 = vld [vmem:[#allocation7 + $0x318] sm:$0xff]  ;;  %7198 = vst [vmem:[#allocation58_spill] sm:$0xff] %v6013_v51  ;;  %v649_v56 = vld [vmem:[#allocation7 + $0x310] sm:$0xff] }
  0x9d   :  { %v6011_v63 = vpack.c.bf16 %v654_v37, %v650_v26  ;;  %v653_v62 = vld [vmem:[#allocation7 + $0x330] sm:$0xff]  ;;  %v662_v26 = vld [vmem:[#allocation7 + $0x378] sm:$0xff]  ;;  %v655_v37 = vld [vmem:[#allocation7 + $0x340] sm:$0xff] }
  0x9e   :  { %7192 = vst [vmem:[#allocation52_spill] sm:$0xff] %v5997_v45  ;;  %3764 = vmatprep.subr.bf16.mxu0 %v5997_v45  ;;  %7195 = vst [vmem:[#allocation55_spill] sm:$0xff] %v6004_v15  ;;  %v6025_v45 = vpack.c.bf16 %v659_v39, %v655_v37 }
  0x9f   :  { %3826 = vmatpush1.bf16.msra.mxu1 %v5992_v16  ;;  %3766 = vmatpush1.bf16.msra.mxu0 %v6001_v24  ;;  %v648_v16 = vld [vmem:[#allocation7 + $0x308] sm:$0xff]  ;;  %7197 = vst [vmem:[#allocation57_spill] sm:$0xff] %v6011_v63 }
  0xa0   :  { %3828 = vmatprep.subr.bf16.mxu1 %v5999_v1  ;;  %v6009_v50 = vpack.c.bf16 %v652_v25, %v648_v16  ;;  %v6016_v1 = vpack.c.bf16 %v653_v62, %v649_v56  ;;  %v660_v16 = vld [vmem:[#allocation7 + $0x368] sm:$0xff]  ;;  %v658_v25 = vld [vmem:[#allocation7 + $0x358] sm:$0xff]  ;;  %7202 = vst [vmem:[#allocation62_spill] sm:$0xff] %v6025_v45  ;;  %v657_v56 = vld [vmem:[#allocation7 + $0x350] sm:$0xff] }
  0xa1   :  { %v6023_v7 = vpack.c.bf16 %v662_v26, %v658_v25  ;;  %v661_v62 = vld [vmem:[#allocation7 + $0x370] sm:$0xff]  ;;  %v663_v25 = vld [vmem:[#allocation7 + $0x380] sm:$0xff] }
  0xa2   :  { %7196 = vst [vmem:[#allocation56_spill] sm:$0xff] %v6009_v50  ;;  %3768 = vmatprep.subr.bf16.mxu0 %v6009_v50  ;;  %7199 = vst [vmem:[#allocation59_spill] sm:$0xff] %v6016_v1  ;;  %v668_v50 = vld [vmem:[#allocation7 + $0x3a8] sm:$0xff]  ;;  %v667_v26 = vld [vmem:[#allocation7 + $0x3a0] sm:$0xff] }
  0xa3   :  { %3830 = vmatpush1.bf16.msra.mxu1 %v6004_v15  ;;  %3770 = vmatpush1.bf16.msra.mxu0 %v6013_v51  ;;  %v656_v15 = vld [vmem:[#allocation7 + $0x348] sm:$0xff]  ;;  %7201 = vst [vmem:[#allocation61_spill] sm:$0xff] %v6023_v7  ;;  %v6037_v39 = vpack.c.bf16 %v667_v26, %v663_v25  ;;  %v673_v25 = vld [vmem:[#allocation7 + $0x3d0] sm:$0xff] }
  0xa4   :  { %3832 = vmatprep.subr.bf16.mxu1 %v6011_v63  ;;  %v6021_v24 = vpack.c.bf16 %v660_v16, %v656_v15  ;;  %v6028_v63 = vpack.c.bf16 %v661_v62, %v657_v56  ;;  %v664_v51 = vld [vmem:[#allocation7 + $0x388] sm:$0xff]  ;;  %v670_v16 = vld [vmem:[#allocation7 + $0x3b8] sm:$0xff]  ;;  %v665_v56 = vld [vmem:[#allocation7 + $0x390] sm:$0xff] }
  0xa5   :  { %v6032_v15 = vpack.c.bf16 %v668_v50, %v664_v51  ;;  %v6035_v37 = vpack.c.bf16 %v670_v16, %v666_v35  ;;  %7206 = vst [vmem:[#allocation66_spill] sm:$0xff] %v6037_v39  ;;  %v669_v62 = vld [vmem:[#allocation7 + $0x3b0] sm:$0xff]  ;;  %v678_v50 = vld [vmem:[#allocation7 + $0x3f8] sm:$0xff]  ;;  %v671_v35 = vld [vmem:[#allocation7 + $0x3c0] sm:$0xff] }
  0xa6   :  { %7200 = vst [vmem:[#allocation60_spill] sm:$0xff] %v6021_v24  ;;  %3772 = vmatprep.subr.bf16.mxu0 %v6021_v24  ;;  %7203 = vst [vmem:[#allocation63_spill] sm:$0xff] %v6028_v63  ;;  %v672_v24 = vld [vmem:[#allocation7 + $0x3c8] sm:$0xff]  ;;  %v675_v16 = vld [vmem:[#allocation7 + $0x3e0] sm:$0xff] }
  0xa7   :  { %3834 = vmatpush1.bf16.msra.mxu1 %v6016_v1  ;;  %3774 = vmatpush1.bf16.msra.mxu0 %v6025_v45  ;;  %7204 = vst [vmem:[#allocation64_spill] sm:$0xff] %v6032_v15  ;;  %7205 = vst [vmem:[#allocation65_spill] sm:$0xff] %v6035_v37  ;;  %v6040_v1 = vpack.c.bf16 %v669_v62, %v665_v56  ;;  %v674_v45 = vld [vmem:[#allocation7 + $0x3d8] sm:$0xff]  ;;  %v6048_v26 = vpack.c.bf16 %v675_v16, %v671_v35 }
  0xa8   :  { %3836 = vmatprep.subr.bf16.mxu1 %v6023_v7  ;;  %3776 = vmatprep.subr.bf16.mxu0 %v6032_v15  ;;  %v676_v7 = vld [vmem:[#allocation7 + $0x3e8] sm:$0xff]  ;;  %v6045_v18 = vpack.c.bf16 %v678_v50, %v674_v45 }
  0xa9   :  { %7207 = vst [vmem:[#allocation67_spill] sm:$0xff] %v6040_v1  ;;  %v6043_v51 = vpack.c.bf16 %v676_v7, %v672_v24  ;;  %7210 = vst [vmem:[#allocation70_spill] sm:$0xff] %v6048_v26  ;;  %v151_v24 = vlaneseq }
  0xaa   :  { %7209 = vst [vmem:[#allocation69_spill] sm:$0xff] %v6045_v18 }
  0xab   :  { %3838 = vmatpush1.bf16.msra.mxu1 %v6028_v63  ;;  %7208 = vst [vmem:[#allocation68_spill] sm:$0xff] %v6043_v51  ;;  %3778 = vmatpush1.bf16.msra.mxu0 %v6037_v39  ;;  %v677_v63 = vld [vmem:[#allocation7 + $0x3f0] sm:$0xff]  ;;  %v6059_v62 = vshrl.u32 %v151_v24, 7 }
  0xac   :  { %3840 = vmatprep.subr.bf16.mxu1 %v6035_v37  ;;  %3780 = vmatprep.subr.bf16.mxu0 %v6043_v51  ;;  %v6052_v56 = vpack.c.bf16 %v677_v63, %v673_v25  ;;  %v149_v63 = vld [vmem:[%s7008_s4] sm:$0xf] }
  0xad   :  { %v7118_v50 = vsub.s32 0, %v6059_v62  ;;  %v7121_v35 = vsub.s32 1, %v6059_v62  ;;  %v7124_v15 = vsub.s32 2, %v6059_v62 }
  0xae   :  { %7211 = vst [vmem:[#allocation71_spill] sm:$0xff] %v6052_v56 }
  0xaf   :  { %3842 = vmatpush1.bf16.msra.mxu1 %v6040_v1  ;;  %3782 = vmatpush1.bf16.msra.mxu0 %v6048_v26 }
  0xb0   :  { %3844 = vmatprep.subr.bf16.mxu1 %v6045_v18  ;;  %3848 = vmatprep.subr.bf16.mxu0 %v5658_v3  ;;  %v154_v3 = vrot.slane %v149_v63, %v7118_v50  ;;  %v7127_v50 = vsub.s32 3, %v6059_v62 }
  0xb3   :  { %3846 = vmatpush1.bf16.msra.mxu1 %v6052_v56 }
  0xb4   :  { %3880 = vmatprep.subr.bf16.mxu1 %v5797_v31  ;;  %v158_v31 = vrot.slane %v149_v63, %v7121_v35 }
 0x121   :  { %v241_v45 = vpop.f32.mrb[0].mxu1 }
 0x122   :  { %v243_v7 = vpop.f32.mrb[1].mxu1  ;;  %v6070_v56 = vadd.f32 %v241_v45, %v154_v3  ;;  %v162_v3 = vrot.slane %v149_v63, %v7124_v15 }
 0x123   :  { %v6072_v24 = vadd.f32 %v243_v7, %v158_v31  ;;  %v166_v31 = vrot.slane %v149_v63, %v7127_v50  ;;  %v7229_v50 = vld [vmem:[#allocation36_spill] sm:$0xff] }
 0x124   :  { %7212 = vst [vmem:[#allocation72_spill] sm:$0xff] %v6070_v56 }
 0x125   :  { %7213 = vst [vmem:[#allocation73_spill] sm:$0xff] %v6072_v24 }
 0x129   :  { %v312_v16 = vpop.f32.mrb[2].mxu1 }
 0x12a   :  { %v314_v25 = vpop.f32.mrb[3].mxu1  ;;  %v6082_v7 = vadd.f32 %v312_v16, %v162_v3 }
 0x12e   :  { %v447_v26 = vpop.f32.mrb[0].mxu0 }
 0x12f   :  { %v523_v18 = vadd.f32 %v447_v26, %v6070_v56  ;;  %v449_v51 = vpop.f32.mrb[1].mxu0 }
 0x130   :  { %v524_v1 = vadd.f32 %v449_v51, %v6072_v24 }
 0x131   :  { %v3538_v37 = vmul.f32 -1.442695, %v523_v18 }
 0x132   :  { %v3539_v39 = vmul.f32 -1.442695, %v524_v1  ;;  %v6084_v1 = vadd.f32 %v314_v25, %v166_v31 }
 0x134   :  { %5224 = vpow2.f32 %v3539_v39 }
 0x135   :  { %5226 = vpow2.f32 %v3538_v37 }
 0x13e   :  { %v5225_v6 = vpop.eup %5224 }
 0x13f   :  { %v5227_v35 = vpop.eup %5226  ;;  %v536_v26 = vadd.f32 1.0, %v5225_v6 }
 0x140   :  { %v530_v45 = vadd.f32 1.0, %v5227_v35 }
 0x141   :  { %5228 = vrcp.f32 %v536_v26 }
 0x142   :  { %5230 = vrcp.f32 %v530_v45 }
 0x149   :  { %v518_v18 = vpop.f32.mrb[4].mxu1 }
 0x14a   :  { %v525_v37 = vadd.f32 %v518_v18, %v6082_v7  ;;  %v520_v39 = vpop.f32.mrb[5].mxu1  ;;  %v7217_v18 = vld [vmem:[#allocation24_spill] sm:$0xff] }
 0x14b   :  { %v526_v51 = vadd.f32 %v520_v39, %v6084_v1  ;;  %v5229_v15 = vpop.eup %5228  ;;  %v7219_v39 = vld [vmem:[#allocation26_spill] sm:$0xff] }
 0x14c   :  { %5232 = vtanh.f32 %v525_v37  ;;  %v5231_v56 = vpop.eup %5230  ;;  %v546_v6 = vmul.f32 0.0, %v5229_v15  ;;  %v7214_v15 = vmov 0.0   ;;  %v7218_v37 = vld [vmem:[#allocation25_spill] sm:$0xff] }
 0x14d   :  { %v3540_v24 = vmul.f32 -1.442695, %v526_v51  ;;  %v7220_v51 = vld [vmem:[#allocation27_spill] sm:$0xff] }
 0x14f   :  { %5234 = vpow2.f32 %v3540_v24  ;;  %v7216_v24 = vld [vmem:[#allocation23_spill] sm:$0xff] }
 0x156   :  { %v5233_v63 = vpop.eup %5232 }
 0x157   :  { %v547_v35 = vmul.f32 %v5233_v63, %v5231_v56  ;;  %v7215_v56 = vld [vmem:[#allocation22_spill] sm:$0xff]  ;;  %v7221_v63 = vld [vmem:[#allocation28_spill] sm:$0xff] }
 0x159   :  { %v5235_v16 = vpop.eup %5234  ;;  %v6088_v3 = vadd.f32 %v547_v35, %v546_v6  ;;  %v7222_v6 = vld [vmem:[#allocation29_spill] sm:$0xff]  ;;  %v7223_v35 = vld [vmem:[#allocation30_spill] sm:$0xff] }
 0x15a   :  { %v543_v25 = vadd.f32 1.0, %v5235_v16  ;;  %v7224_v16 = vld [vmem:[#allocation31_spill] sm:$0xff] }
 0x15b   :  { %5236 = vtanh.f32 %v6088_v3 }
 0x15c   :  { %5238 = vrcp.f32 %v543_v25  ;;  %v7225_v25 = vld [vmem:[#allocation32_spill] sm:$0xff] }
 0x165   :  { %v5237_v31 = vpop.eup %5236 }
 0x166   :  { %v5239_v26 = vpop.eup %5238 }
 0x167   :  { %v550_v45 = vmul.f32 %v5239_v26, %v5237_v31  ;;  %v7226_v31 = vld [vmem:[#allocation33_spill] sm:$0xff]  ;;  %v7227_v26 = vld [vmem:[#allocation34_spill] sm:$0xff] }
 0x169   :  { %766 = vmatmul.mubr.f32.vlgmr.msra.gmra.mrb[2].mxu0 %v550_v45  ;;  %837 = vmatmul.mubr.f32.vlgmr.msra.gmra.mrb[6].mxu1 %v550_v45 }
 0x16a   :  { %3850 = vmatpush1.bf16.msra.mxu0 %v5664_v8  ;;  %3882 = vmatpush1.bf16.msra.mxu1 %v5803_v41 }
 0x16b   :  { %3852 = vmatprep.subr.bf16.mxu0 %v5666_v9  ;;  %3884 = vmatprep.subr.bf16.mxu1 %v5809_v44 }
 0x16c   :  { %931 = vmatprep.mubr.f32.mxu0 %v7214_v15  ;;  %1002 = vmatprep.mubr.f32.mxu1 %v7214_v15 }
 0x16e   :  { %3854 = vmatpush1.bf16.msra.mxu0 %v5686_v17  ;;  %3886 = vmatpush1.bf16.msra.mxu1 %v5816_v52 }
 0x16f   :  { %3856 = vmatprep.subr.bf16.mxu0 %v5694_v22  ;;  %3888 = vmatprep.subr.bf16.mxu1 %v5822_v54 }
 0x172   :  { %3858 = vmatpush1.bf16.msra.mxu0 %v5726_v34  ;;  %3890 = vmatpush1.bf16.msra.mxu1 %v5827_v60 }
 0x173   :  { %3860 = vmatprep.subr.bf16.mxu0 %v5733_v38  ;;  %3892 = vmatprep.subr.bf16.mxu1 %v5830_v61 }
 0x176   :  { %3862 = vmatpush1.bf16.msra.mxu0 %v5748_v49  ;;  %3894 = vmatpush1.bf16.msra.mxu1 %v5834_v2 }
 0x177   :  { %3864 = vmatprep.subr.bf16.mxu0 %v5767_v58  ;;  %3896 = vmatprep.subr.bf16.mxu1 %v5838_v4 }
 0x17a   :  { %3866 = vmatpush1.bf16.msra.mxu0 %v5779_v12  ;;  %3898 = vmatpush1.bf16.msra.mxu1 %v5841_v13 }
 0x17b   :  { %3868 = vmatprep.subr.bf16.mxu0 %v5790_v23  ;;  %3900 = vmatprep.subr.bf16.mxu1 %v5844_v14 }
 0x17e   :  { %3870 = vmatpush1.bf16.msra.mxu0 %v5794_v28  ;;  %3902 = vmatpush1.bf16.msra.mxu1 %v5847_v20 }
 0x17f   :  { %3872 = vmatprep.subr.bf16.mxu0 %v5799_v32  ;;  %3904 = vmatprep.subr.bf16.mxu1 %v5850_v21 }
 0x182   :  { %3874 = vmatpush1.bf16.msra.mxu0 %v5805_v42  ;;  %3906 = vmatpush1.bf16.msra.mxu1 %v5853_v29 }
 0x183   :  { %3876 = vmatprep.subr.bf16.mxu0 %v5811_v46  ;;  %3908 = vmatprep.subr.bf16.mxu1 %v5856_v30 }
 0x186   :  { %3878 = vmatpush1.bf16.msra.mxu0 %v5818_v53  ;;  %3910 = vmatpush1.bf16.msra.mxu1 %v5859_v36 }
 0x187   :  { %3912 = vmatprep.subr.bf16.mxu0 %v5865_v43  ;;  %3976 = vmatprep.subr.bf16.mxu1 %v5867_v47 }
 0x189   :  { %932 = vmatmul.mubr.f32.vlgmr.msra.gmra.mrb[4].mxu0 %v550_v45  ;;  %1003 = vmatmul.mubr.f32.vlgmr.msra.gmra.mrb[8].mxu1 %v550_v45  ;;  %v7228_v45 = vld [vmem:[#allocation35_spill] sm:$0xff] }
 0x18a   :  { %3914 = vmatpush1.bf16.msra.mxu0 %v5871_v55  ;;  %3978 = vmatpush1.bf16.msra.mxu1 %v5873_v57 }
 0x18b   :  { %3916 = vmatprep.subr.bf16.mxu0 %v5877_v0  ;;  %3980 = vmatprep.subr.bf16.mxu1 %v5879_v10 }
 0x18e   :  { %3918 = vmatpush1.bf16.msra.mxu0 %v5881_v11  ;;  %3982 = vmatpush1.bf16.msra.mxu1 %v5884_v19 }
 0x18f   :  { %3920 = vmatprep.subr.bf16.mxu0 %v5888_v27  ;;  %3984 = vmatprep.subr.bf16.mxu1 %v5890_v33 }
 0x192   :  { %3922 = vmatpush1.bf16.msra.mxu0 %v5893_v40  ;;  %3986 = vmatpush1.bf16.msra.mxu1 %v5897_v48 }
 0x193   :  { %3924 = vmatprep.subr.bf16.mxu0 %v5901_v59  ;;  %3988 = vmatprep.subr.bf16.mxu1 %v5903_v5 }
 0x196   :  { %3926 = vmatpush1.bf16.msra.mxu0 %v7215_v56  ;;  %3990 = vmatpush1.bf16.msra.mxu1 %v7216_v24 }
 0x197   :  { %3928 = vmatprep.subr.bf16.mxu0 %v7217_v18  ;;  %3992 = vmatprep.subr.bf16.mxu1 %v7218_v37  ;;  %v7271_v18 = vsub.s32 3, %v6059_v62 }
 0x19a   :  { %3930 = vmatpush1.bf16.msra.mxu0 %v7219_v39  ;;  %3994 = vmatpush1.bf16.msra.mxu1 %v7220_v51  ;;  %v7230_v39 = vld [vmem:[#allocation37_spill] sm:$0xff]  ;;  %v7231_v51 = vld [vmem:[#allocation38_spill] sm:$0xff] }
 0x19b   :  { %3932 = vmatprep.subr.bf16.mxu0 %v7221_v63  ;;  %3996 = vmatprep.subr.bf16.mxu1 %v7222_v6  ;;  %v7232_v63 = vld [vmem:[#allocation39_spill] sm:$0xff]  ;;  %v7233_v6 = vld [vmem:[#allocation40_spill] sm:$0xff] }
 0x19e   :  { %3934 = vmatpush1.bf16.msra.mxu0 %v7223_v35  ;;  %3998 = vmatpush1.bf16.msra.mxu1 %v7224_v16  ;;  %v7234_v35 = vld [vmem:[#allocation41_spill] sm:$0xff]  ;;  %v7235_v16 = vld [vmem:[#allocation42_spill] sm:$0xff] }
 0x19f   :  { %3936 = vmatprep.subr.bf16.mxu0 %v7225_v25  ;;  %4000 = vmatprep.subr.bf16.mxu1 %v7226_v31  ;;  %v7236_v25 = vld [vmem:[#allocation43_spill] sm:$0xff]  ;;  %v7237_v31 = vld [vmem:[#allocation44_spill] sm:$0xff] }
 0x1a2   :  { %3938 = vmatpush1.bf16.msra.mxu0 %v7227_v26  ;;  %4002 = vmatpush1.bf16.msra.mxu1 %v7228_v45  ;;  %v7238_v26 = vld [vmem:[#allocation45_spill] sm:$0xff]  ;;  %v7239_v45 = vld [vmem:[#allocation46_spill] sm:$0xff] }
 0x1a3   :  { %3940 = vmatprep.subr.bf16.mxu0 %v7229_v50  ;;  %4004 = vmatprep.subr.bf16.mxu1 %v7230_v39  ;;  %v7240_v50 = vld [vmem:[#allocation47_spill] sm:$0xff]  ;;  %v7241_v39 = vld [vmem:[#allocation48_spill] sm:$0xff] }
 0x1a6   :  { %3942 = vmatpush1.bf16.msra.mxu0 %v7231_v51  ;;  %4006 = vmatpush1.bf16.msra.mxu1 %v7232_v63  ;;  %v7242_v51 = vld [vmem:[#allocation49_spill] sm:$0xff]  ;;  %v7243_v63 = vld [vmem:[#allocation50_spill] sm:$0xff] }
 0x1a7   :  { %3944 = vmatprep.subr.bf16.mxu0 %v7233_v6  ;;  %4008 = vmatprep.subr.bf16.mxu1 %v7234_v35  ;;  %v7244_v6 = vld [vmem:[#allocation51_spill] sm:$0xff]  ;;  %v7245_v35 = vld [vmem:[#allocation52_spill] sm:$0xff] }
 0x1aa   :  { %3946 = vmatpush1.bf16.msra.mxu0 %v7235_v16  ;;  %4010 = vmatpush1.bf16.msra.mxu1 %v7236_v25  ;;  %v7246_v16 = vld [vmem:[#allocation53_spill] sm:$0xff]  ;;  %v7247_v25 = vld [vmem:[#allocation54_spill] sm:$0xff] }
 0x1ab   :  { %3948 = vmatprep.subr.bf16.mxu0 %v7237_v31  ;;  %4012 = vmatprep.subr.bf16.mxu1 %v7238_v26  ;;  %v7248_v31 = vld [vmem:[#allocation55_spill] sm:$0xff]  ;;  %v7249_v26 = vld [vmem:[#allocation56_spill] sm:$0xff] }
 0x1ae   :  { %3950 = vmatpush1.bf16.msra.mxu0 %v7239_v45  ;;  %4014 = vmatpush1.bf16.msra.mxu1 %v7240_v50  ;;  %v7250_v45 = vld [vmem:[#allocation57_spill] sm:$0xff]  ;;  %v7251_v50 = vld [vmem:[#allocation58_spill] sm:$0xff] }
 0x1af   :  { %3952 = vmatprep.subr.bf16.mxu0 %v7241_v39  ;;  %4016 = vmatprep.subr.bf16.mxu1 %v7242_v51  ;;  %v7252_v39 = vld [vmem:[#allocation59_spill] sm:$0xff]  ;;  %v7253_v51 = vld [vmem:[#allocation60_spill] sm:$0xff] }
 0x1b2   :  { %3954 = vmatpush1.bf16.msra.mxu0 %v7243_v63  ;;  %4018 = vmatpush1.bf16.msra.mxu1 %v7244_v6  ;;  %v7254_v63 = vld [vmem:[#allocation61_spill] sm:$0xff]  ;;  %v7255_v6 = vld [vmem:[#allocation62_spill] sm:$0xff] }
 0x1b3   :  { %3956 = vmatprep.subr.bf16.mxu0 %v7245_v35  ;;  %4020 = vmatprep.subr.bf16.mxu1 %v7246_v16  ;;  %v7256_v35 = vld [vmem:[#allocation63_spill] sm:$0xff]  ;;  %v7257_v16 = vld [vmem:[#allocation64_spill] sm:$0xff] }
 0x1b6   :  { %3958 = vmatpush1.bf16.msra.mxu0 %v7247_v25  ;;  %4022 = vmatpush1.bf16.msra.mxu1 %v7248_v31  ;;  %v7258_v25 = vld [vmem:[#allocation65_spill] sm:$0xff]  ;;  %v7259_v31 = vld [vmem:[#allocation66_spill] sm:$0xff] }
 0x1b7   :  { %3960 = vmatprep.subr.bf16.mxu0 %v7249_v26  ;;  %4024 = vmatprep.subr.bf16.mxu1 %v7250_v45  ;;  %v7260_v26 = vld [vmem:[#allocation67_spill] sm:$0xff]  ;;  %v7261_v45 = vld [vmem:[#allocation68_spill] sm:$0xff] }
 0x1ba   :  { %3962 = vmatpush1.bf16.msra.mxu0 %v7251_v50  ;;  %4026 = vmatpush1.bf16.msra.mxu1 %v7252_v39  ;;  %v7262_v50 = vld [vmem:[#allocation69_spill] sm:$0xff]  ;;  %v7263_v39 = vld [vmem:[#allocation70_spill] sm:$0xff] }
 0x1bb   :  { %3964 = vmatprep.subr.bf16.mxu0 %v7253_v51  ;;  %4028 = vmatprep.subr.bf16.mxu1 %v7254_v63  ;;  %v7264_v51 = vld [vmem:[#allocation71_spill] sm:$0xff]  ;;  %v7265_v63 = vld [vmem:[#allocation14_spill] sm:$0xff] }
 0x1be   :  { %3966 = vmatpush1.bf16.msra.mxu0 %v7255_v6  ;;  %4030 = vmatpush1.bf16.msra.mxu1 %v7256_v35  ;;  %v7266_v6 = vld [vmem:[#allocation15_spill] sm:$0xff] }
 0x1bf   :  { %3968 = vmatprep.subr.bf16.mxu0 %v7257_v16  ;;  %4032 = vmatprep.subr.bf16.mxu1 %v7258_v25  ;;  %v679_v25 = vld [vmem:[%s7010_s6] sm:$0xf] }
 0x1c0   :  { %v6204_v24 = vrot.slane %v679_v25, %v7271_v18 }
 0x1c2   :  { %3970 = vmatpush1.bf16.msra.mxu0 %v7259_v31  ;;  %4034 = vmatpush1.bf16.msra.mxu1 %v7260_v26  ;;  %v7267_v31 = vsub.s32 0, %v6059_v62  ;;  %7272 = vst [vmem:[#allocation76_spill] sm:$0xff] %v6204_v24 }
 0x1c3   :  { %3972 = vmatprep.subr.bf16.mxu0 %v7261_v45  ;;  %4036 = vmatprep.subr.bf16.mxu1 %v7262_v50  ;;  %v7269_v45 = vsub.s32 1, %v6059_v62 }
 0x1c4   :  { %v6194_v16 = vrot.slane %v679_v25, %v7267_v31 }
 0x1c5   :  { %v6198_v26 = vrot.slane %v679_v25, %v7269_v45  ;;  %v7273_v45 = vsub.s32 2, %v6059_v62 }
 0x1c6   :  { %3974 = vmatpush1.bf16.msra.mxu0 %v7263_v39  ;;  %4038 = vmatpush1.bf16.msra.mxu1 %v7264_v51  ;;  %7268 = vst [vmem:[#allocation74_spill] sm:$0xff] %v6194_v16 }
 0x1c7   :  { %4040 = vmatprep.subr.bf16.mxu0 %v7265_v63  ;;  %4072 = vmatprep.subr.bf16.mxu1 %v7266_v6  ;;  %7270 = vst [vmem:[#allocation75_spill] sm:$0xff] %v6198_v26  ;;  %v6209_v5 = vrot.slane %v679_v25, %v7273_v45 }
 0x1c9   :  { %7274 = vst [vmem:[#allocation77_spill] sm:$0xff] %v6209_v5 }
 0x23c   :  { %v767_v50 = vpop.f32.mrb[2].mxu0  ;;  %v838_v39 = vpop.f32.mrb[6].mxu1 }
 0x23d   :  { %v768_v51 = vadd.f32 %v767_v50, %v6194_v16  ;;  %v769_v35 = vpop.f32.mrb[3].mxu0  ;;  %v840_v63 = vpop.f32.mrb[7].mxu1  ;;  %v839_v50 = vadd.f32 %v838_v39, %v6209_v5 }
 0x23e   :  { %v770_v6 = vadd.f32 %v769_v35, %v6198_v26  ;;  %v841_v31 = vadd.f32 %v840_v63, %v6204_v24 }
 0x23f   :  { %v3541_v37 = vmul.f32 -1.442695, %v768_v51 }
 0x240   :  { %v3542_v56 = vmul.f32 -1.442695, %v770_v6  ;;  %v3543_v59 = vmul.f32 -1.442695, %v841_v31 }
 0x241   :  { %5240 = vpow2.f32 %v3541_v37 }
 0x242   :  { %5242 = vpow2.f32 %v3542_v56 }
 0x243   :  { %5244 = vpow2.f32 %v3543_v59  ;;  %v7275_v59 = vld [vmem:[#allocation72_spill] sm:$0xff] }
 0x244   :  { %5246 = vtanh.f32 %v839_v50 }
 0x24b   :  { %v5241_v16 = vpop.eup %5240 }
 0x24c   :  { %v5243_v48 = vpop.eup %5242  ;;  %v846_v35 = vadd.f32 1.0, %v5241_v16 }
 0x24d   :  { %v852_v51 = vadd.f32 1.0, %v5243_v48  ;;  %v5245_v18 = vpop.eup %5244 }
 0x24e   :  { %5248 = vrcp.f32 %v846_v35  ;;  %v5247_v37 = vpop.eup %5246  ;;  %v859_v24 = vadd.f32 1.0, %v5245_v18  ;;  %v7276_v35 = vld [vmem:[#allocation73_spill] sm:$0xff] }
 0x24f   :  { %5250 = vrcp.f32 %v852_v51 }
 0x250   :  { %5252 = vrcp.f32 %v859_v24 }
 0x258   :  { %v5249_v56 = vpop.eup %5248 }
 0x259   :  { %v5251_v6 = vpop.eup %5250  ;;  %v863_v63 = vmul.f32 %v5249_v56, %v5247_v37 }
 0x25a   :  { %v862_v62 = vmul.f32 0.0, %v5251_v6  ;;  %v5253_v56 = vpop.eup %5252 }
 0x25c   :  { %v6212_v25 = vadd.f32 %v863_v63, %v862_v62  ;;  %v933_v31 = vpop.f32.mrb[4].mxu0  ;;  %v1004_v45 = vpop.f32.mrb[8].mxu1 }
 0x25d   :  { %v1013_v39 = vrot.slane %v933_v31, 7  ;;  %v935_v5 = vpop.f32.mrb[5].mxu0  ;;  %v1006_v16 = vpop.f32.mrb[9].mxu1  ;;  %v1015_v6 = vrot.slane %v1004_v45, 7 }
 0x25e   :  { %5254 = vtanh.f32 %v6212_v25  ;;  %v1014_v48 = vrot.slane %v935_v5, 7  ;;  %v1016_v37 = vrot.slane %v1006_v16, 7 }
 0x25f   :  { %v1021_v50 = vadd.f32 %v1013_v39, %v7275_v59  ;;  %v1023_v31 = vadd.f32 %v1015_v6, %v6082_v7 }
 0x260   :  { %v1022_v51 = vadd.f32 %v1014_v48, %v7276_v35  ;;  %v1024_v18 = vadd.f32 %v1016_v37, %v6084_v1 }
 0x261   :  { %v3544_v26 = vmul.f32 -1.442695, %v1021_v50 }
 0x262   :  { %v3545_v40 = vmul.f32 -1.442695, %v1022_v51  ;;  %v3546_v62 = vmul.f32 -1.442695, %v1024_v18  ;;  %v1045_v51 = vrot.slane %v6088_v3, 7  ;;  %v7278_v3 = vld [vmem:[#allocation18_spill] sm:$0xff] }
 0x263   :  { %5256 = vpow2.f32 %v3544_v26 }
 0x264   :  { %5258 = vpow2.f32 %v3545_v40 }
 0x265   :  { %5260 = vpow2.f32 %v3546_v62 }
 0x266   :  { %5262 = vtanh.f32 %v1023_v31 }
 0x268   :  { %v5255_v24 = vpop.eup %5254 }
 0x269   :  { %v6218_v63 = vmul.f32 %v5255_v24, %v5253_v56 }
 0x26b   :  { %7277 = vst [vmem:[#allocation73_spill] sm:$0xff] %v6218_v63  ;;  %v1053_v5 = vrot.slane %v6218_v63, 7  ;;  %v7295_v63 = vld [vmem:[#allocation35_spill] sm:$0xff] }
 0x26d   :  { %v5257_v39 = vpop.eup %5256  ;;  %v1056_v59 = vrot.slane %v1053_v5, 1 }
 0x26e   :  { %v5259_v48 = vpop.eup %5258  ;;  %v1028_v50 = vadd.f32 1.0, %v5257_v39  ;;  %v7279_v39 = vld [vmem:[#allocation19_spill] sm:$0xff] }
 0x26f   :  { %v1034_v26 = vadd.f32 1.0, %v5259_v48  ;;  %1123 = vmatprep.mubr.f32.mxu0 %v1056_v59  ;;  %1194 = vmatprep.mubr.f32.mxu1 %v1056_v59  ;;  %v5261_v40 = vpop.eup %5260  ;;  %v7280_v48 = vld [vmem:[#allocation20_spill] sm:$0xff] }
 0x270   :  { %5264 = vrcp.f32 %v1028_v50  ;;  %v5263_v45 = vpop.eup %5262  ;;  %v1041_v56 = vadd.f32 1.0, %v5261_v40  ;;  %v7281_v50 = vld [vmem:[#allocation21_spill] sm:$0xff]  ;;  %v7283_v40 = vld [vmem:[#allocation23_spill] sm:$0xff] }
 0x271   :  { %5266 = vrcp.f32 %v1034_v26  ;;  %v7282_v26 = vld [vmem:[#allocation22_spill] sm:$0xff] }
 0x272   :  { %5268 = vrcp.f32 %v1041_v56  ;;  %v7289_v56 = vld [vmem:[#allocation29_spill] sm:$0xff] }
 0x27a   :  { %v5265_v16 = vpop.eup %5264 }
 0x27b   :  { %v5267_v37 = vpop.eup %5266  ;;  %v1048_v18 = vmul.f32 %v5265_v16, %v5263_v45  ;;  %v7284_v45 = vld [vmem:[#allocation24_spill] sm:$0xff]  ;;  %v7285_v16 = vld [vmem:[#allocation25_spill] sm:$0xff] }
 0x27c   :  { %v1047_v6 = vmul.f32 %v5267_v37, %v1045_v51  ;;  %v5269_v62 = vpop.eup %5268  ;;  %v7286_v51 = vld [vmem:[#allocation26_spill] sm:$0xff]  ;;  %v7287_v37 = vld [vmem:[#allocation27_spill] sm:$0xff] }
 0x27e   :  { %v6223_v24 = vadd.f32 %v1048_v18, %v1047_v6  ;;  %v7288_v18 = vld [vmem:[#allocation28_spill] sm:$0xff]  ;;  %v7290_v6 = vld [vmem:[#allocation30_spill] sm:$0xff] }
 0x280   :  { %5270 = vtanh.f32 %v6223_v24 }
 0x28a   :  { %v5271_v31 = vpop.eup %5270 }
 0x28b   :  { %v1051_v5 = vmul.f32 %v5271_v31, %v5269_v62  ;;  %v7291_v62 = vld [vmem:[#allocation31_spill] sm:$0xff]  ;;  %v7292_v31 = vld [vmem:[#allocation32_spill] sm:$0xff] }
 0x28d   :  { %v1055_v59 = vrot.slane %v1051_v5, 1  ;;  %v7293_v5 = vld [vmem:[#allocation33_spill] sm:$0xff] }
 0x28f   :  { %1124 = vmatmul.mubr.f32.vlgmr.msra.gmra.mrb[6].mxu0 %v1055_v59  ;;  %1195 = vmatmul.mubr.f32.vlgmr.msra.gmra.mrb[10].mxu1 %v1055_v59 }
 0x290   :  { %4042 = vmatpush1.bf16.msra.mxu0 %v5664_v8  ;;  %4074 = vmatpush1.bf16.msra.mxu1 %v5803_v41 }
 0x291   :  { %4044 = vmatprep.subr.bf16.mxu0 %v5666_v9  ;;  %4076 = vmatprep.subr.bf16.mxu1 %v5809_v44 }
 0x292   :  { %1289 = vmatprep.mubr.f32.mxu0 %v7214_v15  ;;  %1360 = vmatprep.mubr.f32.mxu1 %v7214_v15 }
 0x294   :  { %4046 = vmatpush1.bf16.msra.mxu0 %v5686_v17  ;;  %4078 = vmatpush1.bf16.msra.mxu1 %v5816_v52 }
 0x295   :  { %4048 = vmatprep.subr.bf16.mxu0 %v5694_v22  ;;  %4080 = vmatprep.subr.bf16.mxu1 %v5822_v54 }
 0x298   :  { %4050 = vmatpush1.bf16.msra.mxu0 %v5726_v34  ;;  %4082 = vmatpush1.bf16.msra.mxu1 %v5827_v60 }
 0x299   :  { %4052 = vmatprep.subr.bf16.mxu0 %v5733_v38  ;;  %4084 = vmatprep.subr.bf16.mxu1 %v5830_v61 }
 0x29c   :  { %4054 = vmatpush1.bf16.msra.mxu0 %v5748_v49  ;;  %4086 = vmatpush1.bf16.msra.mxu1 %v5834_v2 }
 0x29d   :  { %4056 = vmatprep.subr.bf16.mxu0 %v5767_v58  ;;  %4088 = vmatprep.subr.bf16.mxu1 %v5838_v4 }
 0x2a0   :  { %4058 = vmatpush1.bf16.msra.mxu0 %v5779_v12  ;;  %4090 = vmatpush1.bf16.msra.mxu1 %v5841_v13 }
 0x2a1   :  { %4060 = vmatprep.subr.bf16.mxu0 %v5790_v23  ;;  %4092 = vmatprep.subr.bf16.mxu1 %v5844_v14 }
 0x2a4   :  { %4062 = vmatpush1.bf16.msra.mxu0 %v5794_v28  ;;  %4094 = vmatpush1.bf16.msra.mxu1 %v5847_v20 }
 0x2a5   :  { %4064 = vmatprep.subr.bf16.mxu0 %v5799_v32  ;;  %4096 = vmatprep.subr.bf16.mxu1 %v5850_v21 }
 0x2a8   :  { %4066 = vmatpush1.bf16.msra.mxu0 %v5805_v42  ;;  %4098 = vmatpush1.bf16.msra.mxu1 %v5853_v29 }
 0x2a9   :  { %4068 = vmatprep.subr.bf16.mxu0 %v5811_v46  ;;  %4100 = vmatprep.subr.bf16.mxu1 %v5856_v30 }
 0x2ac   :  { %4070 = vmatpush1.bf16.msra.mxu0 %v5818_v53  ;;  %4102 = vmatpush1.bf16.msra.mxu1 %v5859_v36 }
 0x2ad   :  { %4104 = vmatprep.subr.bf16.mxu0 %v5865_v43  ;;  %4168 = vmatprep.subr.bf16.mxu1 %v5867_v47 }
 0x2af   :  { %1290 = vmatmul.mubr.f32.vlgmr.msra.gmra.mrb[8].mxu0 %v1055_v59  ;;  %1361 = vmatmul.mubr.f32.vlgmr.msra.gmra.mrb[12].mxu1 %v1055_v59  ;;  %v7294_v59 = vld [vmem:[#allocation34_spill] sm:$0xff] }
 0x2b0   :  { %4106 = vmatpush1.bf16.msra.mxu0 %v5871_v55  ;;  %4170 = vmatpush1.bf16.msra.mxu1 %v5873_v57 }
 0x2b1   :  { %4108 = vmatprep.subr.bf16.mxu0 %v5877_v0  ;;  %4172 = vmatprep.subr.bf16.mxu1 %v5879_v10 }
 0x2b4   :  { %4110 = vmatpush1.bf16.msra.mxu0 %v5881_v11  ;;  %4174 = vmatpush1.bf16.msra.mxu1 %v5884_v19 }
 0x2b5   :  { %4112 = vmatprep.subr.bf16.mxu0 %v5888_v27  ;;  %4176 = vmatprep.subr.bf16.mxu1 %v5890_v33 }
 0x2b8   :  { %4114 = vmatpush1.bf16.msra.mxu0 %v7278_v3  ;;  %4178 = vmatpush1.bf16.msra.mxu1 %v7279_v39 }
 0x2b9   :  { %4116 = vmatprep.subr.bf16.mxu0 %v7280_v48  ;;  %4180 = vmatprep.subr.bf16.mxu1 %v7281_v50 }
 0x2bc   :  { %4118 = vmatpush1.bf16.msra.mxu0 %v7282_v26  ;;  %4182 = vmatpush1.bf16.msra.mxu1 %v7283_v40  ;;  %v7335_v26 = vld [vmem:[#allocation75_spill] sm:$0xff] }
 0x2bd   :  { %4120 = vmatprep.subr.bf16.mxu0 %v7284_v45  ;;  %4184 = vmatprep.subr.bf16.mxu1 %v7285_v16  ;;  %v7296_v16 = vld [vmem:[#allocation36_spill] sm:$0xff]  ;;  %v7334_v45 = vld [vmem:[#allocation74_spill] sm:$0xff] }
 0x2c0   :  { %4122 = vmatpush1.bf16.msra.mxu0 %v7286_v51  ;;  %4186 = vmatpush1.bf16.msra.mxu1 %v7287_v37  ;;  %v7297_v51 = vld [vmem:[#allocation37_spill] sm:$0xff]  ;;  %v7298_v37 = vld [vmem:[#allocation38_spill] sm:$0xff] }
 0x2c1   :  { %4124 = vmatprep.subr.bf16.mxu0 %v7288_v18  ;;  %4188 = vmatprep.subr.bf16.mxu1 %v7289_v56  ;;  %v7299_v18 = vld [vmem:[#allocation39_spill] sm:$0xff]  ;;  %v7300_v56 = vld [vmem:[#allocation40_spill] sm:$0xff] }
 0x2c4   :  { %4126 = vmatpush1.bf16.msra.mxu0 %v7290_v6  ;;  %4190 = vmatpush1.bf16.msra.mxu1 %v7291_v62  ;;  %v7301_v6 = vld [vmem:[#allocation41_spill] sm:$0xff]  ;;  %v7302_v62 = vld [vmem:[#allocation42_spill] sm:$0xff] }
 0x2c5   :  { %4128 = vmatprep.subr.bf16.mxu0 %v7292_v31  ;;  %4192 = vmatprep.subr.bf16.mxu1 %v7293_v5  ;;  %v7303_v31 = vld [vmem:[#allocation43_spill] sm:$0xff]  ;;  %v7304_v5 = vld [vmem:[#allocation44_spill] sm:$0xff] }
 0x2c8   :  { %4130 = vmatpush1.bf16.msra.mxu0 %v7294_v59  ;;  %4194 = vmatpush1.bf16.msra.mxu1 %v7295_v63  ;;  %v7305_v59 = vld [vmem:[#allocation45_spill] sm:$0xff]  ;;  %v7306_v63 = vld [vmem:[#allocation46_spill] sm:$0xff] }
 0x2c9   :  { %4132 = vmatprep.subr.bf16.mxu0 %v7296_v16  ;;  %4196 = vmatprep.subr.bf16.mxu1 %v7297_v51  ;;  %v7307_v16 = vld [vmem:[#allocation47_spill] sm:$0xff]  ;;  %v7308_v51 = vld [vmem:[#allocation48_spill] sm:$0xff] }
 0x2cc   :  { %4134 = vmatpush1.bf16.msra.mxu0 %v7298_v37  ;;  %4198 = vmatpush1.bf16.msra.mxu1 %v7299_v18  ;;  %v7309_v37 = vld [vmem:[#allocation49_spill] sm:$0xff]  ;;  %v7310_v18 = vld [vmem:[#allocation50_spill] sm:$0xff] }
 0x2cd   :  { %4136 = vmatprep.subr.bf16.mxu0 %v7300_v56  ;;  %4200 = vmatprep.subr.bf16.mxu1 %v7301_v6  ;;  %v7311_v56 = vld [vmem:[#allocation51_spill] sm:$0xff]  ;;  %v7312_v6 = vld [vmem:[#allocation52_spill] sm:$0xff] }
 0x2d0   :  { %4138 = vmatpush1.bf16.msra.mxu0 %v7302_v62  ;;  %4202 = vmatpush1.bf16.msra.mxu1 %v7303_v31  ;;  %v7313_v62 = vld [vmem:[#allocation53_spill] sm:$0xff]  ;;  %v7314_v31 = vld [vmem:[#allocation54_spill] sm:$0xff] }
 0x2d1   :  { %4140 = vmatprep.subr.bf16.mxu0 %v7304_v5  ;;  %4204 = vmatprep.subr.bf16.mxu1 %v7305_v59  ;;  %v7315_v5 = vld [vmem:[#allocation55_spill] sm:$0xff]  ;;  %v7316_v59 = vld [vmem:[#allocation56_spill] sm:$0xff] }
 0x2d4   :  { %4142 = vmatpush1.bf16.msra.mxu0 %v7306_v63  ;;  %4206 = vmatpush1.bf16.msra.mxu1 %v7307_v16  ;;  %v7317_v63 = vld [vmem:[#allocation57_spill] sm:$0xff]  ;;  %v7318_v16 = vld [vmem:[#allocation58_spill] sm:$0xff] }
 0x2d5   :  { %4144 = vmatprep.subr.bf16.mxu0 %v7308_v51  ;;  %4208 = vmatprep.subr.bf16.mxu1 %v7309_v37  ;;  %v7319_v51 = vld [vmem:[#allocation59_spill] sm:$0xff]  ;;  %v7320_v37 = vld [vmem:[#allocation60_spill] sm:$0xff] }
 0x2d8   :  { %4146 = vmatpush1.bf16.msra.mxu0 %v7310_v18  ;;  %4210 = vmatpush1.bf16.msra.mxu1 %v7311_v56  ;;  %v7321_v18 = vld [vmem:[#allocation61_spill] sm:$0xff]  ;;  %v7322_v56 = vld [vmem:[#allocation62_spill] sm:$0xff] }
 0x2d9   :  { %4148 = vmatprep.subr.bf16.mxu0 %v7312_v6  ;;  %4212 = vmatprep.subr.bf16.mxu1 %v7313_v62  ;;  %v7323_v6 = vld [vmem:[#allocation63_spill] sm:$0xff]  ;;  %v7324_v62 = vld [vmem:[#allocation64_spill] sm:$0xff] }
 0x2dc   :  { %4150 = vmatpush1.bf16.msra.mxu0 %v7314_v31  ;;  %4214 = vmatpush1.bf16.msra.mxu1 %v7315_v5  ;;  %v7325_v31 = vld [vmem:[#allocation65_spill] sm:$0xff]  ;;  %v7326_v5 = vld [vmem:[#allocation66_spill] sm:$0xff] }
 0x2dd   :  { %4152 = vmatprep.subr.bf16.mxu0 %v7316_v59  ;;  %4216 = vmatprep.subr.bf16.mxu1 %v7317_v63  ;;  %v7327_v59 = vld [vmem:[#allocation67_spill] sm:$0xff]  ;;  %v7328_v63 = vld [vmem:[#allocation68_spill] sm:$0xff] }
 0x2e0   :  { %4154 = vmatpush1.bf16.msra.mxu0 %v7318_v16  ;;  %4218 = vmatpush1.bf16.msra.mxu1 %v7319_v51  ;;  %v7329_v16 = vld [vmem:[#allocation69_spill] sm:$0xff]  ;;  %v7330_v51 = vld [vmem:[#allocation70_spill] sm:$0xff] }
 0x2e1   :  { %4156 = vmatprep.subr.bf16.mxu0 %v7320_v37  ;;  %4220 = vmatprep.subr.bf16.mxu1 %v7321_v18  ;;  %v7331_v37 = vld [vmem:[#allocation71_spill] sm:$0xff]  ;;  %v7332_v18 = vld [vmem:[#allocation14_spill] sm:$0xff] }
 0x2e4   :  { %4158 = vmatpush1.bf16.msra.mxu0 %v7322_v56  ;;  %4222 = vmatpush1.bf16.msra.mxu1 %v7323_v6  ;;  %v7333_v56 = vld [vmem:[#allocation15_spill] sm:$0xff] }
 0x2e5   :  { %4160 = vmatprep.subr.bf16.mxu0 %v7324_v62  ;;  %4224 = vmatprep.subr.bf16.mxu1 %v7325_v31 }
 0x2e8   :  { %4162 = vmatpush1.bf16.msra.mxu0 %v7326_v5  ;;  %4226 = vmatpush1.bf16.msra.mxu1 %v7327_v59 }
 0x2e9   :  { %4164 = vmatprep.subr.bf16.mxu0 %v7328_v63  ;;  %4228 = vmatprep.subr.bf16.mxu1 %v7329_v16  ;;  %v7336_v16 = vld [vmem:[#allocation76_spill] sm:$0xff] }
 0x2ec   :  { %4166 = vmatpush1.bf16.msra.mxu0 %v7330_v51  ;;  %4230 = vmatpush1.bf16.msra.mxu1 %v7331_v37  ;;  %v7337_v37 = vld [vmem:[#allocation77_spill] sm:$0xff] }
 0x2ed   :  { %4232 = vmatprep.subr.bf16.mxu0 %v7332_v18  ;;  %4264 = vmatprep.subr.bf16.mxu1 %v7333_v56 }
 0x362   :  { %v1125_v6 = vpop.f32.mrb[6].mxu0  ;;  %v1196_v62 = vpop.f32.mrb[10].mxu1 }
 0x363   :  { %v1126_v31 = vadd.f32 %v1125_v6, %v7334_v45  ;;  %v1127_v40 = vpop.f32.mrb[7].mxu0  ;;  %v1198_v5 = vpop.f32.mrb[11].mxu1  ;;  %v1197_v39 = vadd.f32 %v1196_v62, %v7337_v37 }
 0x364   :  { %v1128_v59 = vadd.f32 %v1127_v40, %v7335_v26  ;;  %v1199_v51 = vadd.f32 %v1198_v5, %v7336_v16 }
 0x365   :  { %v3547_v50 = vmul.f32 -1.442695, %v1126_v31 }
 0x366   :  { %v3548_v63 = vmul.f32 -1.442695, %v1128_v59  ;;  %v3549_v48 = vmul.f32 -1.442695, %v1199_v51 }
 0x367   :  { %5272 = vpow2.f32 %v3547_v50 }
 0x368   :  { %5274 = vpow2.f32 %v3548_v63 }
 0x369   :  { %5276 = vpow2.f32 %v3549_v48 }
 0x36a   :  { %5278 = vtanh.f32 %v1197_v39 }
 0x371   :  { %v5273_v18 = vpop.eup %5272 }
 0x372   :  { %v5275_v3 = vpop.eup %5274  ;;  %v1204_v56 = vadd.f32 1.0, %v5273_v18 }
 0x373   :  { %v1210_v33 = vadd.f32 1.0, %v5275_v3  ;;  %v5277_v6 = vpop.eup %5276 }
 0x374   :  { %5280 = vrcp.f32 %v1204_v56  ;;  %v5279_v45 = vpop.eup %5278  ;;  %v1217_v50 = vadd.f32 1.0, %v5277_v6 }
 0x375   :  { %5282 = vrcp.f32 %v1210_v33  ;;  %v7338_v33 = vld [vmem:[#allocation72_spill] sm:$0xff] }
 0x376   :  { %5284 = vrcp.f32 %v1217_v50 }
 0x37e   :  { %v5281_v40 = vpop.eup %5280 }
 0x37f   :  { %v5283_v31 = vpop.eup %5282  ;;  %v1221_v59 = vmul.f32 %v5281_v40, %v5279_v45 }
 0x380   :  { %v1220_v63 = vmul.f32 %v5283_v31, %v6212_v25  ;;  %v5285_v40 = vpop.eup %5284 }
 0x382   :  { %v6329_v5 = vadd.f32 %v1221_v59, %v1220_v63  ;;  %v1291_v51 = vpop.f32.mrb[8].mxu0  ;;  %v1362_v62 = vpop.f32.mrb[12].mxu1 }
 0x383   :  { %v1371_v37 = vrot.slane %v1291_v51, 6  ;;  %v1293_v18 = vpop.f32.mrb[9].mxu0  ;;  %v1364_v48 = vpop.f32.mrb[13].mxu1  ;;  %v1373_v31 = vrot.slane %v1362_v62, 6 }
 0x384   :  { %v1372_v39 = vrot.slane %v1293_v18, 6  ;;  %5286 = vtanh.f32 %v6329_v5  ;;  %v1374_v6 = vrot.slane %v1364_v48, 6 }
 0x385   :  { %v1379_v3 = vadd.f32 %v1371_v37, %v7338_v33  ;;  %v1381_v51 = vadd.f32 %v1373_v31, %v6082_v7 }
 0x386   :  { %v1380_v56 = vadd.f32 %v1372_v39, %v7276_v35  ;;  %v1382_v25 = vadd.f32 %v1374_v6, %v6084_v1 }
 0x387   :  { %v3550_v16 = vmul.f32 -1.442695, %v1379_v3 }
 0x388   :  { %v3551_v45 = vmul.f32 -1.442695, %v1380_v56  ;;  %v3552_v63 = vmul.f32 -1.442695, %v1382_v25 }
 0x389   :  { %5288 = vpow2.f32 %v3550_v16 }
 0x38a   :  { %5290 = vpow2.f32 %v3551_v45  ;;  %v1403_v45 = vrot.slane %v6223_v24, 7  ;;  %v7339_v24 = vld [vmem:[#allocation17_spill] sm:$0xff] }
 0x38b   :  { %5292 = vpow2.f32 %v3552_v63 }
 0x38c   :  { %5294 = vtanh.f32 %v1381_v51 }
 0x38e   :  { %v5287_v59 = vpop.eup %5286 }
 0x38f   :  { %v6335_v50 = vmul.f32 %v5287_v59, %v5285_v40 }
 0x391   :  { %v1411_v18 = vrot.slane %v6335_v50, 6 }
 0x393   :  { %v5289_v37 = vpop.eup %5288  ;;  %v1414_v33 = vrot.slane %v1411_v18, 2 }
 0x394   :  { %v5291_v39 = vpop.eup %5290  ;;  %v1386_v3 = vadd.f32 1.0, %v5289_v37  ;;  %v7340_v37 = vld [vmem:[#allocation18_spill] sm:$0xff] }
 0x395   :  { %v1392_v16 = vadd.f32 1.0, %v5291_v39  ;;  %1481 = vmatprep.mubr.f32.mxu0 %v1414_v33  ;;  %1552 = vmatprep.mubr.f32.mxu1 %v1414_v33  ;;  %v5293_v62 = vpop.eup %5292  ;;  %v7341_v39 = vld [vmem:[#allocation19_spill] sm:$0xff] }
 0x396   :  { %5296 = vrcp.f32 %v1386_v3  ;;  %v5295_v48 = vpop.eup %5294  ;;  %v1399_v40 = vadd.f32 1.0, %v5293_v62  ;;  %v7342_v3 = vld [vmem:[#allocation20_spill] sm:$0xff]  ;;  %v7344_v62 = vld [vmem:[#allocation22_spill] sm:$0xff] }
 0x397   :  { %5298 = vrcp.f32 %v1392_v16  ;;  %v7343_v16 = vld [vmem:[#allocation21_spill] sm:$0xff] }
 0x398   :  { %5300 = vrcp.f32 %v1399_v40  ;;  %v7350_v40 = vld [vmem:[#allocation28_spill] sm:$0xff] }
 0x3a0   :  { %v5297_v56 = vpop.eup %5296 }
 0x3a1   :  { %v5299_v6 = vpop.eup %5298  ;;  %v1406_v25 = vmul.f32 %v5297_v56, %v5295_v48  ;;  %v7345_v48 = vld [vmem:[#allocation23_spill] sm:$0xff]  ;;  %v7346_v56 = vld [vmem:[#allocation24_spill] sm:$0xff] }
 0x3a2   :  { %v1405_v31 = vmul.f32 %v5299_v6, %v1403_v45  ;;  %v5301_v63 = vpop.eup %5300  ;;  %v7347_v45 = vld [vmem:[#allocation25_spill] sm:$0xff]  ;;  %v7348_v6 = vld [vmem:[#allocation26_spill] sm:$0xff] }
 0x3a4   :  { %v6340_v59 = vadd.f32 %v1406_v25, %v1405_v31  ;;  %v7349_v25 = vld [vmem:[#allocation27_spill] sm:$0xff]  ;;  %v7351_v31 = vld [vmem:[#allocation29_spill] sm:$0xff] }
 0x3a6   :  { %5302 = vtanh.f32 %v6340_v59 }
 0x3b0   :  { %v5303_v51 = vpop.eup %5302 }
 0x3b1   :  { %v1409_v18 = vmul.f32 %v5303_v51, %v5301_v63  ;;  %v7352_v63 = vld [vmem:[#allocation30_spill] sm:$0xff]  ;;  %v7353_v51 = vld [vmem:[#allocation31_spill] sm:$0xff] }
 0x3b3   :  { %v1413_v33 = vrot.slane %v1409_v18, 2  ;;  %v7354_v18 = vld [vmem:[#allocation32_spill] sm:$0xff] }
 0x3b5   :  { %1482 = vmatmul.mubr.f32.vlgmr.msra.gmra.mrb[10].mxu0 %v1413_v33  ;;  %1553 = vmatmul.mubr.f32.vlgmr.msra.gmra.mrb[14].mxu1 %v1413_v33 }
 0x3b6   :  { %4234 = vmatpush1.bf16.msra.mxu0 %v5664_v8  ;;  %4266 = vmatpush1.bf16.msra.mxu1 %v5803_v41 }
 0x3b7   :  { %4236 = vmatprep.subr.bf16.mxu0 %v5666_v9  ;;  %4268 = vmatprep.subr.bf16.mxu1 %v5809_v44 }
 0x3b8   :  { %1647 = vmatprep.mubr.f32.mxu0 %v7214_v15  ;;  %1718 = vmatprep.mubr.f32.mxu1 %v7214_v15 }
 0x3ba   :  { %4238 = vmatpush1.bf16.msra.mxu0 %v5686_v17  ;;  %4270 = vmatpush1.bf16.msra.mxu1 %v5816_v52 }
 0x3bb   :  { %4240 = vmatprep.subr.bf16.mxu0 %v5694_v22  ;;  %4272 = vmatprep.subr.bf16.mxu1 %v5822_v54 }
 0x3be   :  { %4242 = vmatpush1.bf16.msra.mxu0 %v5726_v34  ;;  %4274 = vmatpush1.bf16.msra.mxu1 %v5827_v60 }
 0x3bf   :  { %4244 = vmatprep.subr.bf16.mxu0 %v5733_v38  ;;  %4276 = vmatprep.subr.bf16.mxu1 %v5830_v61 }
 0x3c2   :  { %4246 = vmatpush1.bf16.msra.mxu0 %v5748_v49  ;;  %4278 = vmatpush1.bf16.msra.mxu1 %v5834_v2 }
 0x3c3   :  { %4248 = vmatprep.subr.bf16.mxu0 %v5767_v58  ;;  %4280 = vmatprep.subr.bf16.mxu1 %v5838_v4 }
 0x3c6   :  { %4250 = vmatpush1.bf16.msra.mxu0 %v5779_v12  ;;  %4282 = vmatpush1.bf16.msra.mxu1 %v5841_v13 }
 0x3c7   :  { %4252 = vmatprep.subr.bf16.mxu0 %v5790_v23  ;;  %4284 = vmatprep.subr.bf16.mxu1 %v5844_v14 }
 0x3ca   :  { %4254 = vmatpush1.bf16.msra.mxu0 %v5794_v28  ;;  %4286 = vmatpush1.bf16.msra.mxu1 %v5847_v20 }
 0x3cb   :  { %4256 = vmatprep.subr.bf16.mxu0 %v5799_v32  ;;  %4288 = vmatprep.subr.bf16.mxu1 %v5850_v21 }
 0x3ce   :  { %4258 = vmatpush1.bf16.msra.mxu0 %v5805_v42  ;;  %4290 = vmatpush1.bf16.msra.mxu1 %v5853_v29 }
 0x3cf   :  { %4260 = vmatprep.subr.bf16.mxu0 %v5811_v46  ;;  %4292 = vmatprep.subr.bf16.mxu1 %v5856_v30 }
 0x3d2   :  { %4262 = vmatpush1.bf16.msra.mxu0 %v5818_v53  ;;  %4294 = vmatpush1.bf16.msra.mxu1 %v5859_v36 }
 0x3d3   :  { %4296 = vmatprep.subr.bf16.mxu0 %v5865_v43  ;;  %4360 = vmatprep.subr.bf16.mxu1 %v5867_v47 }
 0x3d5   :  { %1648 = vmatmul.mubr.f32.vlgmr.msra.gmra.mrb[12].mxu0 %v1413_v33  ;;  %1719 = vmatmul.mubr.f32.vlgmr.msra.gmra.mrb[16].mxu1 %v1413_v33  ;;  %v7355_v33 = vld [vmem:[#allocation33_spill] sm:$0xff] }
 0x3d6   :  { %4298 = vmatpush1.bf16.msra.mxu0 %v5871_v55  ;;  %4362 = vmatpush1.bf16.msra.mxu1 %v5873_v57 }
 0x3d7   :  { %4300 = vmatprep.subr.bf16.mxu0 %v5877_v0  ;;  %4364 = vmatprep.subr.bf16.mxu1 %v5879_v10 }
 0x3da   :  { %4302 = vmatpush1.bf16.msra.mxu0 %v5881_v11  ;;  %4366 = vmatpush1.bf16.msra.mxu1 %v5884_v19 }
 0x3db   :  { %4304 = vmatprep.subr.bf16.mxu0 %v5888_v27  ;;  %4368 = vmatprep.subr.bf16.mxu1 %v7339_v24 }
 0x3de   :  { %4306 = vmatpush1.bf16.msra.mxu0 %v7340_v37  ;;  %4370 = vmatpush1.bf16.msra.mxu1 %v7341_v39 }
 0x3df   :  { %4308 = vmatprep.subr.bf16.mxu0 %v7342_v3  ;;  %4372 = vmatprep.subr.bf16.mxu1 %v7343_v16 }
 0x3e2   :  { %4310 = vmatpush1.bf16.msra.mxu0 %v7344_v62  ;;  %4374 = vmatpush1.bf16.msra.mxu1 %v7345_v48  ;;  %v7356_v48 = vld [vmem:[#allocation34_spill] sm:$0xff] }
 0x3e3   :  { %4312 = vmatprep.subr.bf16.mxu0 %v7346_v56  ;;  %4376 = vmatprep.subr.bf16.mxu1 %v7347_v45  ;;  %v7357_v56 = vld [vmem:[#allocation35_spill] sm:$0xff]  ;;  %v7358_v45 = vld [vmem:[#allocation36_spill] sm:$0xff]  ;;  %v7396_v62 = vld [vmem:[#allocation74_spill] sm:$0xff] }
 0x3e6   :  { %4314 = vmatpush1.bf16.msra.mxu0 %v7348_v6  ;;  %4378 = vmatpush1.bf16.msra.mxu1 %v7349_v25  ;;  %v7359_v6 = vld [vmem:[#allocation37_spill] sm:$0xff]  ;;  %v7360_v25 = vld [vmem:[#allocation38_spill] sm:$0xff] }
 0x3e7   :  { %4316 = vmatprep.subr.bf16.mxu0 %v7350_v40  ;;  %4380 = vmatprep.subr.bf16.mxu1 %v7351_v31  ;;  %v7361_v40 = vld [vmem:[#allocation39_spill] sm:$0xff]  ;;  %v7362_v31 = vld [vmem:[#allocation40_spill] sm:$0xff] }
 0x3ea   :  { %4318 = vmatpush1.bf16.msra.mxu0 %v7352_v63  ;;  %4382 = vmatpush1.bf16.msra.mxu1 %v7353_v51  ;;  %v7363_v63 = vld [vmem:[#allocation41_spill] sm:$0xff]  ;;  %v7364_v51 = vld [vmem:[#allocation42_spill] sm:$0xff] }
 0x3eb   :  { %4320 = vmatprep.subr.bf16.mxu0 %v7354_v18  ;;  %4384 = vmatprep.subr.bf16.mxu1 %v7355_v33  ;;  %v7365_v18 = vld [vmem:[#allocation43_spill] sm:$0xff]  ;;  %v7366_v33 = vld [vmem:[#allocation44_spill] sm:$0xff] }
 0x3ee   :  { %4322 = vmatpush1.bf16.msra.mxu0 %v7356_v48  ;;  %4386 = vmatpush1.bf16.msra.mxu1 %v7357_v56  ;;  %v7367_v48 = vld [vmem:[#allocation45_spill] sm:$0xff]  ;;  %v7368_v56 = vld [vmem:[#allocation46_spill] sm:$0xff] }
 0x3ef   :  { %4324 = vmatprep.subr.bf16.mxu0 %v7358_v45  ;;  %4388 = vmatprep.subr.bf16.mxu1 %v7359_v6  ;;  %v7369_v45 = vld [vmem:[#allocation47_spill] sm:$0xff]  ;;  %v7370_v6 = vld [vmem:[#allocation48_spill] sm:$0xff] }
 0x3f2   :  { %4326 = vmatpush1.bf16.msra.mxu0 %v7360_v25  ;;  %4390 = vmatpush1.bf16.msra.mxu1 %v7361_v40  ;;  %v7371_v25 = vld [vmem:[#allocation49_spill] sm:$0xff]  ;;  %v7372_v40 = vld [vmem:[#allocation50_spill] sm:$0xff] }
 0x3f3   :  { %4328 = vmatprep.subr.bf16.mxu0 %v7362_v31  ;;  %4392 = vmatprep.subr.bf16.mxu1 %v7363_v63  ;;  %v7373_v31 = vld [vmem:[#allocation51_spill] sm:$0xff]  ;;  %v7374_v63 = vld [vmem:[#allocation52_spill] sm:$0xff] }
 0x3f6   :  { %4330 = vmatpush1.bf16.msra.mxu0 %v7364_v51  ;;  %4394 = vmatpush1.bf16.msra.mxu1 %v7365_v18  ;;  %v7375_v51 = vld [vmem:[#allocation53_spill] sm:$0xff]  ;;  %v7376_v18 = vld [vmem:[#allocation54_spill] sm:$0xff] }
 0x3f7   :  { %4332 = vmatprep.subr.bf16.mxu0 %v7366_v33  ;;  %4396 = vmatprep.subr.bf16.mxu1 %v7367_v48  ;;  %v7377_v33 = vld [vmem:[#allocation55_spill] sm:$0xff]  ;;  %v7378_v48 = vld [vmem:[#allocation56_spill] sm:$0xff] }
 0x3fa   :  { %4334 = vmatpush1.bf16.msra.mxu0 %v7368_v56  ;;  %4398 = vmatpush1.bf16.msra.mxu1 %v7369_v45  ;;  %v7379_v56 = vld [vmem:[#allocation57_spill] sm:$0xff]  ;;  %v7380_v45 = vld [vmem:[#allocation58_spill] sm:$0xff] }
 0x3fb   :  { %4336 = vmatprep.subr.bf16.mxu0 %v7370_v6  ;;  %4400 = vmatprep.subr.bf16.mxu1 %v7371_v25  ;;  %v7381_v6 = vld [vmem:[#allocation59_spill] sm:$0xff]  ;;  %v7382_v25 = vld [vmem:[#allocation60_spill] sm:$0xff] }
 0x3fe   :  { %4338 = vmatpush1.bf16.msra.mxu0 %v7372_v40  ;;  %4402 = vmatpush1.bf16.msra.mxu1 %v7373_v31  ;;  %v7383_v40 = vld [vmem:[#allocation61_spill] sm:$0xff]  ;;  %v7384_v31 = vld [vmem:[#allocation62_spill] sm:$0xff] }
 0x3ff   :  { %4340 = vmatprep.subr.bf16.mxu0 %v7374_v63  ;;  %4404 = vmatprep.subr.bf16.mxu1 %v7375_v51  ;;  %v7385_v63 = vld [vmem:[#allocation63_spill] sm:$0xff]  ;;  %v7386_v51 = vld [vmem:[#allocation64_spill] sm:$0xff] }
 0x402   :  { %4342 = vmatpush1.bf16.msra.mxu0 %v7376_v18  ;;  %4406 = vmatpush1.bf16.msra.mxu1 %v7377_v33  ;;  %v7387_v18 = vld [vmem:[#allocation65_spill] sm:$0xff]  ;;  %v7388_v33 = vld [vmem:[#allocation66_spill] sm:$0xff] }
 0x403   :  { %4344 = vmatprep.subr.bf16.mxu0 %v7378_v48  ;;  %4408 = vmatprep.subr.bf16.mxu1 %v7379_v56  ;;  %v7389_v48 = vld [vmem:[#allocation67_spill] sm:$0xff]  ;;  %v7390_v56 = vld [vmem:[#allocation68_spill] sm:$0xff] }
 0x406   :  { %4346 = vmatpush1.bf16.msra.mxu0 %v7380_v45  ;;  %4410 = vmatpush1.bf16.msra.mxu1 %v7381_v6  ;;  %v7391_v45 = vld [vmem:[#allocation69_spill] sm:$0xff]  ;;  %v7392_v6 = vld [vmem:[#allocation70_spill] sm:$0xff] }
 0x407   :  { %4348 = vmatprep.subr.bf16.mxu0 %v7382_v25  ;;  %4412 = vmatprep.subr.bf16.mxu1 %v7383_v40  ;;  %v7393_v25 = vld [vmem:[#allocation71_spill] sm:$0xff]  ;;  %v7394_v40 = vld [vmem:[#allocation14_spill] sm:$0xff] }
 0x40a   :  { %4350 = vmatpush1.bf16.msra.mxu0 %v7384_v31  ;;  %4414 = vmatpush1.bf16.msra.mxu1 %v7385_v63  ;;  %v7395_v31 = vld [vmem:[#allocation15_spill] sm:$0xff] }
 0x40b   :  { %4352 = vmatprep.subr.bf16.mxu0 %v7386_v51  ;;  %4416 = vmatprep.subr.bf16.mxu1 %v7387_v18 }
 0x40e   :  { %4354 = vmatpush1.bf16.msra.mxu0 %v7388_v33  ;;  %4418 = vmatpush1.bf16.msra.mxu1 %v7389_v48 }
 0x40f   :  { %4356 = vmatprep.subr.bf16.mxu0 %v7390_v56  ;;  %4420 = vmatprep.subr.bf16.mxu1 %v7391_v45  ;;  %v7397_v45 = vld [vmem:[#allocation76_spill] sm:$0xff] }
 0x412   :  { %4358 = vmatpush1.bf16.msra.mxu0 %v7392_v6  ;;  %4422 = vmatpush1.bf16.msra.mxu1 %v7393_v25  ;;  %v7398_v25 = vld [vmem:[#allocation77_spill] sm:$0xff] }
 0x413   :  { %4424 = vmatprep.subr.bf16.mxu0 %v7394_v40  ;;  %4456 = vmatprep.subr.bf16.mxu1 %v7395_v31 }
 0x488   :  { %v1483_v63 = vpop.f32.mrb[10].mxu0  ;;  %v1554_v51 = vpop.f32.mrb[14].mxu1 }
 0x489   :  { %v1484_v18 = vadd.f32 %v1483_v63, %v7396_v62  ;;  %v1485_v16 = vpop.f32.mrb[11].mxu0  ;;  %v1556_v33 = vpop.f32.mrb[15].mxu1  ;;  %v1555_v37 = vadd.f32 %v1554_v51, %v7398_v25 }
 0x48a   :  { %v1486_v48 = vadd.f32 %v1485_v16, %v7335_v26  ;;  %v1557_v6 = vadd.f32 %v1556_v33, %v7397_v45 }
 0x48b   :  { %v3553_v3 = vmul.f32 -1.442695, %v1484_v18 }
 0x48c   :  { %v3554_v56 = vmul.f32 -1.442695, %v1486_v48  ;;  %v3555_v39 = vmul.f32 -1.442695, %v1557_v6 }
 0x48d   :  { %5304 = vpow2.f32 %v3553_v3 }
 0x48e   :  { %5306 = vpow2.f32 %v3554_v56 }
 0x48f   :  { %5308 = vpow2.f32 %v3555_v39 }
 0x490   :  { %5310 = vtanh.f32 %v1555_v37 }
 0x497   :  { %v5305_v40 = vpop.eup %5304 }
 0x498   :  { %v5307_v24 = vpop.eup %5306  ;;  %v1562_v31 = vadd.f32 1.0, %v5305_v40 }
 0x499   :  { %v1568_v27 = vadd.f32 1.0, %v5307_v24  ;;  %v5309_v63 = vpop.eup %5308 }
 0x49a   :  { %5312 = vrcp.f32 %v1562_v31  ;;  %v5311_v62 = vpop.eup %5310  ;;  %v1575_v3 = vadd.f32 1.0, %v5309_v63 }
 0x49b   :  { %5314 = vrcp.f32 %v1568_v27  ;;  %v7400_v27 = vld [vmem:[#allocation72_spill] sm:$0xff] }
 0x49c   :  { %5316 = vrcp.f32 %v1575_v3  ;;  %v3373_v3 = vrot.slane %v6335_v50, 7 }
 0x4a4   :  { %v5313_v16 = vpop.eup %5312 }
 0x4a5   :  { %v5315_v18 = vpop.eup %5314  ;;  %v1579_v48 = vmul.f32 %v5313_v16, %v5311_v62 }
 0x4a6   :  { %v1578_v56 = vmul.f32 %v5315_v18, %v6329_v5  ;;  %v5317_v16 = vpop.eup %5316 }
 0x4a8   :  { %v6446_v33 = vadd.f32 %v1579_v48, %v1578_v56  ;;  %v1649_v6 = vpop.f32.mrb[12].mxu0  ;;  %v1720_v51 = vpop.f32.mrb[16].mxu1 }
 0x4a9   :  { %v1729_v25 = vrot.slane %v1649_v6, 5  ;;  %v1651_v40 = vpop.f32.mrb[13].mxu0  ;;  %v1722_v39 = vpop.f32.mrb[17].mxu1  ;;  %v1731_v18 = vrot.slane %v1720_v51, 5 }
 0x4aa   :  { %7399 = vst [vmem:[#allocation78_spill] sm:$0xff] %v6446_v33  ;;  %v1730_v37 = vrot.slane %v1651_v40, 5  ;;  %5318 = vtanh.f32 %v6446_v33  ;;  %v1732_v63 = vrot.slane %v1722_v39, 5 }
 0x4ab   :  { %v1737_v24 = vadd.f32 %v1729_v25, %v7400_v27  ;;  %v1739_v40 = vadd.f32 %v1731_v18, %v6082_v7  ;;  %v7401_v27 = vld [vmem:[#allocation73_spill] sm:$0xff] }
 0x4ac   :  { %v1738_v31 = vadd.f32 %v1730_v37, %v7276_v35  ;;  %v1740_v5 = vadd.f32 %v1732_v63, %v6084_v1  ;;  %v3388_v37 = vsel %vm119_vm0, %v7401_v27, %v3373_v3 }
 0x4ad   :  { %v3556_v45 = vmul.f32 -1.442695, %v1737_v24 }
 0x4ae   :  { %v3557_v62 = vmul.f32 -1.442695, %v1738_v31  ;;  %v3558_v6 = vmul.f32 -1.442695, %v1740_v5 }
 0x4af   :  { %5320 = vpow2.f32 %v3556_v45 }
 0x4b0   :  { %5322 = vpow2.f32 %v3557_v62 }
 0x4b1   :  { %5324 = vpow2.f32 %v3558_v6 }
 0x4b2   :  { %5326 = vtanh.f32 %v1739_v40 }
 0x4b4   :  { %v5319_v48 = vpop.eup %5318 }
 0x4b5   :  { %v1582_v56 = vmul.f32 %v5319_v48, %v5317_v16  ;;  %v1761_v16 = vrot.slane %v6340_v59, 7  ;;  %v7402_v59 = vld [vmem:[#allocation16_spill] sm:$0xff] }
 0x4b7   :  { %v1769_v33 = vrot.slane %v1582_v56, 5  ;;  %v3375_v25 = vrot.slane %v1582_v56, 6 }
 0x4b9   :  { %v5321_v24 = vpop.eup %5320  ;;  %v1772_v39 = vrot.slane %v1769_v33, 3  ;;  %v6457_v45 = vsel %vm121_vm1, %v3388_v37, %v3375_v25  ;;  %v7403_v37 = vld [vmem:[#allocation17_spill] sm:$0xff] }
 0x4ba   :  { %v5323_v31 = vpop.eup %5322  ;;  %v1744_v62 = vadd.f32 1.0, %v5321_v24  ;;  %v7404_v24 = vld [vmem:[#allocation18_spill] sm:$0xff] }
 0x4bb   :  { %v1750_v51 = vadd.f32 1.0, %v5323_v31  ;;  %1839 = vmatprep.mubr.f32.mxu0 %v1772_v39  ;;  %1910 = vmatprep.mubr.f32.mxu1 %v1772_v39  ;;  %v5325_v50 = vpop.eup %5324  ;;  %v7405_v39 = vld [vmem:[#allocation19_spill] sm:$0xff]  ;;  %v7406_v31 = vld [vmem:[#allocation20_spill] sm:$0xff] }
 0x4bc   :  { %5328 = vrcp.f32 %v1744_v62  ;;  %v5327_v63 = vpop.eup %5326  ;;  %v1757_v33 = vadd.f32 1.0, %v5325_v50  ;;  %v7407_v62 = vld [vmem:[#allocation21_spill] sm:$0xff]  ;;  %v7409_v50 = vld [vmem:[#allocation23_spill] sm:$0xff] }
 0x4bd   :  { %5330 = vrcp.f32 %v1750_v51  ;;  %v7408_v51 = vld [vmem:[#allocation22_spill] sm:$0xff] }
 0x4be   :  { %5332 = vrcp.f32 %v1757_v33  ;;  %v7415_v33 = vld [vmem:[#allocation29_spill] sm:$0xff] }
 0x4c6   :  { %v5329_v5 = vpop.eup %5328 }
 0x4c7   :  { %v5331_v27 = vpop.eup %5330  ;;  %v1764_v18 = vmul.f32 %v5329_v5, %v5327_v63  ;;  %v7410_v63 = vld [vmem:[#allocation24_spill] sm:$0xff]  ;;  %v7411_v5 = vld [vmem:[#allocation25_spill] sm:$0xff] }
 0x4c8   :  { %v1763_v48 = vmul.f32 %v5331_v27, %v1761_v16  ;;  %v5333_v56 = vpop.eup %5332  ;;  %v7412_v16 = vld [vmem:[#allocation26_spill] sm:$0xff]  ;;  %v7413_v27 = vld [vmem:[#allocation27_spill] sm:$0xff] }
 0x4ca   :  { %v6460_v3 = vadd.f32 %v1764_v18, %v1763_v48  ;;  %v7414_v18 = vld [vmem:[#allocation28_spill] sm:$0xff]  ;;  %v7416_v48 = vld [vmem:[#allocation30_spill] sm:$0xff] }
 0x4cc   :  { %5334 = vtanh.f32 %v6460_v3 }
 0x4d6   :  { %v5335_v6 = vpop.eup %5334 }
 0x4d7   :  { %v1767_v40 = vmul.f32 %v5335_v6, %v5333_v56  ;;  %v7417_v56 = vld [vmem:[#allocation31_spill] sm:$0xff]  ;;  %v7418_v6 = vld [vmem:[#allocation32_spill] sm:$0xff] }
 0x4d9   :  { %v1771_v25 = vrot.slane %v1767_v40, 3  ;;  %v7419_v40 = vld [vmem:[#allocation33_spill] sm:$0xff] }
 0x4db   :  { %1840 = vmatmul.mubr.f32.vlgmr.msra.gmra.mrb[14].mxu0 %v1771_v25  ;;  %1911 = vmatmul.mubr.f32.vlgmr.msra.gmra.mrb[18].mxu1 %v1771_v25 }
 0x4dc   :  { %4426 = vmatpush1.bf16.msra.mxu0 %v5664_v8  ;;  %4458 = vmatpush1.bf16.msra.mxu1 %v5803_v41 }
 0x4dd   :  { %4428 = vmatprep.subr.bf16.mxu0 %v5666_v9  ;;  %4460 = vmatprep.subr.bf16.mxu1 %v5809_v44 }
 0x4de   :  { %2005 = vmatprep.mubr.f32.mxu0 %v7214_v15  ;;  %2076 = vmatprep.mubr.f32.mxu1 %v7214_v15 }
 0x4e0   :  { %4430 = vmatpush1.bf16.msra.mxu0 %v5686_v17  ;;  %4462 = vmatpush1.bf16.msra.mxu1 %v5816_v52 }
 0x4e1   :  { %4432 = vmatprep.subr.bf16.mxu0 %v5694_v22  ;;  %4464 = vmatprep.subr.bf16.mxu1 %v5822_v54 }
 0x4e4   :  { %4434 = vmatpush1.bf16.msra.mxu0 %v5726_v34  ;;  %4466 = vmatpush1.bf16.msra.mxu1 %v5827_v60 }
 0x4e5   :  { %4436 = vmatprep.subr.bf16.mxu0 %v5733_v38  ;;  %4468 = vmatprep.subr.bf16.mxu1 %v5830_v61 }
 0x4e8   :  { %4438 = vmatpush1.bf16.msra.mxu0 %v5748_v49  ;;  %4470 = vmatpush1.bf16.msra.mxu1 %v5834_v2 }
 0x4e9   :  { %4440 = vmatprep.subr.bf16.mxu0 %v5767_v58  ;;  %4472 = vmatprep.subr.bf16.mxu1 %v5838_v4 }
 0x4ec   :  { %4442 = vmatpush1.bf16.msra.mxu0 %v5779_v12  ;;  %4474 = vmatpush1.bf16.msra.mxu1 %v5841_v13 }
 0x4ed   :  { %4444 = vmatprep.subr.bf16.mxu0 %v5790_v23  ;;  %4476 = vmatprep.subr.bf16.mxu1 %v5844_v14 }
 0x4f0   :  { %4446 = vmatpush1.bf16.msra.mxu0 %v5794_v28  ;;  %4478 = vmatpush1.bf16.msra.mxu1 %v5847_v20 }
 0x4f1   :  { %4448 = vmatprep.subr.bf16.mxu0 %v5799_v32  ;;  %4480 = vmatprep.subr.bf16.mxu1 %v5850_v21 }
 0x4f4   :  { %4450 = vmatpush1.bf16.msra.mxu0 %v5805_v42  ;;  %4482 = vmatpush1.bf16.msra.mxu1 %v5853_v29 }
 0x4f5   :  { %4452 = vmatprep.subr.bf16.mxu0 %v5811_v46  ;;  %4484 = vmatprep.subr.bf16.mxu1 %v5856_v30 }
 0x4f8   :  { %4454 = vmatpush1.bf16.msra.mxu0 %v5818_v53  ;;  %4486 = vmatpush1.bf16.msra.mxu1 %v5859_v36 }
 0x4f9   :  { %4488 = vmatprep.subr.bf16.mxu0 %v5865_v43  ;;  %4552 = vmatprep.subr.bf16.mxu1 %v5867_v47 }
 0x4fb   :  { %2006 = vmatmul.mubr.f32.vlgmr.msra.gmra.mrb[16].mxu0 %v1771_v25  ;;  %2077 = vmatmul.mubr.f32.vlgmr.msra.gmra.mrb[20].mxu1 %v1771_v25  ;;  %v7420_v25 = vld [vmem:[#allocation34_spill] sm:$0xff] }
 0x4fc   :  { %4490 = vmatpush1.bf16.msra.mxu0 %v5871_v55  ;;  %4554 = vmatpush1.bf16.msra.mxu1 %v5873_v57 }
 0x4fd   :  { %4492 = vmatprep.subr.bf16.mxu0 %v5877_v0  ;;  %4556 = vmatprep.subr.bf16.mxu1 %v5879_v10 }
 0x500   :  { %4494 = vmatpush1.bf16.msra.mxu0 %v5881_v11  ;;  %4558 = vmatpush1.bf16.msra.mxu1 %v5884_v19 }
 0x501   :  { %4496 = vmatprep.subr.bf16.mxu0 %v7402_v59  ;;  %4560 = vmatprep.subr.bf16.mxu1 %v7403_v37 }
 0x504   :  { %4498 = vmatpush1.bf16.msra.mxu0 %v7404_v24  ;;  %4562 = vmatpush1.bf16.msra.mxu1 %v7405_v39 }
 0x505   :  { %4500 = vmatprep.subr.bf16.mxu0 %v7406_v31  ;;  %4564 = vmatprep.subr.bf16.mxu1 %v7407_v62 }
 0x508   :  { %4502 = vmatpush1.bf16.msra.mxu0 %v7408_v51  ;;  %4566 = vmatpush1.bf16.msra.mxu1 %v7409_v50  ;;  %v7460_v50 = vld [vmem:[#allocation74_spill] sm:$0xff] }
 0x509   :  { %4504 = vmatprep.subr.bf16.mxu0 %v7410_v63  ;;  %4568 = vmatprep.subr.bf16.mxu1 %v7411_v5  ;;  %v7421_v63 = vld [vmem:[#allocation35_spill] sm:$0xff]  ;;  %v7422_v5 = vld [vmem:[#allocation36_spill] sm:$0xff] }
 0x50c   :  { %4506 = vmatpush1.bf16.msra.mxu0 %v7412_v16  ;;  %4570 = vmatpush1.bf16.msra.mxu1 %v7413_v27  ;;  %v7423_v16 = vld [vmem:[#allocation37_spill] sm:$0xff]  ;;  %v7424_v27 = vld [vmem:[#allocation38_spill] sm:$0xff] }
 0x50d   :  { %4508 = vmatprep.subr.bf16.mxu0 %v7414_v18  ;;  %4572 = vmatprep.subr.bf16.mxu1 %v7415_v33  ;;  %v7425_v18 = vld [vmem:[#allocation39_spill] sm:$0xff]  ;;  %v7426_v33 = vld [vmem:[#allocation40_spill] sm:$0xff] }
 0x510   :  { %4510 = vmatpush1.bf16.msra.mxu0 %v7416_v48  ;;  %4574 = vmatpush1.bf16.msra.mxu1 %v7417_v56  ;;  %v7427_v48 = vld [vmem:[#allocation41_spill] sm:$0xff]  ;;  %v7428_v56 = vld [vmem:[#allocation42_spill] sm:$0xff] }
 0x511   :  { %4512 = vmatprep.subr.bf16.mxu0 %v7418_v6  ;;  %4576 = vmatprep.subr.bf16.mxu1 %v7419_v40  ;;  %v7429_v6 = vld [vmem:[#allocation43_spill] sm:$0xff]  ;;  %v7430_v40 = vld [vmem:[#allocation44_spill] sm:$0xff] }
 0x514   :  { %4514 = vmatpush1.bf16.msra.mxu0 %v7420_v25  ;;  %4578 = vmatpush1.bf16.msra.mxu1 %v7421_v63  ;;  %v7431_v25 = vld [vmem:[#allocation45_spill] sm:$0xff]  ;;  %v7432_v63 = vld [vmem:[#allocation46_spill] sm:$0xff] }
 0x515   :  { %4516 = vmatprep.subr.bf16.mxu0 %v7422_v5  ;;  %4580 = vmatprep.subr.bf16.mxu1 %v7423_v16  ;;  %v7433_v5 = vld [vmem:[#allocation47_spill] sm:$0xff]  ;;  %v7434_v16 = vld [vmem:[#allocation48_spill] sm:$0xff] }
 0x518   :  { %4518 = vmatpush1.bf16.msra.mxu0 %v7424_v27  ;;  %4582 = vmatpush1.bf16.msra.mxu1 %v7425_v18  ;;  %v7435_v27 = vld [vmem:[#allocation49_spill] sm:$0xff]  ;;  %v7436_v18 = vld [vmem:[#allocation50_spill] sm:$0xff] }
 0x519   :  { %4520 = vmatprep.subr.bf16.mxu0 %v7426_v33  ;;  %4584 = vmatprep.subr.bf16.mxu1 %v7427_v48  ;;  %v7437_v33 = vld [vmem:[#allocation51_spill] sm:$0xff]  ;;  %v7438_v48 = vld [vmem:[#allocation52_spill] sm:$0xff] }
 0x51c   :  { %4522 = vmatpush1.bf16.msra.mxu0 %v7428_v56  ;;  %4586 = vmatpush1.bf16.msra.mxu1 %v7429_v6  ;;  %v7439_v56 = vld [vmem:[#allocation53_spill] sm:$0xff]  ;;  %v7440_v6 = vld [vmem:[#allocation54_spill] sm:$0xff] }
 0x51d   :  { %4524 = vmatprep.subr.bf16.mxu0 %v7430_v40  ;;  %4588 = vmatprep.subr.bf16.mxu1 %v7431_v25  ;;  %v7441_v40 = vld [vmem:[#allocation55_spill] sm:$0xff]  ;;  %v7442_v25 = vld [vmem:[#allocation56_spill] sm:$0xff] }
 0x520   :  { %4526 = vmatpush1.bf16.msra.mxu0 %v7432_v63  ;;  %4590 = vmatpush1.bf16.msra.mxu1 %v7433_v5  ;;  %v7443_v63 = vld [vmem:[#allocation57_spill] sm:$0xff]  ;;  %v7444_v5 = vld [vmem:[#allocation58_spill] sm:$0xff] }
 0x521   :  { %4528 = vmatprep.subr.bf16.mxu0 %v7434_v16  ;;  %4592 = vmatprep.subr.bf16.mxu1 %v7435_v27  ;;  %v7445_v16 = vld [vmem:[#allocation59_spill] sm:$0xff]  ;;  %v7446_v27 = vld [vmem:[#allocation60_spill] sm:$0xff] }
 0x524   :  { %4530 = vmatpush1.bf16.msra.mxu0 %v7436_v18  ;;  %4594 = vmatpush1.bf16.msra.mxu1 %v7437_v33  ;;  %v7447_v18 = vld [vmem:[#allocation61_spill] sm:$0xff]  ;;  %v7448_v33 = vld [vmem:[#allocation62_spill] sm:$0xff] }
 0x525   :  { %4532 = vmatprep.subr.bf16.mxu0 %v7438_v48  ;;  %4596 = vmatprep.subr.bf16.mxu1 %v7439_v56  ;;  %v7449_v48 = vld [vmem:[#allocation63_spill] sm:$0xff]  ;;  %v7450_v56 = vld [vmem:[#allocation64_spill] sm:$0xff] }
 0x528   :  { %4534 = vmatpush1.bf16.msra.mxu0 %v7440_v6  ;;  %4598 = vmatpush1.bf16.msra.mxu1 %v7441_v40  ;;  %v7451_v6 = vld [vmem:[#allocation65_spill] sm:$0xff]  ;;  %v7452_v40 = vld [vmem:[#allocation66_spill] sm:$0xff] }
 0x529   :  { %4536 = vmatprep.subr.bf16.mxu0 %v7442_v25  ;;  %4600 = vmatprep.subr.bf16.mxu1 %v7443_v63  ;;  %v7453_v25 = vld [vmem:[#allocation67_spill] sm:$0xff]  ;;  %v7454_v63 = vld [vmem:[#allocation68_spill] sm:$0xff] }
 0x52c   :  { %4538 = vmatpush1.bf16.msra.mxu0 %v7444_v5  ;;  %4602 = vmatpush1.bf16.msra.mxu1 %v7445_v16  ;;  %v7455_v5 = vld [vmem:[#allocation69_spill] sm:$0xff]  ;;  %v7456_v16 = vld [vmem:[#allocation70_spill] sm:$0xff] }
 0x52d   :  { %4540 = vmatprep.subr.bf16.mxu0 %v7446_v27  ;;  %4604 = vmatprep.subr.bf16.mxu1 %v7447_v18  ;;  %v7457_v27 = vld [vmem:[#allocation71_spill] sm:$0xff]  ;;  %v7458_v18 = vld [vmem:[#allocation14_spill] sm:$0xff] }
 0x530   :  { %4542 = vmatpush1.bf16.msra.mxu0 %v7448_v33  ;;  %4606 = vmatpush1.bf16.msra.mxu1 %v7449_v48  ;;  %v7459_v33 = vld [vmem:[#allocation15_spill] sm:$0xff] }
 0x531   :  { %4544 = vmatprep.subr.bf16.mxu0 %v7450_v56  ;;  %4608 = vmatprep.subr.bf16.mxu1 %v7451_v6 }
 0x534   :  { %4546 = vmatpush1.bf16.msra.mxu0 %v7452_v40  ;;  %4610 = vmatpush1.bf16.msra.mxu1 %v7453_v25 }
 0x535   :  { %4548 = vmatprep.subr.bf16.mxu0 %v7454_v63  ;;  %4612 = vmatprep.subr.bf16.mxu1 %v7455_v5  ;;  %v7461_v5 = vld [vmem:[#allocation76_spill] sm:$0xff] }
 0x538   :  { %4550 = vmatpush1.bf16.msra.mxu0 %v7456_v16  ;;  %4614 = vmatpush1.bf16.msra.mxu1 %v7457_v27  ;;  %v7462_v27 = vld [vmem:[#allocation77_spill] sm:$0xff] }
 0x539   :  { %4616 = vmatprep.subr.bf16.mxu0 %v7458_v18  ;;  %4648 = vmatprep.subr.bf16.mxu1 %v7459_v33 }
 0x5ae   :  { %v1841_v48 = vpop.f32.mrb[14].mxu0  ;;  %v1912_v56 = vpop.f32.mrb[18].mxu1 }
 0x5af   :  { %v1842_v6 = vadd.f32 %v1841_v48, %v7460_v50  ;;  %v1843_v51 = vpop.f32.mrb[15].mxu0  ;;  %v1914_v40 = vpop.f32.mrb[19].mxu1  ;;  %v1913_v39 = vadd.f32 %v1912_v56, %v7462_v27 }
 0x5b0   :  { %v1844_v25 = vadd.f32 %v1843_v51, %v7335_v26  ;;  %v1915_v16 = vadd.f32 %v1914_v40, %v7461_v5 }
 0x5b1   :  { %v3559_v62 = vmul.f32 -1.442695, %v1842_v6 }
 0x5b2   :  { %v3560_v63 = vmul.f32 -1.442695, %v1844_v25  ;;  %v3561_v31 = vmul.f32 -1.442695, %v1915_v16 }
 0x5b3   :  { %5336 = vpow2.f32 %v3559_v62 }
 0x5b4   :  { %5338 = vpow2.f32 %v3560_v63  ;;  %v7463_v63 = vld [vmem:[#allocation78_spill] sm:$0xff] }
 0x5b5   :  { %5340 = vpow2.f32 %v3561_v31 }
 0x5b6   :  { %5342 = vtanh.f32 %v1913_v39 }
 0x5bd   :  { %v5337_v18 = vpop.eup %5336 }
 0x5be   :  { %v5339_v24 = vpop.eup %5338  ;;  %v1920_v33 = vadd.f32 1.0, %v5337_v18 }
 0x5bf   :  { %v1926_v37 = vadd.f32 1.0, %v5339_v24  ;;  %v5341_v48 = vpop.eup %5340 }
 0x5c0   :  { %5344 = vrcp.f32 %v1920_v33  ;;  %v5343_v50 = vpop.eup %5342  ;;  %v1933_v62 = vadd.f32 1.0, %v5341_v48 }
 0x5c1   :  { %5346 = vrcp.f32 %v1926_v37  ;;  %v7465_v37 = vld [vmem:[#allocation72_spill] sm:$0xff] }
 0x5c2   :  { %5348 = vrcp.f32 %v1933_v62 }
 0x5ca   :  { %v5345_v51 = vpop.eup %5344 }
 0x5cb   :  { %v5347_v6 = vpop.eup %5346  ;;  %v1937_v25 = vmul.f32 %v5345_v51, %v5343_v50 }
 0x5cc   :  { %v1936_v26 = vmul.f32 %v5347_v6, %v7463_v63  ;;  %v5349_v51 = vpop.eup %5348 }
 0x5ce   :  { %v6566_v40 = vadd.f32 %v1937_v25, %v1936_v26  ;;  %v2007_v16 = vpop.f32.mrb[16].mxu0  ;;  %v2078_v56 = vpop.f32.mrb[20].mxu1 }
 0x5cf   :  { %v2087_v27 = vrot.slane %v2007_v16, 4  ;;  %v2009_v18 = vpop.f32.mrb[17].mxu0  ;;  %v2080_v31 = vpop.f32.mrb[21].mxu1  ;;  %v2089_v6 = vrot.slane %v2078_v56, 4 }
 0x5d0   :  { %7464 = vst [vmem:[#allocation73_spill] sm:$0xff] %v6566_v40  ;;  %v2088_v39 = vrot.slane %v2009_v18, 4  ;;  %5350 = vtanh.f32 %v6566_v40  ;;  %v2090_v48 = vrot.slane %v2080_v31, 4 }
 0x5d1   :  { %v2095_v24 = vadd.f32 %v2087_v27, %v7465_v37  ;;  %v2097_v16 = vadd.f32 %v2089_v6, %v6082_v7 }
 0x5d2   :  { %v2096_v33 = vadd.f32 %v2088_v39, %v7276_v35  ;;  %v2098_v26 = vadd.f32 %v2090_v48, %v6084_v1  ;;  %v2119_v48 = vrot.slane %v6460_v3, 7  ;;  %v7466_v3 = vld [vmem:[#allocation16_spill] sm:$0xff] }
 0x5d3   :  { %v3562_v5 = vmul.f32 -1.442695, %v2095_v24 }
 0x5d4   :  { %v3563_v50 = vmul.f32 -1.442695, %v2096_v33  ;;  %v3564_v63 = vmul.f32 -1.442695, %v2098_v26 }
 0x5d5   :  { %5352 = vpow2.f32 %v3562_v5 }
 0x5d6   :  { %5354 = vpow2.f32 %v3563_v50 }
 0x5d7   :  { %5356 = vpow2.f32 %v3564_v63 }
 0x5d8   :  { %5358 = vtanh.f32 %v2097_v16  ;;  %v7467_v16 = vld [vmem:[#allocation17_spill] sm:$0xff] }
 0x5da   :  { %v5351_v25 = vpop.eup %5350 }
 0x5db   :  { %v1940_v62 = vmul.f32 %v5351_v25, %v5349_v51 }
 0x5dd   :  { %v2127_v18 = vrot.slane %v1940_v62, 4  ;;  %v3377_v40 = vrot.slane %v1940_v62, 5 }
 0x5df   :  { %v5353_v59 = vpop.eup %5352  ;;  %v2130_v27 = vrot.slane %v2127_v18, 4  ;;  %v6575_v39 = vsel %vm123_vm2, %v6457_v45, %v3377_v40  ;;  %v7468_v18 = vld [vmem:[#allocation18_spill] sm:$0xff] }
 0x5e0   :  { %v5355_v31 = vpop.eup %5354  ;;  %v2102_v5 = vadd.f32 1.0, %v5353_v59 }
 0x5e1   :  { %v2108_v24 = vadd.f32 1.0, %v5355_v31  ;;  %2197 = vmatprep.mubr.f32.mxu0 %v2130_v27  ;;  %2268 = vmatprep.mubr.f32.mxu1 %v2130_v27  ;;  %v5357_v56 = vpop.eup %5356  ;;  %v7469_v27 = vld [vmem:[#allocation19_spill] sm:$0xff]  ;;  %v7470_v31 = vld [vmem:[#allocation20_spill] sm:$0xff] }
 0x5e2   :  { %5360 = vrcp.f32 %v2102_v5  ;;  %v5359_v33 = vpop.eup %5358  ;;  %v2115_v6 = vadd.f32 1.0, %v5357_v56  ;;  %v7471_v5 = vld [vmem:[#allocation21_spill] sm:$0xff]  ;;  %v7473_v56 = vld [vmem:[#allocation23_spill] sm:$0xff] }
 0x5e3   :  { %5362 = vrcp.f32 %v2108_v24  ;;  %v7472_v24 = vld [vmem:[#allocation22_spill] sm:$0xff] }
 0x5e4   :  { %5364 = vrcp.f32 %v2115_v6  ;;  %v7479_v6 = vld [vmem:[#allocation29_spill] sm:$0xff] }
 0x5ec   :  { %v5361_v50 = vpop.eup %5360 }
 0x5ed   :  { %v5363_v26 = vpop.eup %5362  ;;  %v2122_v51 = vmul.f32 %v5361_v50, %v5359_v33  ;;  %v7474_v33 = vld [vmem:[#allocation24_spill] sm:$0xff]  ;;  %v7475_v50 = vld [vmem:[#allocation25_spill] sm:$0xff] }
 0x5ee   :  { %v2121_v25 = vmul.f32 %v5363_v26, %v2119_v48  ;;  %v5365_v59 = vpop.eup %5364  ;;  %v7476_v48 = vld [vmem:[#allocation26_spill] sm:$0xff]  ;;  %v7477_v26 = vld [vmem:[#allocation27_spill] sm:$0xff] }
 0x5f0   :  { %v6578_v45 = vadd.f32 %v2122_v51, %v2121_v25  ;;  %v7478_v51 = vld [vmem:[#allocation28_spill] sm:$0xff]  ;;  %v7480_v25 = vld [vmem:[#allocation30_spill] sm:$0xff] }
 0x5f2   :  { %5366 = vtanh.f32 %v6578_v45 }
 0x5fc   :  { %v5367_v40 = vpop.eup %5366 }
 0x5fd   :  { %v2125_v62 = vmul.f32 %v5367_v40, %v5365_v59  ;;  %v7481_v59 = vld [vmem:[#allocation31_spill] sm:$0xff]  ;;  %v7482_v40 = vld [vmem:[#allocation32_spill] sm:$0xff] }
 0x5ff   :  { %v2129_v63 = vrot.slane %v2125_v62, 4  ;;  %v7483_v62 = vld [vmem:[#allocation33_spill] sm:$0xff] }
 0x601   :  { %2198 = vmatmul.mubr.f32.vlgmr.msra.gmra.mrb[18].mxu0 %v2129_v63  ;;  %2269 = vmatmul.mubr.f32.vlgmr.msra.gmra.mrb[22].mxu1 %v2129_v63 }
 0x602   :  { %4618 = vmatpush1.bf16.msra.mxu0 %v5664_v8  ;;  %4650 = vmatpush1.bf16.msra.mxu1 %v5803_v41 }
 0x603   :  { %4620 = vmatprep.subr.bf16.mxu0 %v5666_v9  ;;  %4652 = vmatprep.subr.bf16.mxu1 %v5809_v44 }
 0x604   :  { %2363 = vmatprep.mubr.f32.mxu0 %v7214_v15  ;;  %2434 = vmatprep.mubr.f32.mxu1 %v7214_v15 }
 0x606   :  { %4622 = vmatpush1.bf16.msra.mxu0 %v5686_v17  ;;  %4654 = vmatpush1.bf16.msra.mxu1 %v5816_v52 }
 0x607   :  { %4624 = vmatprep.subr.bf16.mxu0 %v5694_v22  ;;  %4656 = vmatprep.subr.bf16.mxu1 %v5822_v54 }
 0x60a   :  { %4626 = vmatpush1.bf16.msra.mxu0 %v5726_v34  ;;  %4658 = vmatpush1.bf16.msra.mxu1 %v5827_v60 }
 0x60b   :  { %4628 = vmatprep.subr.bf16.mxu0 %v5733_v38  ;;  %4660 = vmatprep.subr.bf16.mxu1 %v5830_v61 }
 0x60e   :  { %4630 = vmatpush1.bf16.msra.mxu0 %v5748_v49  ;;  %4662 = vmatpush1.bf16.msra.mxu1 %v5834_v2 }
 0x60f   :  { %4632 = vmatprep.subr.bf16.mxu0 %v5767_v58  ;;  %4664 = vmatprep.subr.bf16.mxu1 %v5838_v4 }
 0x612   :  { %4634 = vmatpush1.bf16.msra.mxu0 %v5779_v12  ;;  %4666 = vmatpush1.bf16.msra.mxu1 %v5841_v13 }
 0x613   :  { %4636 = vmatprep.subr.bf16.mxu0 %v5790_v23  ;;  %4668 = vmatprep.subr.bf16.mxu1 %v5844_v14 }
 0x616   :  { %4638 = vmatpush1.bf16.msra.mxu0 %v5794_v28  ;;  %4670 = vmatpush1.bf16.msra.mxu1 %v5847_v20 }
 0x617   :  { %4640 = vmatprep.subr.bf16.mxu0 %v5799_v32  ;;  %4672 = vmatprep.subr.bf16.mxu1 %v5850_v21 }
 0x61a   :  { %4642 = vmatpush1.bf16.msra.mxu0 %v5805_v42  ;;  %4674 = vmatpush1.bf16.msra.mxu1 %v5853_v29 }
 0x61b   :  { %4644 = vmatprep.subr.bf16.mxu0 %v5811_v46  ;;  %4676 = vmatprep.subr.bf16.mxu1 %v5856_v30 }
 0x61e   :  { %4646 = vmatpush1.bf16.msra.mxu0 %v5818_v53  ;;  %4678 = vmatpush1.bf16.msra.mxu1 %v5859_v36 }
 0x61f   :  { %4680 = vmatprep.subr.bf16.mxu0 %v5865_v43  ;;  %4744 = vmatprep.subr.bf16.mxu1 %v5867_v47 }
 0x621   :  { %2364 = vmatmul.mubr.f32.vlgmr.msra.gmra.mrb[20].mxu0 %v2129_v63  ;;  %2435 = vmatmul.mubr.f32.vlgmr.msra.gmra.mrb[24].mxu1 %v2129_v63  ;;  %v7484_v63 = vld [vmem:[#allocation34_spill] sm:$0xff] }
 0x622   :  { %4682 = vmatpush1.bf16.msra.mxu0 %v5871_v55  ;;  %4746 = vmatpush1.bf16.msra.mxu1 %v5873_v57 }
 0x623   :  { %4684 = vmatprep.subr.bf16.mxu0 %v5877_v0  ;;  %4748 = vmatprep.subr.bf16.mxu1 %v5879_v10 }
 0x626   :  { %4686 = vmatpush1.bf16.msra.mxu0 %v5881_v11  ;;  %4750 = vmatpush1.bf16.msra.mxu1 %v5884_v19 }
 0x627   :  { %4688 = vmatprep.subr.bf16.mxu0 %v7466_v3  ;;  %4752 = vmatprep.subr.bf16.mxu1 %v7467_v16 }
 0x62a   :  { %4690 = vmatpush1.bf16.msra.mxu0 %v7468_v18  ;;  %4754 = vmatpush1.bf16.msra.mxu1 %v7469_v27 }
 0x62b   :  { %4692 = vmatprep.subr.bf16.mxu0 %v7470_v31  ;;  %4756 = vmatprep.subr.bf16.mxu1 %v7471_v5  ;;  %v7525_v5 = vld [vmem:[#allocation75_spill] sm:$0xff] }
 0x62e   :  { %4694 = vmatpush1.bf16.msra.mxu0 %v7472_v24  ;;  %4758 = vmatpush1.bf16.msra.mxu1 %v7473_v56  ;;  %v7524_v56 = vld [vmem:[#allocation74_spill] sm:$0xff] }
 0x62f   :  { %4696 = vmatprep.subr.bf16.mxu0 %v7474_v33  ;;  %4760 = vmatprep.subr.bf16.mxu1 %v7475_v50  ;;  %v7485_v33 = vld [vmem:[#allocation35_spill] sm:$0xff]  ;;  %v7486_v50 = vld [vmem:[#allocation36_spill] sm:$0xff] }
 0x632   :  { %4698 = vmatpush1.bf16.msra.mxu0 %v7476_v48  ;;  %4762 = vmatpush1.bf16.msra.mxu1 %v7477_v26  ;;  %v7487_v48 = vld [vmem:[#allocation37_spill] sm:$0xff]  ;;  %v7488_v26 = vld [vmem:[#allocation38_spill] sm:$0xff] }
 0x633   :  { %4700 = vmatprep.subr.bf16.mxu0 %v7478_v51  ;;  %4764 = vmatprep.subr.bf16.mxu1 %v7479_v6  ;;  %v7489_v51 = vld [vmem:[#allocation39_spill] sm:$0xff]  ;;  %v7490_v6 = vld [vmem:[#allocation40_spill] sm:$0xff] }
 0x636   :  { %4702 = vmatpush1.bf16.msra.mxu0 %v7480_v25  ;;  %4766 = vmatpush1.bf16.msra.mxu1 %v7481_v59  ;;  %v7491_v25 = vld [vmem:[#allocation41_spill] sm:$0xff]  ;;  %v7492_v59 = vld [vmem:[#allocation42_spill] sm:$0xff] }
 0x637   :  { %4704 = vmatprep.subr.bf16.mxu0 %v7482_v40  ;;  %4768 = vmatprep.subr.bf16.mxu1 %v7483_v62  ;;  %v7493_v40 = vld [vmem:[#allocation43_spill] sm:$0xff]  ;;  %v7494_v62 = vld [vmem:[#allocation44_spill] sm:$0xff] }
 0x63a   :  { %4706 = vmatpush1.bf16.msra.mxu0 %v7484_v63  ;;  %4770 = vmatpush1.bf16.msra.mxu1 %v7485_v33  ;;  %v7495_v63 = vld [vmem:[#allocation45_spill] sm:$0xff]  ;;  %v7496_v33 = vld [vmem:[#allocation46_spill] sm:$0xff] }
 0x63b   :  { %4708 = vmatprep.subr.bf16.mxu0 %v7486_v50  ;;  %4772 = vmatprep.subr.bf16.mxu1 %v7487_v48  ;;  %v7497_v50 = vld [vmem:[#allocation47_spill] sm:$0xff]  ;;  %v7498_v48 = vld [vmem:[#allocation48_spill] sm:$0xff] }
 0x63e   :  { %4710 = vmatpush1.bf16.msra.mxu0 %v7488_v26  ;;  %4774 = vmatpush1.bf16.msra.mxu1 %v7489_v51  ;;  %v7499_v26 = vld [vmem:[#allocation49_spill] sm:$0xff]  ;;  %v7500_v51 = vld [vmem:[#allocation50_spill] sm:$0xff] }
 0x63f   :  { %4712 = vmatprep.subr.bf16.mxu0 %v7490_v6  ;;  %4776 = vmatprep.subr.bf16.mxu1 %v7491_v25  ;;  %v7501_v6 = vld [vmem:[#allocation51_spill] sm:$0xff]  ;;  %v7502_v25 = vld [vmem:[#allocation52_spill] sm:$0xff] }
 0x642   :  { %4714 = vmatpush1.bf16.msra.mxu0 %v7492_v59  ;;  %4778 = vmatpush1.bf16.msra.mxu1 %v7493_v40  ;;  %v7503_v59 = vld [vmem:[#allocation53_spill] sm:$0xff]  ;;  %v7504_v40 = vld [vmem:[#allocation54_spill] sm:$0xff] }
 0x643   :  { %4716 = vmatprep.subr.bf16.mxu0 %v7494_v62  ;;  %4780 = vmatprep.subr.bf16.mxu1 %v7495_v63  ;;  %v7505_v62 = vld [vmem:[#allocation55_spill] sm:$0xff]  ;;  %v7506_v63 = vld [vmem:[#allocation56_spill] sm:$0xff] }
 0x646   :  { %4718 = vmatpush1.bf16.msra.mxu0 %v7496_v33  ;;  %4782 = vmatpush1.bf16.msra.mxu1 %v7497_v50  ;;  %v7507_v33 = vld [vmem:[#allocation57_spill] sm:$0xff]  ;;  %v7508_v50 = vld [vmem:[#allocation58_spill] sm:$0xff] }
 0x647   :  { %4720 = vmatprep.subr.bf16.mxu0 %v7498_v48  ;;  %4784 = vmatprep.subr.bf16.mxu1 %v7499_v26  ;;  %v7509_v48 = vld [vmem:[#allocation59_spill] sm:$0xff]  ;;  %v7510_v26 = vld [vmem:[#allocation60_spill] sm:$0xff] }
 0x64a   :  { %4722 = vmatpush1.bf16.msra.mxu0 %v7500_v51  ;;  %4786 = vmatpush1.bf16.msra.mxu1 %v7501_v6  ;;  %v7511_v51 = vld [vmem:[#allocation61_spill] sm:$0xff]  ;;  %v7512_v6 = vld [vmem:[#allocation62_spill] sm:$0xff] }
 0x64b   :  { %4724 = vmatprep.subr.bf16.mxu0 %v7502_v25  ;;  %4788 = vmatprep.subr.bf16.mxu1 %v7503_v59  ;;  %v7513_v25 = vld [vmem:[#allocation63_spill] sm:$0xff]  ;;  %v7514_v59 = vld [vmem:[#allocation64_spill] sm:$0xff] }
 0x64e   :  { %4726 = vmatpush1.bf16.msra.mxu0 %v7504_v40  ;;  %4790 = vmatpush1.bf16.msra.mxu1 %v7505_v62  ;;  %v7515_v40 = vld [vmem:[#allocation65_spill] sm:$0xff]  ;;  %v7516_v62 = vld [vmem:[#allocation66_spill] sm:$0xff] }
 0x64f   :  { %4728 = vmatprep.subr.bf16.mxu0 %v7506_v63  ;;  %4792 = vmatprep.subr.bf16.mxu1 %v7507_v33  ;;  %v7517_v63 = vld [vmem:[#allocation67_spill] sm:$0xff]  ;;  %v7518_v33 = vld [vmem:[#allocation68_spill] sm:$0xff] }
 0x652   :  { %4730 = vmatpush1.bf16.msra.mxu0 %v7508_v50  ;;  %4794 = vmatpush1.bf16.msra.mxu1 %v7509_v48  ;;  %v7519_v50 = vld [vmem:[#allocation69_spill] sm:$0xff]  ;;  %v7520_v48 = vld [vmem:[#allocation70_spill] sm:$0xff] }
 0x653   :  { %4732 = vmatprep.subr.bf16.mxu0 %v7510_v26  ;;  %4796 = vmatprep.subr.bf16.mxu1 %v7511_v51  ;;  %v7521_v26 = vld [vmem:[#allocation71_spill] sm:$0xff]  ;;  %v7522_v51 = vld [vmem:[#allocation14_spill] sm:$0xff] }
 0x656   :  { %4734 = vmatpush1.bf16.msra.mxu0 %v7512_v6  ;;  %4798 = vmatpush1.bf16.msra.mxu1 %v7513_v25  ;;  %v7523_v6 = vld [vmem:[#allocation15_spill] sm:$0xff] }
 0x657   :  { %4736 = vmatprep.subr.bf16.mxu0 %v7514_v59  ;;  %4800 = vmatprep.subr.bf16.mxu1 %v7515_v40 }
 0x65a   :  { %4738 = vmatpush1.bf16.msra.mxu0 %v7516_v62  ;;  %4802 = vmatpush1.bf16.msra.mxu1 %v7517_v63 }
 0x65b   :  { %4740 = vmatprep.subr.bf16.mxu0 %v7518_v33  ;;  %4804 = vmatprep.subr.bf16.mxu1 %v7519_v50  ;;  %v7526_v50 = vld [vmem:[#allocation76_spill] sm:$0xff] }
 0x65e   :  { %4742 = vmatpush1.bf16.msra.mxu0 %v7520_v48  ;;  %4806 = vmatpush1.bf16.msra.mxu1 %v7521_v26  ;;  %v7527_v26 = vld [vmem:[#allocation77_spill] sm:$0xff] }
 0x65f   :  { %4808 = vmatprep.subr.bf16.mxu0 %v7522_v51  ;;  %4840 = vmatprep.subr.bf16.mxu1 %v7523_v6 }
 0x6d4   :  { %v2199_v25 = vpop.f32.mrb[18].mxu0  ;;  %v2270_v59 = vpop.f32.mrb[22].mxu1 }
 0x6d5   :  { %v2200_v40 = vadd.f32 %v2199_v25, %v7524_v56  ;;  %v2201_v24 = vpop.f32.mrb[19].mxu0  ;;  %v2272_v62 = vpop.f32.mrb[23].mxu1  ;;  %v2271_v18 = vadd.f32 %v2270_v59, %v7527_v26 }
 0x6d6   :  { %v2202_v63 = vadd.f32 %v2201_v24, %v7525_v5  ;;  %v2273_v48 = vadd.f32 %v2272_v62, %v7526_v50 }
 0x6d7   :  { %v3565_v31 = vmul.f32 -1.442695, %v2200_v40 }
 0x6d8   :  { %v3566_v33 = vmul.f32 -1.442695, %v2202_v63  ;;  %v3567_v27 = vmul.f32 -1.442695, %v2273_v48 }
 0x6d9   :  { %5368 = vpow2.f32 %v3565_v31 }
 0x6da   :  { %5370 = vpow2.f32 %v3566_v33  ;;  %v7528_v33 = vld [vmem:[#allocation73_spill] sm:$0xff] }
 0x6db   :  { %5372 = vpow2.f32 %v3567_v27 }
 0x6dc   :  { %5374 = vtanh.f32 %v2271_v18 }
 0x6e3   :  { %v5369_v51 = vpop.eup %5368 }
 0x6e4   :  { %v5371_v16 = vpop.eup %5370  ;;  %v2278_v6 = vadd.f32 1.0, %v5369_v51 }
 0x6e5   :  { %v2284_v3 = vadd.f32 1.0, %v5371_v16  ;;  %v5373_v25 = vpop.eup %5372 }
 0x6e6   :  { %5376 = vrcp.f32 %v2278_v6  ;;  %v5375_v56 = vpop.eup %5374  ;;  %v2291_v31 = vadd.f32 1.0, %v5373_v25 }
 0x6e7   :  { %5378 = vrcp.f32 %v2284_v3 }
 0x6e8   :  { %5380 = vrcp.f32 %v2291_v31 }
 0x6f0   :  { %v5377_v24 = vpop.eup %5376 }
 0x6f1   :  { %v5379_v40 = vpop.eup %5378  ;;  %v2295_v63 = vmul.f32 %v5377_v24, %v5375_v56 }
 0x6f2   :  { %v2294_v5 = vmul.f32 %v5379_v40, %v7528_v33  ;;  %v5381_v24 = vpop.eup %5380 }
 0x6f4   :  { %v6684_v62 = vadd.f32 %v2295_v63, %v2294_v5  ;;  %v2365_v48 = vpop.f32.mrb[20].mxu0  ;;  %v2436_v59 = vpop.f32.mrb[24].mxu1 }
 0x6f5   :  { %v2445_v26 = vrot.slane %v2365_v48, 3  ;;  %v2367_v51 = vpop.f32.mrb[21].mxu0  ;;  %v2438_v27 = vpop.f32.mrb[25].mxu1  ;;  %v2447_v40 = vrot.slane %v2436_v59, 3 }
 0x6f6   :  { %7529 = vst [vmem:[#allocation78_spill] sm:$0xff] %v6684_v62  ;;  %v2446_v18 = vrot.slane %v2367_v51, 3  ;;  %5382 = vtanh.f32 %v6684_v62  ;;  %v2448_v25 = vrot.slane %v2438_v27, 3 }
 0x6f7   :  { %v2453_v3 = vadd.f32 %v2445_v26, %v7465_v37  ;;  %v2455_v48 = vadd.f32 %v2447_v40, %v6082_v7 }
 0x6f8   :  { %v2454_v16 = vadd.f32 %v2446_v18, %v7276_v35  ;;  %v2456_v5 = vadd.f32 %v2448_v25, %v6084_v1  ;;  %v2477_v25 = vrot.slane %v6578_v45, 7  ;;  %v7530_v45 = vld [vmem:[#allocation16_spill] sm:$0xff] }
 0x6f9   :  { %v3568_v6 = vmul.f32 -1.442695, %v2453_v3 }
 0x6fa   :  { %v3569_v56 = vmul.f32 -1.442695, %v2454_v16  ;;  %v3570_v33 = vmul.f32 -1.442695, %v2456_v5 }
 0x6fb   :  { %5384 = vpow2.f32 %v3568_v6 }
 0x6fc   :  { %5386 = vpow2.f32 %v3569_v56 }
 0x6fd   :  { %5388 = vpow2.f32 %v3570_v33 }
 0x6fe   :  { %5390 = vtanh.f32 %v2455_v48  ;;  %v7531_v48 = vld [vmem:[#allocation17_spill] sm:$0xff] }
 0x700   :  { %v5383_v63 = vpop.eup %5382 }
 0x701   :  { %v2298_v31 = vmul.f32 %v5383_v63, %v5381_v24 }
 0x703   :  { %v2485_v51 = vrot.slane %v2298_v31, 3  ;;  %v3379_v62 = vrot.slane %v2298_v31, 4 }
 0x705   :  { %v5385_v50 = vpop.eup %5384  ;;  %v2488_v26 = vrot.slane %v2485_v51, 5  ;;  %v6693_v18 = vsel %vm125_vm3, %v6575_v39, %v3379_v62  ;;  %v7532_v51 = vld [vmem:[#allocation18_spill] sm:$0xff] }
 0x706   :  { %v5387_v27 = vpop.eup %5386  ;;  %v2460_v3 = vadd.f32 1.0, %v5385_v50 }
 0x707   :  { %v2466_v16 = vadd.f32 1.0, %v5387_v27  ;;  %2555 = vmatprep.mubr.f32.mxu0 %v2488_v26  ;;  %2626 = vmatprep.mubr.f32.mxu1 %v2488_v26  ;;  %v5389_v59 = vpop.eup %5388  ;;  %v7533_v26 = vld [vmem:[#allocation19_spill] sm:$0xff]  ;;  %v7534_v27 = vld [vmem:[#allocation20_spill] sm:$0xff] }
 0x708   :  { %5392 = vrcp.f32 %v2460_v3  ;;  %v5391_v6 = vpop.eup %5390  ;;  %v2473_v40 = vadd.f32 1.0, %v5389_v59  ;;  %v7535_v3 = vld [vmem:[#allocation21_spill] sm:$0xff]  ;;  %v7537_v59 = vld [vmem:[#allocation23_spill] sm:$0xff] }
 0x709   :  { %5394 = vrcp.f32 %v2466_v16  ;;  %v7536_v16 = vld [vmem:[#allocation22_spill] sm:$0xff] }
 0x70a   :  { %5396 = vrcp.f32 %v2473_v40  ;;  %v7543_v40 = vld [vmem:[#allocation29_spill] sm:$0xff] }
 0x712   :  { %v5393_v56 = vpop.eup %5392 }
 0x713   :  { %v5395_v5 = vpop.eup %5394  ;;  %v2480_v24 = vmul.f32 %v5393_v56, %v5391_v6  ;;  %v7538_v6 = vld [vmem:[#allocation24_spill] sm:$0xff]  ;;  %v7539_v56 = vld [vmem:[#allocation25_spill] sm:$0xff] }
 0x714   :  { %v2479_v63 = vmul.f32 %v5395_v5, %v2477_v25  ;;  %v5397_v50 = vpop.eup %5396  ;;  %v7540_v25 = vld [vmem:[#allocation26_spill] sm:$0xff]  ;;  %v7541_v5 = vld [vmem:[#allocation27_spill] sm:$0xff] }
 0x716   :  { %v6696_v39 = vadd.f32 %v2480_v24, %v2479_v63  ;;  %v7542_v24 = vld [vmem:[#allocation28_spill] sm:$0xff]  ;;  %v7544_v63 = vld [vmem:[#allocation30_spill] sm:$0xff] }
 0x718   :  { %5398 = vtanh.f32 %v6696_v39 }
 0x722   :  { %v5399_v62 = vpop.eup %5398 }
 0x723   :  { %v2483_v31 = vmul.f32 %v5399_v62, %v5397_v50  ;;  %v7545_v50 = vld [vmem:[#allocation31_spill] sm:$0xff]  ;;  %v7546_v62 = vld [vmem:[#allocation32_spill] sm:$0xff] }
 0x725   :  { %v2487_v33 = vrot.slane %v2483_v31, 5  ;;  %v7547_v31 = vld [vmem:[#allocation33_spill] sm:$0xff] }
 0x727   :  { %2556 = vmatmul.mubr.f32.vlgmr.msra.gmra.mrb[22].mxu0 %v2487_v33  ;;  %2627 = vmatmul.mubr.f32.vlgmr.msra.gmra.mrb[26].mxu1 %v2487_v33 }
 0x728   :  { %4810 = vmatpush1.bf16.msra.mxu0 %v5664_v8  ;;  %4842 = vmatpush1.bf16.msra.mxu1 %v5803_v41 }
 0x729   :  { %4812 = vmatprep.subr.bf16.mxu0 %v5666_v9  ;;  %4844 = vmatprep.subr.bf16.mxu1 %v5809_v44 }
 0x72a   :  { %2721 = vmatprep.mubr.f32.mxu0 %v7214_v15  ;;  %2792 = vmatprep.mubr.f32.mxu1 %v7214_v15 }
 0x72c   :  { %4814 = vmatpush1.bf16.msra.mxu0 %v5686_v17  ;;  %4846 = vmatpush1.bf16.msra.mxu1 %v5816_v52 }
 0x72d   :  { %4816 = vmatprep.subr.bf16.mxu0 %v5694_v22  ;;  %4848 = vmatprep.subr.bf16.mxu1 %v5822_v54 }
 0x730   :  { %4818 = vmatpush1.bf16.msra.mxu0 %v5726_v34  ;;  %4850 = vmatpush1.bf16.msra.mxu1 %v5827_v60 }
 0x731   :  { %4820 = vmatprep.subr.bf16.mxu0 %v5733_v38  ;;  %4852 = vmatprep.subr.bf16.mxu1 %v5830_v61 }
 0x734   :  { %4822 = vmatpush1.bf16.msra.mxu0 %v5748_v49  ;;  %4854 = vmatpush1.bf16.msra.mxu1 %v5834_v2 }
 0x735   :  { %4824 = vmatprep.subr.bf16.mxu0 %v5767_v58  ;;  %4856 = vmatprep.subr.bf16.mxu1 %v5838_v4 }
 0x738   :  { %4826 = vmatpush1.bf16.msra.mxu0 %v5779_v12  ;;  %4858 = vmatpush1.bf16.msra.mxu1 %v5841_v13 }
 0x739   :  { %4828 = vmatprep.subr.bf16.mxu0 %v5790_v23  ;;  %4860 = vmatprep.subr.bf16.mxu1 %v5844_v14 }
 0x73c   :  { %4830 = vmatpush1.bf16.msra.mxu0 %v5794_v28  ;;  %4862 = vmatpush1.bf16.msra.mxu1 %v5847_v20 }
 0x73d   :  { %4832 = vmatprep.subr.bf16.mxu0 %v5799_v32  ;;  %4864 = vmatprep.subr.bf16.mxu1 %v5850_v21 }
 0x740   :  { %4834 = vmatpush1.bf16.msra.mxu0 %v5805_v42  ;;  %4866 = vmatpush1.bf16.msra.mxu1 %v5853_v29 }
 0x741   :  { %4836 = vmatprep.subr.bf16.mxu0 %v5811_v46  ;;  %4868 = vmatprep.subr.bf16.mxu1 %v5856_v30 }
 0x744   :  { %4838 = vmatpush1.bf16.msra.mxu0 %v5818_v53  ;;  %4870 = vmatpush1.bf16.msra.mxu1 %v5859_v36 }
 0x745   :  { %4872 = vmatprep.subr.bf16.mxu0 %v5865_v43  ;;  %4936 = vmatprep.subr.bf16.mxu1 %v5867_v47 }
 0x747   :  { %2722 = vmatmul.mubr.f32.vlgmr.msra.gmra.mrb[24].mxu0 %v2487_v33  ;;  %2793 = vmatmul.mubr.f32.vlgmr.msra.gmra.mrb[28].mxu1 %v2487_v33  ;;  %v7548_v33 = vld [vmem:[#allocation34_spill] sm:$0xff] }
 0x748   :  { %4874 = vmatpush1.bf16.msra.mxu0 %v5871_v55  ;;  %4938 = vmatpush1.bf16.msra.mxu1 %v5873_v57 }
 0x749   :  { %4876 = vmatprep.subr.bf16.mxu0 %v5877_v0  ;;  %4940 = vmatprep.subr.bf16.mxu1 %v5879_v10 }
 0x74c   :  { %4878 = vmatpush1.bf16.msra.mxu0 %v5881_v11  ;;  %4942 = vmatpush1.bf16.msra.mxu1 %v5884_v19 }
 0x74d   :  { %4880 = vmatprep.subr.bf16.mxu0 %v7530_v45  ;;  %4944 = vmatprep.subr.bf16.mxu1 %v7531_v48 }
 0x750   :  { %4882 = vmatpush1.bf16.msra.mxu0 %v7532_v51  ;;  %4946 = vmatpush1.bf16.msra.mxu1 %v7533_v26 }
 0x751   :  { %4884 = vmatprep.subr.bf16.mxu0 %v7534_v27  ;;  %4948 = vmatprep.subr.bf16.mxu1 %v7535_v3  ;;  %v7589_v3 = vld [vmem:[#allocation75_spill] sm:$0xff] }
 0x754   :  { %4886 = vmatpush1.bf16.msra.mxu0 %v7536_v16  ;;  %4950 = vmatpush1.bf16.msra.mxu1 %v7537_v59  ;;  %v7588_v59 = vld [vmem:[#allocation74_spill] sm:$0xff] }
 0x755   :  { %4888 = vmatprep.subr.bf16.mxu0 %v7538_v6  ;;  %4952 = vmatprep.subr.bf16.mxu1 %v7539_v56  ;;  %v7549_v6 = vld [vmem:[#allocation35_spill] sm:$0xff]  ;;  %v7550_v56 = vld [vmem:[#allocation36_spill] sm:$0xff] }
 0x758   :  { %4890 = vmatpush1.bf16.msra.mxu0 %v7540_v25  ;;  %4954 = vmatpush1.bf16.msra.mxu1 %v7541_v5  ;;  %v7551_v25 = vld [vmem:[#allocation37_spill] sm:$0xff]  ;;  %v7552_v5 = vld [vmem:[#allocation38_spill] sm:$0xff] }
 0x759   :  { %4892 = vmatprep.subr.bf16.mxu0 %v7542_v24  ;;  %4956 = vmatprep.subr.bf16.mxu1 %v7543_v40  ;;  %v7553_v24 = vld [vmem:[#allocation39_spill] sm:$0xff]  ;;  %v7554_v40 = vld [vmem:[#allocation40_spill] sm:$0xff] }
 0x75c   :  { %4894 = vmatpush1.bf16.msra.mxu0 %v7544_v63  ;;  %4958 = vmatpush1.bf16.msra.mxu1 %v7545_v50  ;;  %v7555_v63 = vld [vmem:[#allocation41_spill] sm:$0xff]  ;;  %v7556_v50 = vld [vmem:[#allocation42_spill] sm:$0xff] }
 0x75d   :  { %4896 = vmatprep.subr.bf16.mxu0 %v7546_v62  ;;  %4960 = vmatprep.subr.bf16.mxu1 %v7547_v31  ;;  %v7557_v62 = vld [vmem:[#allocation43_spill] sm:$0xff]  ;;  %v7558_v31 = vld [vmem:[#allocation44_spill] sm:$0xff] }
 0x760   :  { %4898 = vmatpush1.bf16.msra.mxu0 %v7548_v33  ;;  %4962 = vmatpush1.bf16.msra.mxu1 %v7549_v6  ;;  %v7559_v33 = vld [vmem:[#allocation45_spill] sm:$0xff]  ;;  %v7560_v6 = vld [vmem:[#allocation46_spill] sm:$0xff] }
 0x761   :  { %4900 = vmatprep.subr.bf16.mxu0 %v7550_v56  ;;  %4964 = vmatprep.subr.bf16.mxu1 %v7551_v25  ;;  %v7561_v56 = vld [vmem:[#allocation47_spill] sm:$0xff]  ;;  %v7562_v25 = vld [vmem:[#allocation48_spill] sm:$0xff] }
 0x764   :  { %4902 = vmatpush1.bf16.msra.mxu0 %v7552_v5  ;;  %4966 = vmatpush1.bf16.msra.mxu1 %v7553_v24  ;;  %v7563_v5 = vld [vmem:[#allocation49_spill] sm:$0xff]  ;;  %v7564_v24 = vld [vmem:[#allocation50_spill] sm:$0xff] }
 0x765   :  { %4904 = vmatprep.subr.bf16.mxu0 %v7554_v40  ;;  %4968 = vmatprep.subr.bf16.mxu1 %v7555_v63  ;;  %v7565_v40 = vld [vmem:[#allocation51_spill] sm:$0xff]  ;;  %v7566_v63 = vld [vmem:[#allocation52_spill] sm:$0xff] }
 0x768   :  { %4906 = vmatpush1.bf16.msra.mxu0 %v7556_v50  ;;  %4970 = vmatpush1.bf16.msra.mxu1 %v7557_v62  ;;  %v7567_v50 = vld [vmem:[#allocation53_spill] sm:$0xff]  ;;  %v7568_v62 = vld [vmem:[#allocation54_spill] sm:$0xff] }
 0x769   :  { %4908 = vmatprep.subr.bf16.mxu0 %v7558_v31  ;;  %4972 = vmatprep.subr.bf16.mxu1 %v7559_v33  ;;  %v7569_v31 = vld [vmem:[#allocation55_spill] sm:$0xff]  ;;  %v7570_v33 = vld [vmem:[#allocation56_spill] sm:$0xff] }
 0x76c   :  { %4910 = vmatpush1.bf16.msra.mxu0 %v7560_v6  ;;  %4974 = vmatpush1.bf16.msra.mxu1 %v7561_v56  ;;  %v7571_v6 = vld [vmem:[#allocation57_spill] sm:$0xff]  ;;  %v7572_v56 = vld [vmem:[#allocation58_spill] sm:$0xff] }
 0x76d   :  { %4912 = vmatprep.subr.bf16.mxu0 %v7562_v25  ;;  %4976 = vmatprep.subr.bf16.mxu1 %v7563_v5  ;;  %v7573_v25 = vld [vmem:[#allocation59_spill] sm:$0xff]  ;;  %v7574_v5 = vld [vmem:[#allocation60_spill] sm:$0xff] }
 0x770   :  { %4914 = vmatpush1.bf16.msra.mxu0 %v7564_v24  ;;  %4978 = vmatpush1.bf16.msra.mxu1 %v7565_v40  ;;  %v7575_v24 = vld [vmem:[#allocation61_spill] sm:$0xff]  ;;  %v7576_v40 = vld [vmem:[#allocation62_spill] sm:$0xff] }
 0x771   :  { %4916 = vmatprep.subr.bf16.mxu0 %v7566_v63  ;;  %4980 = vmatprep.subr.bf16.mxu1 %v7567_v50  ;;  %v7577_v63 = vld [vmem:[#allocation63_spill] sm:$0xff]  ;;  %v7578_v50 = vld [vmem:[#allocation64_spill] sm:$0xff] }
 0x774   :  { %4918 = vmatpush1.bf16.msra.mxu0 %v7568_v62  ;;  %4982 = vmatpush1.bf16.msra.mxu1 %v7569_v31  ;;  %v7579_v62 = vld [vmem:[#allocation65_spill] sm:$0xff]  ;;  %v7580_v31 = vld [vmem:[#allocation66_spill] sm:$0xff] }
 0x775   :  { %4920 = vmatprep.subr.bf16.mxu0 %v7570_v33  ;;  %4984 = vmatprep.subr.bf16.mxu1 %v7571_v6  ;;  %v7581_v33 = vld [vmem:[#allocation67_spill] sm:$0xff]  ;;  %v7582_v6 = vld [vmem:[#allocation68_spill] sm:$0xff] }
 0x778   :  { %4922 = vmatpush1.bf16.msra.mxu0 %v7572_v56  ;;  %4986 = vmatpush1.bf16.msra.mxu1 %v7573_v25  ;;  %v7583_v56 = vld [vmem:[#allocation69_spill] sm:$0xff]  ;;  %v7584_v25 = vld [vmem:[#allocation70_spill] sm:$0xff] }
 0x779   :  { %4924 = vmatprep.subr.bf16.mxu0 %v7574_v5  ;;  %4988 = vmatprep.subr.bf16.mxu1 %v7575_v24  ;;  %v7585_v5 = vld [vmem:[#allocation71_spill] sm:$0xff]  ;;  %v7586_v24 = vld [vmem:[#allocation14_spill] sm:$0xff] }
 0x77c   :  { %4926 = vmatpush1.bf16.msra.mxu0 %v7576_v40  ;;  %4990 = vmatpush1.bf16.msra.mxu1 %v7577_v63  ;;  %v7587_v40 = vld [vmem:[#allocation15_spill] sm:$0xff] }
 0x77d   :  { %4928 = vmatprep.subr.bf16.mxu0 %v7578_v50  ;;  %4992 = vmatprep.subr.bf16.mxu1 %v7579_v62 }
 0x780   :  { %4930 = vmatpush1.bf16.msra.mxu0 %v7580_v31  ;;  %4994 = vmatpush1.bf16.msra.mxu1 %v7581_v33 }
 0x781   :  { %4932 = vmatprep.subr.bf16.mxu0 %v7582_v6  ;;  %4996 = vmatprep.subr.bf16.mxu1 %v7583_v56  ;;  %v7590_v56 = vld [vmem:[#allocation76_spill] sm:$0xff] }
 0x784   :  { %4934 = vmatpush1.bf16.msra.mxu0 %v7584_v25  ;;  %4998 = vmatpush1.bf16.msra.mxu1 %v7585_v5  ;;  %v7591_v5 = vld [vmem:[#allocation77_spill] sm:$0xff] }
 0x785   :  { %5000 = vmatprep.subr.bf16.mxu0 %v7586_v24  ;;  %5032 = vmatprep.subr.bf16.mxu1 %v7587_v40 }
 0x7fa   :  { %v2557_v63 = vpop.f32.mrb[22].mxu0  ;;  %v2628_v50 = vpop.f32.mrb[26].mxu1 }
 0x7fb   :  { %v2558_v62 = vadd.f32 %v2557_v63, %v7588_v59  ;;  %v2559_v16 = vpop.f32.mrb[23].mxu0  ;;  %v2630_v31 = vpop.f32.mrb[27].mxu1  ;;  %v2629_v51 = vadd.f32 %v2628_v50, %v7591_v5 }
 0x7fc   :  { %v2560_v33 = vadd.f32 %v2559_v16, %v7589_v3  ;;  %v2631_v25 = vadd.f32 %v2630_v31, %v7590_v56 }
 0x7fd   :  { %v3571_v27 = vmul.f32 -1.442695, %v2558_v62 }
 0x7fe   :  { %v3572_v6 = vmul.f32 -1.442695, %v2560_v33  ;;  %v3573_v26 = vmul.f32 -1.442695, %v2631_v25 }
 0x7ff   :  { %5400 = vpow2.f32 %v3571_v27 }
 0x800   :  { %5402 = vpow2.f32 %v3572_v6  ;;  %v7592_v6 = vld [vmem:[#allocation78_spill] sm:$0xff] }
 0x801   :  { %5404 = vpow2.f32 %v3573_v26 }
 0x802   :  { %5406 = vtanh.f32 %v2629_v51 }
 0x809   :  { %v5401_v24 = vpop.eup %5400 }
 0x80a   :  { %v5403_v48 = vpop.eup %5402  ;;  %v2636_v40 = vadd.f32 1.0, %v5401_v24 }
 0x80b   :  { %v2642_v45 = vadd.f32 1.0, %v5403_v48  ;;  %v5405_v63 = vpop.eup %5404 }
 0x80c   :  { %5408 = vrcp.f32 %v2636_v40  ;;  %v5407_v59 = vpop.eup %5406  ;;  %v2649_v27 = vadd.f32 1.0, %v5405_v63 }
 0x80d   :  { %5410 = vrcp.f32 %v2642_v45 }
 0x80e   :  { %5412 = vrcp.f32 %v2649_v27 }
 0x816   :  { %v5409_v16 = vpop.eup %5408 }
 0x817   :  { %v5411_v62 = vpop.eup %5410  ;;  %v2653_v33 = vmul.f32 %v5409_v16, %v5407_v59 }
 0x818   :  { %v2652_v3 = vmul.f32 %v5411_v62, %v7592_v6  ;;  %v5413_v16 = vpop.eup %5412 }
 0x81a   :  { %v6802_v31 = vadd.f32 %v2653_v33, %v2652_v3  ;;  %v2723_v25 = vpop.f32.mrb[24].mxu0  ;;  %v2794_v50 = vpop.f32.mrb[28].mxu1 }
 0x81b   :  { %v2803_v5 = vrot.slane %v2723_v25, 2  ;;  %v2725_v24 = vpop.f32.mrb[25].mxu0  ;;  %v2796_v26 = vpop.f32.mrb[29].mxu1  ;;  %v2805_v62 = vrot.slane %v2794_v50, 2 }
 0x81c   :  { %7593 = vst [vmem:[#allocation72_spill] sm:$0xff] %v6802_v31  ;;  %v2804_v51 = vrot.slane %v2725_v24, 2  ;;  %5414 = vtanh.f32 %v6802_v31  ;;  %v2806_v63 = vrot.slane %v2796_v26, 2 }
 0x81d   :  { %v2811_v45 = vadd.f32 %v2803_v5, %v7465_v37  ;;  %v2813_v25 = vadd.f32 %v2805_v62, %v6082_v7 }
 0x81e   :  { %v2812_v48 = vadd.f32 %v2804_v51, %v7276_v35  ;;  %v2814_v3 = vadd.f32 %v2806_v63, %v6084_v1  ;;  %v2835_v63 = vrot.slane %v6696_v39, 7  ;;  %v7632_v39 = vld [vmem:[#allocation54_spill] sm:$0xff] }
 0x81f   :  { %v3574_v40 = vmul.f32 -1.442695, %v2811_v45 }
 0x820   :  { %v3575_v59 = vmul.f32 -1.442695, %v2812_v48  ;;  %v3576_v6 = vmul.f32 -1.442695, %v2814_v3 }
 0x821   :  { %5416 = vpow2.f32 %v3574_v40 }
 0x822   :  { %5418 = vpow2.f32 %v3575_v59 }
 0x823   :  { %5420 = vpow2.f32 %v3576_v6 }
 0x824   :  { %5422 = vtanh.f32 %v2813_v25  ;;  %v7633_v25 = vld [vmem:[#allocation55_spill] sm:$0xff] }
 0x826   :  { %v5415_v33 = vpop.eup %5414 }
 0x827   :  { %v2656_v27 = vmul.f32 %v5415_v33, %v5413_v16 }
 0x829   :  { %v2843_v24 = vrot.slane %v2656_v27, 2  ;;  %v3381_v31 = vrot.slane %v2656_v27, 3 }
 0x82b   :  { %v5417_v56 = vpop.eup %5416  ;;  %v2846_v5 = vrot.slane %v2843_v24, 6  ;;  %v6811_v51 = vsel %vm127_vm4, %v6693_v18, %v3381_v31  ;;  %v7634_v24 = vld [vmem:[#allocation56_spill] sm:$0xff] }
 0x82c   :  { %v5419_v26 = vpop.eup %5418  ;;  %v2818_v45 = vadd.f32 1.0, %v5417_v56 }
 0x82d   :  { %v2824_v48 = vadd.f32 1.0, %v5419_v26  ;;  %2913 = vmatprep.mubr.f32.mxu0 %v2846_v5  ;;  %2984 = vmatprep.mubr.f32.mxu1 %v2846_v5  ;;  %v5421_v50 = vpop.eup %5420  ;;  %v7635_v5 = vld [vmem:[#allocation57_spill] sm:$0xff]  ;;  %v7636_v26 = vld [vmem:[#allocation58_spill] sm:$0xff] }
 0x82e   :  { %5424 = vrcp.f32 %v2818_v45  ;;  %v5423_v40 = vpop.eup %5422  ;;  %v2831_v62 = vadd.f32 1.0, %v5421_v50  ;;  %v7637_v45 = vld [vmem:[#allocation59_spill] sm:$0xff]  ;;  %v7639_v50 = vld [vmem:[#allocation61_spill] sm:$0xff] }
 0x82f   :  { %5426 = vrcp.f32 %v2824_v48  ;;  %v7638_v48 = vld [vmem:[#allocation60_spill] sm:$0xff] }
 0x830   :  { %5428 = vrcp.f32 %v2831_v62  ;;  %v7645_v62 = vld [vmem:[#allocation67_spill] sm:$0xff] }
 0x838   :  { %v5425_v59 = vpop.eup %5424 }
 0x839   :  { %v5427_v3 = vpop.eup %5426  ;;  %v2838_v16 = vmul.f32 %v5425_v59, %v5423_v40  ;;  %v7640_v40 = vld [vmem:[#allocation62_spill] sm:$0xff]  ;;  %v7641_v59 = vld [vmem:[#allocation63_spill] sm:$0xff] }
 0x83a   :  { %v2837_v33 = vmul.f32 %v5427_v3, %v2835_v63  ;;  %v5429_v56 = vpop.eup %5428  ;;  %v7642_v63 = vld [vmem:[#allocation64_spill] sm:$0xff]  ;;  %v7643_v3 = vld [vmem:[#allocation65_spill] sm:$0xff] }
 0x83c   :  { %v6814_v18 = vadd.f32 %v2838_v16, %v2837_v33  ;;  %v7644_v16 = vld [vmem:[#allocation66_spill] sm:$0xff]  ;;  %v7646_v33 = vld [vmem:[#allocation68_spill] sm:$0xff] }
 0x83e   :  { %5430 = vtanh.f32 %v6814_v18 }
 0x848   :  { %v5431_v31 = vpop.eup %5430 }
 0x849   :  { %v2841_v27 = vmul.f32 %v5431_v31, %v5429_v56  ;;  %v7647_v56 = vld [vmem:[#allocation69_spill] sm:$0xff]  ;;  %v7648_v31 = vld [vmem:[#allocation70_spill] sm:$0xff] }
 0x84b   :  { %v2845_v6 = vrot.slane %v2841_v27, 6  ;;  %v7649_v27 = vld [vmem:[#allocation71_spill] sm:$0xff] }
 0x84d   :  { %2914 = vmatmul.mubr.f32.vlgmr.msra.gmra.mrb[26].mxu0 %v2845_v6  ;;  %2985 = vmatmul.mubr.f32.vlgmr.msra.gmra.mrb[30].mxu1 %v2845_v6 }
 0x84e   :  { %5002 = vmatpush1.bf16.msra.mxu0 %v5664_v8  ;;  %5034 = vmatpush1.bf16.msra.mxu1 %v5803_v41  ;;  %v7594_v8 = vld [vmem:[#allocation16_spill] sm:$0xff] }
 0x84f   :  { %5004 = vmatprep.subr.bf16.mxu0 %v5666_v9  ;;  %5036 = vmatprep.subr.bf16.mxu1 %v5809_v44  ;;  %v7595_v9 = vld [vmem:[#allocation17_spill] sm:$0xff]  ;;  %v7606_v41 = vld [vmem:[#allocation28_spill] sm:$0xff]  ;;  %v7608_v44 = vld [vmem:[#allocation30_spill] sm:$0xff] }
 0x850   :  { %3079 = vmatprep.mubr.f32.mxu0 %v7214_v15  ;;  %3150 = vmatprep.mubr.f32.mxu1 %v7214_v15 }
 0x852   :  { %5006 = vmatpush1.bf16.msra.mxu0 %v5686_v17  ;;  %5038 = vmatpush1.bf16.msra.mxu1 %v5816_v52  ;;  %v7596_v17 = vld [vmem:[#allocation18_spill] sm:$0xff]  ;;  %v7610_v52 = vld [vmem:[#allocation32_spill] sm:$0xff] }
 0x853   :  { %5008 = vmatprep.subr.bf16.mxu0 %v5694_v22  ;;  %5040 = vmatprep.subr.bf16.mxu1 %v5822_v54  ;;  %v7597_v22 = vld [vmem:[#allocation19_spill] sm:$0xff]  ;;  %v7612_v54 = vld [vmem:[#allocation34_spill] sm:$0xff] }
 0x856   :  { %5010 = vmatpush1.bf16.msra.mxu0 %v5726_v34  ;;  %5042 = vmatpush1.bf16.msra.mxu1 %v5827_v60  ;;  %v7598_v34 = vld [vmem:[#allocation20_spill] sm:$0xff]  ;;  %v7613_v60 = vld [vmem:[#allocation35_spill] sm:$0xff] }
 0x857   :  { %5012 = vmatprep.subr.bf16.mxu0 %v5733_v38  ;;  %5044 = vmatprep.subr.bf16.mxu1 %v5830_v61  ;;  %v7599_v38 = vld [vmem:[#allocation21_spill] sm:$0xff]  ;;  %v7614_v61 = vld [vmem:[#allocation36_spill] sm:$0xff] }
 0x85a   :  { %5014 = vmatpush1.bf16.msra.mxu0 %v5748_v49  ;;  %5046 = vmatpush1.bf16.msra.mxu1 %v5834_v2  ;;  %v7600_v49 = vld [vmem:[#allocation22_spill] sm:$0xff]  ;;  %v7615_v2 = vld [vmem:[#allocation37_spill] sm:$0xff] }
 0x85b   :  { %5016 = vmatprep.subr.bf16.mxu0 %v5767_v58  ;;  %5048 = vmatprep.subr.bf16.mxu1 %v5838_v4  ;;  %v7601_v58 = vld [vmem:[#allocation23_spill] sm:$0xff]  ;;  %v7616_v4 = vld [vmem:[#allocation38_spill] sm:$0xff] }
 0x85e   :  { %5018 = vmatpush1.bf16.msra.mxu0 %v5779_v12  ;;  %5050 = vmatpush1.bf16.msra.mxu1 %v5841_v13  ;;  %v7602_v12 = vld [vmem:[#allocation24_spill] sm:$0xff]  ;;  %v7617_v13 = vld [vmem:[#allocation39_spill] sm:$0xff] }
 0x85f   :  { %5020 = vmatprep.subr.bf16.mxu0 %v5790_v23  ;;  %5052 = vmatprep.subr.bf16.mxu1 %v5844_v14  ;;  %v7603_v23 = vld [vmem:[#allocation25_spill] sm:$0xff]  ;;  %v7618_v14 = vld [vmem:[#allocation40_spill] sm:$0xff] }
 0x862   :  { %5022 = vmatpush1.bf16.msra.mxu0 %v5794_v28  ;;  %5054 = vmatpush1.bf16.msra.mxu1 %v5847_v20  ;;  %v7604_v28 = vld [vmem:[#allocation26_spill] sm:$0xff]  ;;  %v7619_v20 = vld [vmem:[#allocation41_spill] sm:$0xff] }
 0x863   :  { %5024 = vmatprep.subr.bf16.mxu0 %v5799_v32  ;;  %5056 = vmatprep.subr.bf16.mxu1 %v5850_v21  ;;  %v7605_v32 = vld [vmem:[#allocation27_spill] sm:$0xff]  ;;  %v7620_v21 = vld [vmem:[#allocation42_spill] sm:$0xff] }
 0x866   :  { %5026 = vmatpush1.bf16.msra.mxu0 %v5805_v42  ;;  %5058 = vmatpush1.bf16.msra.mxu1 %v5853_v29  ;;  %v7607_v42 = vld [vmem:[#allocation29_spill] sm:$0xff]  ;;  %v7621_v29 = vld [vmem:[#allocation43_spill] sm:$0xff] }
 0x867   :  { %5028 = vmatprep.subr.bf16.mxu0 %v5811_v46  ;;  %5060 = vmatprep.subr.bf16.mxu1 %v5856_v30  ;;  %v7609_v46 = vld [vmem:[#allocation31_spill] sm:$0xff]  ;;  %v7622_v30 = vld [vmem:[#allocation44_spill] sm:$0xff] }
 0x86a   :  { %5030 = vmatpush1.bf16.msra.mxu0 %v5818_v53  ;;  %5062 = vmatpush1.bf16.msra.mxu1 %v5859_v36  ;;  %v7611_v53 = vld [vmem:[#allocation33_spill] sm:$0xff] }
 0x86b   :  { %5064 = vmatprep.subr.bf16.mxu0 %v5865_v43  ;;  %5128 = vmatprep.subr.bf16.mxu1 %v5867_v47  ;;  %v7623_v36 = vld [vmem:[#allocation45_spill] sm:$0xff]  ;;  %v7624_v43 = vld [vmem:[#allocation46_spill] sm:$0xff]  ;;  %v7625_v47 = vld [vmem:[#allocation47_spill] sm:$0xff] }
 0x86d   :  { %3080 = vmatmul.mubr.f32.vlgmr.msra.gmra.mrb[28].mxu0 %v2845_v6  ;;  %3151 = vmatmul.mubr.f32.vlgmr.msra.gmra.mrb[32].mxu1 %v2845_v6 }
 0x86e   :  { %5066 = vmatpush1.bf16.msra.mxu0 %v5871_v55  ;;  %5130 = vmatpush1.bf16.msra.mxu1 %v5873_v57  ;;  %v7626_v55 = vld [vmem:[#allocation48_spill] sm:$0xff]  ;;  %v7627_v57 = vld [vmem:[#allocation49_spill] sm:$0xff] }
 0x86f   :  { %5068 = vmatprep.subr.bf16.mxu0 %v5877_v0  ;;  %5132 = vmatprep.subr.bf16.mxu1 %v5879_v10  ;;  %v7628_v0 = vld [vmem:[#allocation50_spill] sm:$0xff]  ;;  %v7629_v10 = vld [vmem:[#allocation51_spill] sm:$0xff] }
 0x872   :  { %5070 = vmatpush1.bf16.msra.mxu0 %v5881_v11  ;;  %5134 = vmatpush1.bf16.msra.mxu1 %v5884_v19  ;;  %v7630_v11 = vld [vmem:[#allocation52_spill] sm:$0xff]  ;;  %v7631_v19 = vld [vmem:[#allocation53_spill] sm:$0xff] }
 0x873   :  { %5072 = vmatprep.subr.bf16.mxu0 %v7594_v8  ;;  %5136 = vmatprep.subr.bf16.mxu1 %v7595_v9  ;;  %v7650_v9 = vld [vmem:[#allocation74_spill] sm:$0xff] }
 0x876   :  { %5074 = vmatpush1.bf16.msra.mxu0 %v7596_v17  ;;  %5138 = vmatpush1.bf16.msra.mxu1 %v7597_v22 }
 0x877   :  { %5076 = vmatprep.subr.bf16.mxu0 %v7598_v34  ;;  %5140 = vmatprep.subr.bf16.mxu1 %v7599_v38  ;;  %v7651_v38 = vld [vmem:[#allocation75_spill] sm:$0xff] }
 0x87a   :  { %5078 = vmatpush1.bf16.msra.mxu0 %v7600_v49  ;;  %5142 = vmatpush1.bf16.msra.mxu1 %v7601_v58 }
 0x87b   :  { %5080 = vmatprep.subr.bf16.mxu0 %v7602_v12  ;;  %5144 = vmatprep.subr.bf16.mxu1 %v7603_v23  ;;  %v7652_v23 = vld [vmem:[#allocation76_spill] sm:$0xff] }
 0x87e   :  { %5082 = vmatpush1.bf16.msra.mxu0 %v7604_v28  ;;  %5146 = vmatpush1.bf16.msra.mxu1 %v7605_v32 }
 0x87f   :  { %5084 = vmatprep.subr.bf16.mxu0 %v7606_v41  ;;  %5148 = vmatprep.subr.bf16.mxu1 %v7607_v42  ;;  %v7653_v41 = vld [vmem:[#allocation77_spill] sm:$0xff] }
 0x882   :  { %5086 = vmatpush1.bf16.msra.mxu0 %v7608_v44  ;;  %5150 = vmatpush1.bf16.msra.mxu1 %v7609_v46 }
 0x883   :  { %5088 = vmatprep.subr.bf16.mxu0 %v7610_v52  ;;  %5152 = vmatprep.subr.bf16.mxu1 %v7611_v53 }
 0x886   :  { %5090 = vmatpush1.bf16.msra.mxu0 %v7612_v54  ;;  %5154 = vmatpush1.bf16.msra.mxu1 %v7613_v60 }
 0x887   :  { %5092 = vmatprep.subr.bf16.mxu0 %v7614_v61  ;;  %5156 = vmatprep.subr.bf16.mxu1 %v7615_v2 }
 0x88a   :  { %5094 = vmatpush1.bf16.msra.mxu0 %v7616_v4  ;;  %5158 = vmatpush1.bf16.msra.mxu1 %v7617_v13 }
 0x88b   :  { %5096 = vmatprep.subr.bf16.mxu0 %v7618_v14  ;;  %5160 = vmatprep.subr.bf16.mxu1 %v7619_v20  ;;  %v7654_v14 = vld [vmem:[#allocation72_spill] sm:$0xff] }
 0x88e   :  { %5098 = vmatpush1.bf16.msra.mxu0 %v7620_v21  ;;  %5162 = vmatpush1.bf16.msra.mxu1 %v7621_v29 }
 0x88f   :  { %5100 = vmatprep.subr.bf16.mxu0 %v7622_v30  ;;  %5164 = vmatprep.subr.bf16.mxu1 %v7623_v36 }
 0x892   :  { %5102 = vmatpush1.bf16.msra.mxu0 %v7624_v43  ;;  %5166 = vmatpush1.bf16.msra.mxu1 %v7625_v47 }
 0x893   :  { %5104 = vmatprep.subr.bf16.mxu0 %v7626_v55  ;;  %5168 = vmatprep.subr.bf16.mxu1 %v7627_v57 }
 0x896   :  { %5106 = vmatpush1.bf16.msra.mxu0 %v7628_v0  ;;  %5170 = vmatpush1.bf16.msra.mxu1 %v7629_v10 }
 0x897   :  { %5108 = vmatprep.subr.bf16.mxu0 %v7630_v11  ;;  %5172 = vmatprep.subr.bf16.mxu1 %v7631_v19 }
 0x89a   :  { %5110 = vmatpush1.bf16.msra.mxu0 %v7632_v39  ;;  %5174 = vmatpush1.bf16.msra.mxu1 %v7633_v25 }
 0x89b   :  { %5112 = vmatprep.subr.bf16.mxu0 %v7634_v24  ;;  %5176 = vmatprep.subr.bf16.mxu1 %v7635_v5 }
 0x89e   :  { %5114 = vmatpush1.bf16.msra.mxu0 %v7636_v26  ;;  %5178 = vmatpush1.bf16.msra.mxu1 %v7637_v45 }
 0x89f   :  { %5116 = vmatprep.subr.bf16.mxu0 %v7638_v48  ;;  %5180 = vmatprep.subr.bf16.mxu1 %v7639_v50 }
 0x8a2   :  { %5118 = vmatpush1.bf16.msra.mxu0 %v7640_v40  ;;  %5182 = vmatpush1.bf16.msra.mxu1 %v7641_v59 }
 0x8a3   :  { %5120 = vmatprep.subr.bf16.mxu0 %v7642_v63  ;;  %5184 = vmatprep.subr.bf16.mxu1 %v7643_v3 }
 0x8a6   :  { %5122 = vmatpush1.bf16.msra.mxu0 %v7644_v16  ;;  %5186 = vmatpush1.bf16.msra.mxu1 %v7645_v62 }
 0x8a7   :  { %5124 = vmatprep.subr.bf16.mxu0 %v7646_v33  ;;  %5188 = vmatprep.subr.bf16.mxu1 %v7647_v56  ;;  %v3193_v33 = vrot.slane %v6814_v18, 7  ;;  %v3396_v18 = vld [vmem:[%s7011_s7 + $0x8] sm:$0xff] }
 0x8aa   :  { %5126 = vmatpush1.bf16.msra.mxu0 %v7648_v31  ;;  %5190 = vmatpush1.bf16.msra.mxu1 %v7649_v27 }
 0x920   :  { %v2915_v6 = vpop.f32.mrb[26].mxu0  ;;  %v2986_v8 = vpop.f32.mrb[30].mxu1 }
 0x921   :  { %v2916_v17 = vadd.f32 %v2915_v6, %v7650_v9  ;;  %v2917_v22 = vpop.f32.mrb[27].mxu0  ;;  %v2988_v34 = vpop.f32.mrb[31].mxu1  ;;  %v2987_v42 = vadd.f32 %v2986_v8, %v7653_v41 }
 0x922   :  { %v2918_v49 = vadd.f32 %v2917_v22, %v7651_v38  ;;  %v2989_v28 = vadd.f32 %v2988_v34, %v7652_v23 }
 0x923   :  { %v3577_v58 = vmul.f32 -1.442695, %v2916_v17 }
 0x924   :  { %v3578_v12 = vmul.f32 -1.442695, %v2918_v49  ;;  %v3579_v32 = vmul.f32 -1.442695, %v2989_v28  ;;  %v3395_v49 = vld [vmem:[%s7011_s7] sm:$0xff]  ;;  %v3397_v28 = vld [vmem:[%s7011_s7 + $0x10] sm:$0xff] }
 0x925   :  { %5432 = vpow2.f32 %v3577_v58  ;;  %v5192_v58 = vpack.c.bf16 %v3396_v18, %v3395_v49 }
 0x926   :  { %5434 = vpow2.f32 %v3578_v12  ;;  %v5576_v12 = vmov 0.0|0.0  }
 0x927   :  { %5436 = vpow2.f32 %v3579_v32  ;;  %5191 = vmatprep.subr.bf16.mxu0 %v5576_v12  ;;  %v3398_v32 = vld [vmem:[%s7011_s7 + $0x18] sm:$0xff] }
 0x928   :  { %5438 = vtanh.f32 %v2987_v42  ;;  %v5195_v42 = vpack.c.bf16 %v3398_v32, %v3397_v28 }
 0x92f   :  { %v5433_v44 = vpop.eup %5432 }
 0x930   :  { %v5435_v46 = vpop.eup %5434  ;;  %v2994_v52 = vadd.f32 1.0, %v5433_v44  ;;  %v3399_v44 = vld [vmem:[%s7011_s7 + $0x20] sm:$0xff] }
 0x931   :  { %v3000_v53 = vadd.f32 1.0, %v5435_v46  ;;  %v5437_v54 = vpop.eup %5436  ;;  %v3400_v46 = vld [vmem:[%s7011_s7 + $0x28] sm:$0xff] }
 0x932   :  { %5440 = vrcp.f32 %v2994_v52  ;;  %v5439_v60 = vpop.eup %5438  ;;  %v3007_v13 = vadd.f32 1.0, %v5437_v54  ;;  %v5198_v52 = vpack.c.bf16 %v3400_v46, %v3399_v44  ;;  %v3402_v54 = vld [vmem:[%s7011_s7 + $0x38] sm:$0xff] }
 0x933   :  { %5442 = vrcp.f32 %v3000_v53  ;;  %v3401_v53 = vld [vmem:[%s7011_s7 + $0x30] sm:$0xff] }
 0x934   :  { %5444 = vrcp.f32 %v3007_v13  ;;  %v3405_v13 = vld [vmem:[%s7011_s7 + $0x50] sm:$0xff] }
 0x93c   :  { %v5441_v61 = vpop.eup %5440 }
 0x93d   :  { %v5443_v2 = vpop.eup %5442  ;;  %v3011_v4 = vmul.f32 %v5441_v61, %v5439_v60  ;;  %v5201_v60 = vpack.c.bf16 %v3402_v54, %v3401_v53  ;;  %v3403_v61 = vld [vmem:[%s7011_s7 + $0x40] sm:$0xff] }
 0x93e   :  { %v3010_v20 = vmul.f32 %v5443_v2, %v7654_v14  ;;  %v5445_v25 = vpop.eup %5444  ;;  %v3404_v2 = vld [vmem:[%s7011_s7 + $0x48] sm:$0xff]  ;;  %v3406_v14 = vld [vmem:[%s7011_s7 + $0x58] sm:$0xff] }
 0x940   :  { %v6918_v21 = vadd.f32 %v3011_v4, %v3010_v20  ;;  %v3081_v29 = vpop.f32.mrb[28].mxu0  ;;  %v3152_v30 = vpop.f32.mrb[32].mxu1  ;;  %v5204_v4 = vpack.c.bf16 %v3404_v2, %v3403_v61  ;;  %v5207_v20 = vpack.c.bf16 %v3406_v14, %v3405_v13 }
 0x941   :  { %v3161_v36 = vrot.slane %v3081_v29, 1  ;;  %v3083_v43 = vpop.f32.mrb[29].mxu0  ;;  %v3154_v47 = vpop.f32.mrb[33].mxu1  ;;  %v3163_v24 = vrot.slane %v3152_v30, 1  ;;  %v3407_v29 = vld [vmem:[%s7011_s7 + $0x60] sm:$0xff]  ;;  %v3408_v30 = vld [vmem:[%s7011_s7 + $0x68] sm:$0xff] }
 0x942   :  { %v3162_v55 = vrot.slane %v3083_v43, 1  ;;  %5446 = vtanh.f32 %v6918_v21  ;;  %v3164_v19 = vrot.slane %v3154_v47, 1  ;;  %v3409_v43 = vld [vmem:[%s7011_s7 + $0x70] sm:$0xff] }
 0x943   :  { %v3169_v57 = vadd.f32 %v3161_v36, %v7465_v37  ;;  %v3171_v48 = vadd.f32 %v3163_v24, %v6082_v7  ;;  %v5210_v36 = vpack.c.bf16 %v3408_v30, %v3407_v29 }
 0x944   :  { %v3170_v0 = vadd.f32 %v3162_v55, %v7276_v35  ;;  %v3172_v39 = vadd.f32 %v3164_v19, %v6084_v1 }
 0x945   :  { %v3580_v10 = vmul.f32 -1.442695, %v3169_v57 }
 0x946   :  { %v3581_v11 = vmul.f32 -1.442695, %v3170_v0  ;;  %v3582_v45 = vmul.f32 -1.442695, %v3172_v39 }
 0x947   :  { %5448 = vpow2.f32 %v3580_v10 }
 0x948   :  { %5450 = vpow2.f32 %v3581_v11 }
 0x949   :  { %5452 = vpow2.f32 %v3582_v45 }
 0x94a   :  { %5454 = vtanh.f32 %v3171_v48 }
 0x94c   :  { %v5447_v5 = vpop.eup %5446 }
 0x94d   :  { %v3014_v26 = vmul.f32 %v5447_v5, %v5445_v25 }
 0x94f   :  { %v3201_v50 = vrot.slane %v3014_v26, 1  ;;  %v3383_v40 = vrot.slane %v3014_v26, 2 }
 0x951   :  { %v5449_v59 = vpop.eup %5448  ;;  %v3204_v37 = vrot.slane %v3201_v50, 7  ;;  %v6927_v35 = vsel %vm129_vm5, %v6811_v51, %v3383_v40 }
 0x952   :  { %v5451_v63 = vpop.eup %5450  ;;  %v3176_v3 = vadd.f32 1.0, %v5449_v59 }
 0x953   :  { %v3182_v1 = vadd.f32 1.0, %v5451_v63  ;;  %3271 = vmatprep.mubr.f32.mxu0 %v3204_v37  ;;  %3342 = vmatprep.mubr.f32.mxu1 %v3204_v37  ;;  %v5453_v16 = vpop.eup %5452 }
 0x954   :  { %5456 = vrcp.f32 %v3176_v3  ;;  %v5455_v62 = vpop.eup %5454  ;;  %v3189_v27 = vadd.f32 1.0, %v5453_v16 }
 0x955   :  { %5458 = vrcp.f32 %v3182_v1 }
 0x956   :  { %5460 = vrcp.f32 %v3189_v27 }
 0x95e   :  { %v5457_v7 = vpop.eup %5456 }
 0x95f   :  { %v5459_v56 = vpop.eup %5458  ;;  %v3196_v31 = vmul.f32 %v5457_v7, %v5455_v62 }
 0x960   :  { %v3195_v6 = vmul.f32 %v5459_v56, %v3193_v33  ;;  %v5461_v8 = vpop.eup %5460  ;;  %v3586_v56 = vld [vmem:[%s7012_s8] ss:$0 sm:$0xff]  ;;  %s5578_s8 = smov [#allocation9]  }
 0x961   :  { %s3510_s18 = sshll.u32 %s5578_s8, 4  ;;  %s3511_s18 = int_to_ptr.vmem [resolvable:$true] %s3510_s18 }
 0x962   :  { %v3197_v51 = vadd.f32 %v3196_v31, %v3195_v6  ;;  %s5540_s26 = scalar_lea.vmem %s3511_s18, 128  ;;  %p5545_p8 = scmp.lt.s32.totalorder %s3511_s18, %s3511_s18 }
 0x963   :  { %p5541_p7 = scmp.ne.s32.totalorder %s3511_s18, %s5540_s26  ;;  %p5546_p9 = scmp.lt.s32.totalorder %s5540_s26, %s5540_s26 }
 0x964   :  { %5462 = vtanh.f32 %v3197_v51 }
 0x965   :  { %p5547_p10 = por %p5546_p9, %p5545_p8 }
 0x967   :  { %p5548_p11 = pnand %p5547_p10, %p5541_p7 }
 0x96e   :  { %v5463_v17 = vpop.eup %5462 }
 0x96f   :  { %v3199_v22 = vmul.f32 %v5463_v17, %v5461_v8 }
 0x971   :  { %v3203_v34 = vrot.slane %v3199_v22, 7 }
 0x973   :  { %3272 = vmatmul.mubr.f32.vlgmr.msra.gmra.mrb[30].mxu0 %v3203_v34  ;;  %3343 = vmatmul.mubr.f32.vlgmr.msra.gmra.mrb[34].mxu1 %v3203_v34 }
 0x974   :  { %5193 = vmatpush3.bf16.msra.mxu0 %v5192_v58  ;;  %3636 = vmatprep.mubr.msk.f32.mxu0 %vm5577_vm8, %v7214_v15  ;;  %v3410_v15 = vld [vmem:[%s7011_s7 + $0x78] sm:$0xff] }
 0x975   :  { %5194 = vmatprep.subr.bf16.mxu0 %v5576_v12  ;;  %v5213_v47 = vpack.c.bf16 %v3410_v15, %v3409_v43 }
 0x978   :  { %5196 = vmatpush3.bf16.msra.mxu0 %v5195_v42 }
 0x979   :  { %5197 = vmatprep.subr.bf16.mxu0 %v5576_v12 }
 0x97c   :  { %5199 = vmatpush3.bf16.msra.mxu0 %v5198_v52 }
 0x97d   :  { %5200 = vmatprep.subr.bf16.mxu0 %v5576_v12 }
 0x980   :  { %5202 = vmatpush3.bf16.msra.mxu0 %v5201_v60 }
 0x981   :  { %5203 = vmatprep.subr.bf16.mxu0 %v5576_v12 }
 0x984   :  { %5205 = vmatpush3.bf16.msra.mxu0 %v5204_v4 }
 0x985   :  { %5206 = vmatprep.subr.bf16.mxu0 %v5576_v12 }
 0x988   :  { %5208 = vmatpush3.bf16.msra.mxu0 %v5207_v20 }
 0x989   :  { %5209 = vmatprep.subr.bf16.mxu0 %v5576_v12 }
 0x98c   :  { %5211 = vmatpush3.bf16.msra.mxu0 %v5210_v36 }
 0x98d   :  { %5212 = vmatprep.subr.bf16.mxu0 %v5576_v12 }
 0x990   :  { %5214 = vmatpush3.bf16.msra.mxu0 %v5213_v47 }
 0xa46   :  { %v3273_v55 = vpop.f32.mrb[30].mxu0  ;;  %v3344_v57 = vpop.f32.mrb[34].mxu1 }
 0xa47   :  { %v3274_v0 = vadd.f32 %v3273_v55, %v7650_v9  ;;  %v3275_v10 = vpop.f32.mrb[31].mxu0  ;;  %v3346_v11 = vpop.f32.mrb[35].mxu1  ;;  %v3345_v26 = vadd.f32 %v3344_v57, %v7653_v41 }
 0xa48   :  { %v3276_v19 = vadd.f32 %v3275_v10, %v7651_v38  ;;  %v3347_v24 = vadd.f32 %v3346_v11, %v7652_v23 }
 0xa49   :  { %v3583_v39 = vmul.f32 -1.442695, %v3274_v0 }
 0xa4a   :  { %v3584_v25 = vmul.f32 -1.442695, %v3276_v19  ;;  %v3585_v5 = vmul.f32 -1.442695, %v3347_v24 }
 0xa4b   :  { %5464 = vpow2.f32 %v3583_v39 }
 0xa4c   :  { %5466 = vpow2.f32 %v3584_v25 }
 0xa4d   :  { %5468 = vpow2.f32 %v3585_v5 }
 0xa4e   :  { %5470 = vtanh.f32 %v3345_v26 }
 0xa55   :  { %v5465_v45 = vpop.eup %5464 }
 0xa56   :  { %v5467_v48 = vpop.eup %5466  ;;  %v3352_v50 = vadd.f32 1.0, %v5465_v45 }
 0xa57   :  { %v3358_v40 = vadd.f32 1.0, %v5467_v48  ;;  %v5469_v9 = vpop.eup %5468 }
 0xa58   :  { %5472 = vrcp.f32 %v3352_v50  ;;  %v5471_v59 = vpop.eup %5470  ;;  %v3365_v3 = vadd.f32 1.0, %v5469_v9 }
 0xa59   :  { %5474 = vrcp.f32 %v3358_v40 }
 0xa5a   :  { %5476 = vrcp.f32 %v3365_v3 }
 0xa62   :  { %v5473_v38 = vpop.eup %5472 }
 0xa63   :  { %v5475_v37 = vpop.eup %5474  ;;  %v3369_v63 = vmul.f32 %v5473_v38, %v5471_v59 }
 0xa64   :  { %v3368_v1 = vmul.f32 %v5475_v37, %v6918_v21  ;;  %v5477_v41 = vpop.eup %5476 }
 0xa66   :  { %v3370_v23 = vadd.f32 %v3369_v63, %v3368_v1 }
 0xa68   :  { %5478 = vtanh.f32 %v3370_v23 }
 0xa72   :  { %v5479_v16 = vpop.eup %5478 }
 0xa73   :  { %v3372_v62 = vmul.f32 %v5479_v16, %v5477_v41 }
 0xa75   :  { %v3386_v7 = vrot.slane %v3372_v62, 1 }
 0xa77   :  { %v3394_v33 = vsel %vm131_vm6, %v6927_v35, %v3386_v7 }
 0xa78   :  { %3637 = vmatmul.mubr.f32.vlgmr.msra.gmra.mrb[32].mxu0 %v3394_v33 }
 0xb4b   :  { %v3484_v31 = vpop.f32.mrb[32].mxu0 }
 0xb4c   :  { %v3485_v27 = vadd.f32 %v3586_v56, %v3484_v31  ;;  %v3638_v6 = vpop.f32.mrb[33].mxu0 }
 0xb4e   :  { %v3488_v21 = vmax.f32 %v3485_v27, 0.0 }
 0xb50   :  { %v3490_v51 = vsel %vm3489_vm9, %v3488_v21, -inf }
 0xb51   :  { %3491 = vmax.xlane.f32.xlu0 %v3490_v51 }
 0xbde   :  { %v3492_v8 = vpop.xlane.xlu0 %3491 }
 0xbdf   :  { %v3493_v17 = vsub.f32 %v3488_v21, %v3492_v8 }
 0xbe1   :  { %v3494_v22 = vmul.f32 1.442695, %v3493_v17 }
 0xbe3   :  { %5480 = vpow2.f32 %v3494_v22 }
 0xbed   :  { %v5481_v34 = vpop.eup %5480 }
 0xbee   :  { %v3496_v35 = vsel %vm3489_vm9, %v5481_v34, 0.0 }
 0xbef   :  { %3497 = vadd.xlane.f32.xlu0 %v3496_v35 }
 0xc7c   :  { %v3498_v49 = vpop.xlane.xlu0 %3497 }
 0xc7d   :  { %5482 = vlog2.f32 %v3498_v49 }
 0xc87   :  { %v5483_v18 = vpop.eup %5482 }
 0xc88   :  { %v3500_v58 = vmul.f32 0.6931472, %v5483_v18 }
 0xc8a   :  { %v3501_v12 = vadd.f32 %v3500_v58, %v3492_v8 }
 0xc8c   :  { %v3502_v28 = vsub.f32 %v3488_v21, %v3501_v12 }
 0xc8e   :  { %3503 = vst.msk [vmem:[#allocation9] sm:$0xff] %vm3489_vm9, %v3502_v28 }
 0xc8f   :  { %5551 = shalt.err (!%p5548_p11)
}
 0xc90   :  { %s5552_s0 = scalar_lea.hbm %s7013_s9, 128 }
 0xc91   :  { %p5553_p12 = scmp.ne.s32.totalorder %s7013_s9, %s5552_s0  ;;  %p5556_p13 = scmp.lt.u32.totalorder %s5552_s0, %s7013_s9 }
 0xc93   :  { %p5558_p0 = pnand %p5556_p13, %p5553_p12 }
 0xc95   :  { %5561 = shalt.err (!%p5558_p0)
}
 0xc96   :  { %3513 = dma.vmem_to_hbm [thread:$0]  %s3511_s18, 128, %s7013_s9, [#allocation4]  }
 0xc97   :  { %5568 = dma.done.wait [#allocation4], 128  }
 0xc98   :  { %5569 = vsyncadd [#allocation4], 4294967168 }
 0xc99   :  { %3517 = vsyncpa [#allocation3], 1 }
 0xc9a   :  { %3518 = vsyncpa [#allocation8], 1 }
 0xc9b   :  { %3519 = vsyncpa [#allocation4], 1 }
 0xc9c   :  { %3520 = vsyncpa [#allocation5], 1 }

</bundles_post_ra>
